<compile_context>
chip_gen: v7x
topology: tpu7x:2x2x1
jax: 0.10.0
libtpu: 0.0.40
codegen_flags: <defaults>
</compile_context>

<pallas_src>
import functools

import jax
import jax.numpy as jnp
from jax.experimental import pallas as pl
from jax.experimental.pallas import tpu as pltpu


B_PAD = 8                            # batch rows padded to one full sublane tile
C_PAD = 128                          # classifier width padded to one full lane tile
GATE_SCALE = (0.5, 0.5, 1.0, 0.5)    # i, f, g, o : sigmoid(z) == 0.5*tanh(0.5*z)+0.5


# ----------------------------------------------------------------------------- kernel
def activity_detection_kernel(x_ref, w_in_ref, b_in_ref, w_hh_ref, w2_ref, b2_ref, out_ref):
    BP = out_ref.shape[0]            # 8   padded batch (one sublane tile)
    T = x_ref.shape[0] // BP         # 15  timesteps
    G = w_hh_ref.shape[1]            # 16H all gates x all streams
    SH = w_hh_ref.shape[0]           # 4H  fused hidden width (4 streams)
    QH = G // 4                      # 4H  one gate group across the 4 streams (== SH)

    # Input-side gate pre-activations for every timestep / stream / direction in ONE bf16 MXU
    # matmul; all biases are folded into the forward half here (added exactly once).
    gx = (jnp.dot(x_ref[...], w_in_ref[...], preferred_element_type=jnp.float32)
          + b_in_ref[...])                                    # (T*8, 2*16H) f32

    w_hh = w_hh_ref[...]                                      # hoisted (bf16)

    h = jnp.zeros((BP, SH), jnp.float32)
    c = jnp.zeros((BP, SH), jnp.float32)

    # 15 serial steps, fully unrolled (static trip count): each step is one (8,4H)@(4H,16H)
    # bf16 MXU matmul + ONE tanh over the whole gate vector (+ tanh(c)); all slices are
    # (8,128)-tile aligned so the per-step reads are plain vreg loads.
    for t in range(T):
        rf = t * BP                  # forward-time streams (fr, fc)
        rr = (T - 1 - t) * BP        # reverse-time streams (rr, rc)
        pre = (gx[rf:rf + BP, :G] + gx[rr:rr + BP, G:]
               + jnp.dot(h.astype(jnp.bfloat16), w_hh, preferred_element_type=jnp.float32))
        th = jnp.tanh(pre)           # i/f/o columns are pre-scaled by 0.5 host-side
        i_g = 0.5 * th[:, 0 * QH:1 * QH] + 0.5
        f_g = 0.5 * th[:, 1 * QH:2 * QH] + 0.5
        g_g = th[:, 2 * QH:3 * QH]
        o_g = 0.5 * th[:, 3 * QH:4 * QH] + 0.5
        c = f_g * c + i_g * g_g
        h = o_g * jnp.tanh(c)

    # h == torch.cat([fhr, rhr, fhc, rhc], dim=1) by construction (padded rows dropped outside).
    logits = (jnp.dot(h.astype(jnp.bfloat16), w2_ref[...], preferred_element_type=jnp.float32)
              + b2_ref[...])
    out_ref[...] = logits.astype(out_ref.dtype)               # (8,128) lane-dense store


# ----------------------------------------------------------------------------- packing
def pack_params(params, F1, F2, H, c_pad=C_PAD):
    """Fold fc11/fc22 into the LSTM input weights and pack all 4 streams (f32).

    Fused gate axis (width 16H), gate-major / stream-minor:
      [ i:(fr,rr,fc,rc) | f:(fr,rr,fc,rc) | g:(fr,rr,fc,rc) | o:(fr,rr,fc,rc) ]
    so the final fused h equals torch.cat([fhr, rhr, fhc, rhc], dim=1).
    w_in has width 2*16H: columns [0,16H) carry the forward-time streams (fr, fc),
    columns [16H,32H) the reverse-time streams (rr, rc); the kernel forms
    gx_fwd[t] + gx_rev[T-1-t], which realises the time reversal with no data flip.
    The i/f/o gate columns of w_in / b_in / w_hh are pre-scaled by 0.5 so
    sigmoid(z) can be evaluated as 0.5*tanh(z_scaled)+0.5 with a single EUP tanh.
    """
    S = 4                        # streams: fr, rr, fc, rc  (torch.cat order)
    G = 4 * S * H                # 16H fused gate width
    Kf = F1 + F2                 # fused feature width [resnet | c3d]

    # (stream idx, half 0=fwd/1=rev, proj W, proj b, w_ih, w_hh, lstm bias, feat row0, rows)
    stream_defs = [
        (0, 0, params["w11"], params["b11"], params["wih_fr"], params["whh_fr"], params["b_fr"], 0,  F1),
        (1, 1, params["w11"], params["b11"], params["wih_rr"], params["whh_rr"], params["b_rr"], 0,  F1),
        (2, 0, params["w22"], params["b22"], params["wih_fc"], params["whh_fc"], params["b_fc"], F1, F2),
        (3, 1, params["w22"], params["b22"], params["wih_rc"], params["whh_rc"], params["b_rc"], F1, F2),
    ]

    w_in = jnp.zeros((Kf, 2 * G), jnp.float32)
    b_in = jnp.zeros((1, 2 * G), jnp.float32)
    w_hh = jnp.zeros((S * H, G), jnp.float32)

    for s, half, pw, pb, wih, whh, b, r0, rlen in stream_defs:
        wx = pw @ wih            # fc11/fc22 folded into the LSTM input weight   (rlen, 4H)
        bx = pb @ wih + b        # folded bias                                   (1, 4H)
        for q in range(4):       # gate order i, f, g, o (PyTorch LSTMCell)
            sc = GATE_SCALE[q]
            c0 = q * S * H + s * H
            w_in = w_in.at[r0:r0 + rlen, half * G + c0: half * G + c0 + H].set(
                sc * wx[:, q * H:(q + 1) * H])
            # all biases live in the forward half so each is added exactly once
            b_in = b_in.at[:, c0:c0 + H].set(sc * bx[:, q * H:(q + 1) * H])
            w_hh = w_hh.at[s * H:(s + 1) * H, c0:c0 + H].set(
                sc * whh[:, q * H:(q + 1) * H])

    C = params["w2"].shape[1]
    w2 = jnp.zeros((S * H, c_pad), jnp.float32).at[:, :C].set(params["w2"])
    b2 = jnp.zeros((1, c_pad), jnp.float32).at[:, :C].set(params["b2"])
    return {"w_in": w_in, "b_in": b_in, "w_hh": w_hh, "w2": w2, "b2": b2}


def to_kernel_operands(packed32):
    """bf16 MXU operands; biases (and f32 accumulation) stay f32."""
    return {"w_in": packed32["w_in"].astype(jnp.bfloat16),
            "b_in": packed32["b_in"],
            "w_hh": packed32["w_hh"].astype(jnp.bfloat16),
            "w2": packed32["w2"].astype(jnp.bfloat16),
            "b2": packed32["b2"]}


def _build_input_slab(resnet_features, c3d_features):
    """Time-major, batch-padded fused feature slab (T*8, F1+F2), f32."""
    B, T, F1 = resnet_features.shape
    F2 = c3d_features.shape[2]
    assert B <= B_PAD
    x = jnp.concatenate([resnet_features, c3d_features], axis=-1)   # (B, T, F1+F2)
    x = jnp.transpose(x, (1, 0, 2))                                 # (T, B, Kf)
    x = jnp.pad(x, ((0, 0), (0, B_PAD - B), (0, 0)))                # (T, 8, Kf)
    return x.reshape(T * B_PAD, F1 + F2)


# ----------------------------------------------------------------------------- wrapper
@functools.partial(jax.jit, static_argnums=(3,))
def activity_detection(resnet_features, c3d_features, kernel_params, num_classes):
    B = resnet_features.shape[0]
    x = _build_input_slab(resnet_features, c3d_features).astype(jnp.bfloat16)

    vmem = pl.BlockSpec(memory_space=pltpu.MemorySpace.VMEM)
    args = (x, kernel_params["w_in"], kernel_params["b_in"], kernel_params["w_hh"],
            kernel_params["w2"], kernel_params["b2"])
    out = pl.pallas_call(
        activity_detection_kernel,
        out_shape=jax.ShapeDtypeStruct((B_PAD, C_PAD), jnp.float32),
        in_specs=[vmem] * len(args),
        out_specs=vmem,
    )(*args)
    return out[:B, :num_classes]


# ----------------------------------------------------------------------------- params
def init_params(key, F1, F2, P, H, C):
    """Deterministic synthetic parameters (PyTorch-style uniform init ranges)."""
    def linear(k, fin, fout):
        bound = 1.0 / (fin ** 0.5)
        kw, kb = jax.random.split(k)
        w = jax.random.uniform(kw, (fin, fout), jnp.float32, -bound, bound)
        b = jax.random.uniform(kb, (1, fout), jnp.float32, -bound, bound)
        return w, b

    def lstm(k, fin, h):
        bound = 1.0 / (h ** 0.5)
        k1, k2, k3, k4 = jax.random.split(k, 4)
        w_ih = jax.random.uniform(k1, (fin, 4 * h), jnp.float32, -bound, bound)
        w_hh = jax.random.uniform(k2, (h, 4 * h), jnp.float32, -bound, bound)
        b_ih = jax.random.uniform(k3, (1, 4 * h), jnp.float32, -bound, bound)
        b_hh = jax.random.uniform(k4, (1, 4 * h), jnp.float32, -bound, bound)
        return w_ih, w_hh, b_ih + b_hh   # biases always appear summed

    k11, k22, kfr, krr, kfc, krc, k2 = jax.random.split(key, 7)
    params = {}
    params["w11"], params["b11"] = linear(k11, F1, P)
    params["w22"], params["b22"] = linear(k22, F2, P)
    params["wih_fr"], params["whh_fr"], params["b_fr"] = lstm(kfr, P, H)
    params["wih_rr"], params["whh_rr"], params["b_rr"] = lstm(krr, P, H)
    params["wih_fc"], params["whh_fc"], params["b_fc"] = lstm(kfc, P, H)
    params["wih_rc"], params["whh_rc"], params["b_rc"] = lstm(krc, P, H)
    params["w2"], params["b2"] = linear(k2, 4 * H, C)
    return params


# ----------------------------------------------------------------------------- references
def activity_detection_reference(resnet_features, c3d_features, params):
    """Straight (unfused) f32 port of the PyTorch forward, for correctness checking."""
    hp = jax.lax.Precision.HIGHEST

    def cell(x, h, c, w_ih, w_hh, b, H):
        g = jnp.dot(x, w_ih, precision=hp) + jnp.dot(h, w_hh, precision=hp) + b
        i = jax.nn.sigmoid(g[:, 0 * H:1 * H])
        f = jax.nn.sigmoid(g[:, 1 * H:2 * H])
        gg = jnp.tanh(g[:, 2 * H:3 * H])
        o = jax.nn.sigmoid(g[:, 3 * H:4 * H])
        c = f * c + i * gg
        return o * jnp.tanh(c), c

    B, T, _ = resnet_features.shape
    H = params["whh_fr"].shape[0]
    out1 = jnp.dot(resnet_features, params["w11"], precision=hp) + params["b11"]
    out2 = jnp.dot(c3d_features, params["w22"], precision=hp) + params["b22"]
    z = jnp.zeros((B, H), jnp.float32)
    fhr, fcr = z, z
    for i in range(T):
        fhr, fcr = cell(out1[:, i], fhr, fcr, params["wih_fr"], params["whh_fr"], params["b_fr"], H)
    rhr, rcr = z, z
    for i in reversed(range(T)):
        rhr, rcr = cell(out1[:, i], rhr, rcr, params["wih_rr"], params["whh_rr"], params["b_rr"], H)
    fhc, fcc = z, z
    for i in range(T):
        fhc, fcc = cell(out2[:, i], fhc, fcc, params["wih_fc"], params["whh_fc"], params["b_fc"], H)
    rhc, rcc = z, z
    for i in reversed(range(T)):
        rhc, rcc = cell(out2[:, i], rhc, rcc, params["wih_rc"], params["whh_rc"], params["b_rc"], H)
    out5 = jnp.concatenate([fhr, rhr, fhc, rhc], axis=1)
    return jnp.dot(out5, params["w2"], precision=hp) + params["b2"]


def fused_forward_f32(resnet_features, c3d_features, packed32, num_classes):
    """Pure-JAX f32 mirror of the fused kernel math — validates the packing/layout
    independently of the bf16 matmul operands used by the kernel."""
    hp = jax.lax.Precision.HIGHEST
    B, T, _ = resnet_features.shape
    x = _build_input_slab(resnet_features, c3d_features)
    G = packed32["w_hh"].shape[1]
    SH = packed32["w_hh"].shape[0]
    QH = G // 4
    gx = jnp.dot(x, packed32["w_in"], precision=hp) + packed32["b_in"]
    h = jnp.zeros((B_PAD, SH), jnp.float32)
    c = jnp.zeros((B_PAD, SH), jnp.float32)
    for t in range(T):
        rf, rr = t * B_PAD, (T - 1 - t) * B_PAD
        pre = (gx[rf:rf + B_PAD, :G] + gx[rr:rr + B_PAD, G:]
               + jnp.dot(h, packed32["w_hh"], precision=hp))
        th = jnp.tanh(pre)
        i_g = 0.5 * th[:, :QH] + 0.5
        f_g = 0.5 * th[:, QH:2 * QH] + 0.5
        g_g = th[:, 2 * QH:3 * QH]
        o_g = 0.5 * th[:, 3 * QH:] + 0.5
        c = f_g * c + i_g * g_g
        h = o_g * jnp.tanh(c)
    logits = jnp.dot(h, packed32["w2"], precision=hp) + packed32["b2"]
    return logits[:B, :num_classes]


# ----------------------------------------------------------------------------- main
if __name__ == "__main__":
    # Small shapes consistent with the module: 15-step sequences, two feature streams.
    B, T = 2, 15
    F1, F2, P, H, C = 32, 48, 32, 32, 16

    key = jax.random.PRNGKey(0)
    k_in1, k_in2, k_params = jax.random.split(key, 3)
    resnet_features = jax.random.normal(k_in1, (B, T, F1), jnp.float32)
    c3d_features = jax.random.normal(k_in2, (B, T, F2), jnp.float32)
    params = init_params(k_params, F1, F2, P, H, C)

    packed32 = pack_params(params, F1, F2, H)
    kernel_params = to_kernel_operands(packed32)

    out = activity_detection(resnet_features, c3d_features, kernel_params, C)
    out = jax.block_until_ready(out)
    assert out.shape == (B, C), out.shape
    assert bool(jnp.all(jnp.isfinite(out)))

    ref = activity_detection_reference(resnet_features, c3d_features, params)

    # 1) Packing/layout validation in pure f32 (bf16-independent): the fused math vs. the
    #    unfused PyTorch port differs only by reassociation rounding.
    fused32 = fused_forward_f32(resnet_features, c3d_features, packed32, C)
    assert bool(jnp.allclose(fused32, ref, rtol=1e-3, atol=1e-3)), \
        float(jnp.max(jnp.abs(fused32 - ref)))

    # 2) Kernel vs. reference: the error budget is dominated by the bf16 matmul operands
    #    (~2^-9 relative on O(1) gate pre-activations, gate derivatives <= 1, 15 recurrence
    #    steps, 128-wide classifier matmul) -> expected max |err| ~ 1e-2; assert at 5e-2.
    err = float(jnp.max(jnp.abs(out - ref)))
    assert err < 5e-2, err

    print("KERNEL_OK")
</pallas_src>

<mosaic_0001>
module attributes {stable_mosaic.version = 11 : i64} {
  func.func @activity_detection_kernel(%arg0: memref<120x80xbf16, #tpu.memory_space<vmem>>, %arg1: memref<80x1024xbf16, #tpu.memory_space<vmem>>, %arg2: memref<1x1024xf32, #tpu.memory_space<vmem>>, %arg3: memref<128x512xbf16, #tpu.memory_space<vmem>>, %arg4: memref<128x128xbf16, #tpu.memory_space<vmem>>, %arg5: memref<1x128xf32, #tpu.memory_space<vmem>>, %arg6: memref<8x128xf32, #tpu.memory_space<vmem>>) attributes {dimension_semantics = [], scalar_prefetch = 0 : i64, scratch_operands = 0 : i64, tpu.core_type = #tpu.core_type<tc>} {
    %c0 = arith.constant 0 : index
    %c0_0 = arith.constant 0 : index
    %0 = vector.load %arg0[%c0, %c0_0] : memref<120x80xbf16, #tpu.memory_space<vmem>>, vector<120x80xbf16>
    %c0_1 = arith.constant 0 : index
    %c0_2 = arith.constant 0 : index
    %1 = vector.load %arg1[%c0_1, %c0_2] : memref<80x1024xbf16, #tpu.memory_space<vmem>>, vector<80x1024xbf16>
    %cst = arith.constant dense<0.000000e+00> : vector<120x1024xf32>
    %2 = tpu.matmul %0, %1, %cst {dimension_numbers = #tpu.dot_dimension_numbers<[1], [0], [0], [1], [0, 0, 1, 1], [], []>} : vector<120x80xbf16>, vector<80x1024xbf16>, vector<120x1024xf32> -> vector<120x1024xf32>
    %c0_3 = arith.constant 0 : index
    %c0_4 = arith.constant 0 : index
    %3 = vector.load %arg2[%c0_3, %c0_4] : memref<1x1024xf32, #tpu.memory_space<vmem>>, vector<1x1024xf32>
    %4 = vector.broadcast %3 : vector<1x1024xf32> to vector<120x1024xf32>
    %5 = arith.addf %2, %4 : vector<120x1024xf32>
    %c0_5 = arith.constant 0 : index
    %c0_6 = arith.constant 0 : index
    %6 = vector.load %arg3[%c0_5, %c0_6] : memref<128x512xbf16, #tpu.memory_space<vmem>>, vector<128x512xbf16>
    %cst_7 = arith.constant 0.000000e+00 : f32
    %7 = vector.broadcast %cst_7 : f32 to vector<8x128xf32>
    %cst_8 = arith.constant 0.000000e+00 : f32
    %8 = vector.broadcast %cst_8 : f32 to vector<8x128xf32>
    %9 = vector.extract_strided_slice %5 {offsets = [0, 0], sizes = [8, 512], strides = [1, 1]} : vector<120x1024xf32> to vector<8x512xf32>
    %10 = vector.extract_strided_slice %5 {offsets = [112, 512], sizes = [8, 512], strides = [1, 1]} : vector<120x1024xf32> to vector<8x512xf32>
    %11 = arith.addf %9, %10 : vector<8x512xf32>
    %12 = arith.truncf %7 : vector<8x128xf32> to vector<8x128xbf16>
    %cst_9 = arith.constant dense<0.000000e+00> : vector<8x512xf32>
    %13 = tpu.matmul %12, %6, %cst_9 {dimension_numbers = #tpu.dot_dimension_numbers<[1], [0], [0], [1], [0, 0, 1, 1], [], []>} : vector<8x128xbf16>, vector<128x512xbf16>, vector<8x512xf32> -> vector<8x512xf32>
    %14 = arith.addf %11, %13 : vector<8x512xf32>
    %15 = math.tanh %14 : vector<8x512xf32>
    %16 = vector.extract_strided_slice %15 {offsets = [0, 0], sizes = [8, 128], strides = [1, 1]} : vector<8x512xf32> to vector<8x128xf32>
    %cst_10 = arith.constant 5.000000e-01 : f32
    %17 = vector.broadcast %cst_10 : f32 to vector<8x128xf32>
    %18 = arith.mulf %17, %16 : vector<8x128xf32>
    %cst_11 = arith.constant 5.000000e-01 : f32
    %19 = vector.broadcast %cst_11 : f32 to vector<8x128xf32>
    %20 = arith.addf %18, %19 : vector<8x128xf32>
    %21 = vector.extract_strided_slice %15 {offsets = [0, 128], sizes = [8, 128], strides = [1, 1]} : vector<8x512xf32> to vector<8x128xf32>
    %cst_12 = arith.constant 5.000000e-01 : f32
    %22 = vector.broadcast %cst_12 : f32 to vector<8x128xf32>
    %23 = arith.mulf %22, %21 : vector<8x128xf32>
    %cst_13 = arith.constant 5.000000e-01 : f32
    %24 = vector.broadcast %cst_13 : f32 to vector<8x128xf32>
    %25 = arith.addf %23, %24 : vector<8x128xf32>
    %26 = vector.extract_strided_slice %15 {offsets = [0, 256], sizes = [8, 128], strides = [1, 1]} : vector<8x512xf32> to vector<8x128xf32>
    %27 = vector.extract_strided_slice %15 {offsets = [0, 384], sizes = [8, 128], strides = [1, 1]} : vector<8x512xf32> to vector<8x128xf32>
    %cst_14 = arith.constant 5.000000e-01 : f32
    %28 = vector.broadcast %cst_14 : f32 to vector<8x128xf32>
    %29 = arith.mulf %28, %27 : vector<8x128xf32>
    %cst_15 = arith.constant 5.000000e-01 : f32
    %30 = vector.broadcast %cst_15 : f32 to vector<8x128xf32>
    %31 = arith.addf %29, %30 : vector<8x128xf32>
    %32 = arith.mulf %25, %8 : vector<8x128xf32>
    %33 = arith.mulf %20, %26 : vector<8x128xf32>
    %34 = arith.addf %32, %33 : vector<8x128xf32>
    %35 = math.tanh %34 : vector<8x128xf32>
    %36 = arith.mulf %31, %35 : vector<8x128xf32>
    %37 = vector.extract_strided_slice %5 {offsets = [8, 0], sizes = [8, 512], strides = [1, 1]} : vector<120x1024xf32> to vector<8x512xf32>
    %38 = vector.extract_strided_slice %5 {offsets = [104, 512], sizes = [8, 512], strides = [1, 1]} : vector<120x1024xf32> to vector<8x512xf32>
    %39 = arith.addf %37, %38 : vector<8x512xf32>
    %40 = arith.truncf %36 : vector<8x128xf32> to vector<8x128xbf16>
    %cst_16 = arith.constant dense<0.000000e+00> : vector<8x512xf32>
    %41 = tpu.matmul %40, %6, %cst_16 {dimension_numbers = #tpu.dot_dimension_numbers<[1], [0], [0], [1], [0, 0, 1, 1], [], []>} : vector<8x128xbf16>, vector<128x512xbf16>, vector<8x512xf32> -> vector<8x512xf32>
    %42 = arith.addf %39, %41 : vector<8x512xf32>
    %43 = math.tanh %42 : vector<8x512xf32>
    %44 = vector.extract_strided_slice %43 {offsets = [0, 0], sizes = [8, 128], strides = [1, 1]} : vector<8x512xf32> to vector<8x128xf32>
    %cst_17 = arith.constant 5.000000e-01 : f32
    %45 = vector.broadcast %cst_17 : f32 to vector<8x128xf32>
    %46 = arith.mulf %45, %44 : vector<8x128xf32>
    %cst_18 = arith.constant 5.000000e-01 : f32
    %47 = vector.broadcast %cst_18 : f32 to vector<8x128xf32>
    %48 = arith.addf %46, %47 : vector<8x128xf32>
    %49 = vector.extract_strided_slice %43 {offsets = [0, 128], sizes = [8, 128], strides = [1, 1]} : vector<8x512xf32> to vector<8x128xf32>
    %cst_19 = arith.constant 5.000000e-01 : f32
    %50 = vector.broadcast %cst_19 : f32 to vector<8x128xf32>
    %51 = arith.mulf %50, %49 : vector<8x128xf32>
    %cst_20 = arith.constant 5.000000e-01 : f32
    %52 = vector.broadcast %cst_20 : f32 to vector<8x128xf32>
    %53 = arith.addf %51, %52 : vector<8x128xf32>
    %54 = vector.extract_strided_slice %43 {offsets = [0, 256], sizes = [8, 128], strides = [1, 1]} : vector<8x512xf32> to vector<8x128xf32>
    %55 = vector.extract_strided_slice %43 {offsets = [0, 384], sizes = [8, 128], strides = [1, 1]} : vector<8x512xf32> to vector<8x128xf32>
    %cst_21 = arith.constant 5.000000e-01 : f32
    %56 = vector.broadcast %cst_21 : f32 to vector<8x128xf32>
    %57 = arith.mulf %56, %55 : vector<8x128xf32>
    %cst_22 = arith.constant 5.000000e-01 : f32
    %58 = vector.broadcast %cst_22 : f32 to vector<8x128xf32>
    %59 = arith.addf %57, %58 : vector<8x128xf32>
    %60 = arith.mulf %53, %34 : vector<8x128xf32>
    %61 = arith.mulf %48, %54 : vector<8x128xf32>
    %62 = arith.addf %60, %61 : vector<8x128xf32>
    %63 = math.tanh %62 : vector<8x128xf32>
    %64 = arith.mulf %59, %63 : vector<8x128xf32>
    %65 = vector.extract_strided_slice %5 {offsets = [16, 0], sizes = [8, 512], strides = [1, 1]} : vector<120x1024xf32> to vector<8x512xf32>
    %66 = vector.extract_strided_slice %5 {offsets = [96, 512], sizes = [8, 512], strides = [1, 1]} : vector<120x1024xf32> to vector<8x512xf32>
    %67 = arith.addf %65, %66 : vector<8x512xf32>
    %68 = arith.truncf %64 : vector<8x128xf32> to vector<8x128xbf16>
    %cst_23 = arith.constant dense<0.000000e+00> : vector<8x512xf32>
    %69 = tpu.matmul %68, %6, %cst_23 {dimension_numbers = #tpu.dot_dimension_numbers<[1], [0], [0], [1], [0, 0, 1, 1], [], []>} : vector<8x128xbf16>, vector<128x512xbf16>, vector<8x512xf32> -> vector<8x512xf32>
    %70 = arith.addf %67, %69 : vector<8x512xf32>
    %71 = math.tanh %70 : vector<8x512xf32>
    %72 = vector.extract_strided_slice %71 {offsets = [0, 0], sizes = [8, 128], strides = [1, 1]} : vector<8x512xf32> to vector<8x128xf32>
    %cst_24 = arith.constant 5.000000e-01 : f32
    %73 = vector.broadcast %cst_24 : f32 to vector<8x128xf32>
    %74 = arith.mulf %73, %72 : vector<8x128xf32>
    %cst_25 = arith.constant 5.000000e-01 : f32
    %75 = vector.broadcast %cst_25 : f32 to vector<8x128xf32>
    %76 = arith.addf %74, %75 : vector<8x128xf32>
    %77 = vector.extract_strided_slice %71 {offsets = [0, 128], sizes = [8, 128], strides = [1, 1]} : vector<8x512xf32> to vector<8x128xf32>
    %cst_26 = arith.constant 5.000000e-01 : f32
    %78 = vector.broadcast %cst_26 : f32 to vector<8x128xf32>
    %79 = arith.mulf %78, %77 : vector<8x128xf32>
    %cst_27 = arith.constant 5.000000e-01 : f32
    %80 = vector.broadcast %cst_27 : f32 to vector<8x128xf32>
    %81 = arith.addf %79, %80 : vector<8x128xf32>
    %82 = vector.extract_strided_slice %71 {offsets = [0, 256], sizes = [8, 128], strides = [1, 1]} : vector<8x512xf32> to vector<8x128xf32>
    %83 = vector.extract_strided_slice %71 {offsets = [0, 384], sizes = [8, 128], strides = [1, 1]} : vector<8x512xf32> to vector<8x128xf32>
    %cst_28 = arith.constant 5.000000e-01 : f32
    %84 = vector.broadcast %cst_28 : f32 to vector<8x128xf32>
    %85 = arith.mulf %84, %83 : vector<8x128xf32>
    %cst_29 = arith.constant 5.000000e-01 : f32
    %86 = vector.broadcast %cst_29 : f32 to vector<8x128xf32>
    %87 = arith.addf %85, %86 : vector<8x128xf32>
    %88 = arith.mulf %81, %62 : vector<8x128xf32>
    %89 = arith.mulf %76, %82 : vector<8x128xf32>
    %90 = arith.addf %88, %89 : vector<8x128xf32>
    %91 = math.tanh %90 : vector<8x128xf32>
    %92 = arith.mulf %87, %91 : vector<8x128xf32>
    %93 = vector.extract_strided_slice %5 {offsets = [24, 0], sizes = [8, 512], strides = [1, 1]} : vector<120x1024xf32> to vector<8x512xf32>
    %94 = vector.extract_strided_slice %5 {offsets = [88, 512], sizes = [8, 512], strides = [1, 1]} : vector<120x1024xf32> to vector<8x512xf32>
    %95 = arith.addf %93, %94 : vector<8x512xf32>
    %96 = arith.truncf %92 : vector<8x128xf32> to vector<8x128xbf16>
    %cst_30 = arith.constant dense<0.000000e+00> : vector<8x512xf32>
    %97 = tpu.matmul %96, %6, %cst_30 {dimension_numbers = #tpu.dot_dimension_numbers<[1], [0], [0], [1], [0, 0, 1, 1], [], []>} : vector<8x128xbf16>, vector<128x512xbf16>, vector<8x512xf32> -> vector<8x512xf32>
    %98 = arith.addf %95, %97 : vector<8x512xf32>
    %99 = math.tanh %98 : vector<8x512xf32>
    %100 = vector.extract_strided_slice %99 {offsets = [0, 0], sizes = [8, 128], strides = [1, 1]} : vector<8x512xf32> to vector<8x128xf32>
    %cst_31 = arith.constant 5.000000e-01 : f32
    %101 = vector.broadcast %cst_31 : f32 to vector<8x128xf32>
    %102 = arith.mulf %101, %100 : vector<8x128xf32>
    %cst_32 = arith.constant 5.000000e-01 : f32
    %103 = vector.broadcast %cst_32 : f32 to vector<8x128xf32>
    %104 = arith.addf %102, %103 : vector<8x128xf32>
    %105 = vector.extract_strided_slice %99 {offsets = [0, 128], sizes = [8, 128], strides = [1, 1]} : vector<8x512xf32> to vector<8x128xf32>
    %cst_33 = arith.constant 5.000000e-01 : f32
    %106 = vector.broadcast %cst_33 : f32 to vector<8x128xf32>
    %107 = arith.mulf %106, %105 : vector<8x128xf32>
    %cst_34 = arith.constant 5.000000e-01 : f32
    %108 = vector.broadcast %cst_34 : f32 to vector<8x128xf32>
    %109 = arith.addf %107, %108 : vector<8x128xf32>
    %110 = vector.extract_strided_slice %99 {offsets = [0, 256], sizes = [8, 128], strides = [1, 1]} : vector<8x512xf32> to vector<8x128xf32>
    %111 = vector.extract_strided_slice %99 {offsets = [0, 384], sizes = [8, 128], strides = [1, 1]} : vector<8x512xf32> to vector<8x128xf32>
    %cst_35 = arith.constant 5.000000e-01 : f32
    %112 = vector.broadcast %cst_35 : f32 to vector<8x128xf32>
    %113 = arith.mulf %112, %111 : vector<8x128xf32>
    %cst_36 = arith.constant 5.000000e-01 : f32
    %114 = vector.broadcast %cst_36 : f32 to vector<8x128xf32>
    %115 = arith.addf %113, %114 : vector<8x128xf32>
    %116 = arith.mulf %109, %90 : vector<8x128xf32>
    %117 = arith.mulf %104, %110 : vector<8x128xf32>
    %118 = arith.addf %116, %117 : vector<8x128xf32>
    %119 = math.tanh %118 : vector<8x128xf32>
    %120 = arith.mulf %115, %119 : vector<8x128xf32>
    %121 = vector.extract_strided_slice %5 {offsets = [32, 0], sizes = [8, 512], strides = [1, 1]} : vector<120x1024xf32> to vector<8x512xf32>
    %122 = vector.extract_strided_slice %5 {offsets = [80, 512], sizes = [8, 512], strides = [1, 1]} : vector<120x1024xf32> to vector<8x512xf32>
    %123 = arith.addf %121, %122 : vector<8x512xf32>
    %124 = arith.truncf %120 : vector<8x128xf32> to vector<8x128xbf16>
    %cst_37 = arith.constant dense<0.000000e+00> : vector<8x512xf32>
    %125 = tpu.matmul %124, %6, %cst_37 {dimension_numbers = #tpu.dot_dimension_numbers<[1], [0], [0], [1], [0, 0, 1, 1], [], []>} : vector<8x128xbf16>, vector<128x512xbf16>, vector<8x512xf32> -> vector<8x512xf32>
    %126 = arith.addf %123, %125 : vector<8x512xf32>
    %127 = math.tanh %126 : vector<8x512xf32>
    %128 = vector.extract_strided_slice %127 {offsets = [0, 0], sizes = [8, 128], strides = [1, 1]} : vector<8x512xf32> to vector<8x128xf32>
    %cst_38 = arith.constant 5.000000e-01 : f32
    %129 = vector.broadcast %cst_38 : f32 to vector<8x128xf32>
    %130 = arith.mulf %129, %128 : vector<8x128xf32>
    %cst_39 = arith.constant 5.000000e-01 : f32
    %131 = vector.broadcast %cst_39 : f32 to vector<8x128xf32>
    %132 = arith.addf %130, %131 : vector<8x128xf32>
    %133 = vector.extract_strided_slice %127 {offsets = [0, 128], sizes = [8, 128], strides = [1, 1]} : vector<8x512xf32> to vector<8x128xf32>
    %cst_40 = arith.constant 5.000000e-01 : f32
    %134 = vector.broadcast %cst_40 : f32 to vector<8x128xf32>
    %135 = arith.mulf %134, %133 : vector<8x128xf32>
    %cst_41 = arith.constant 5.000000e-01 : f32
    %136 = vector.broadcast %cst_41 : f32 to vector<8x128xf32>
    %137 = arith.addf %135, %136 : vector<8x128xf32>
    %138 = vector.extract_strided_slice %127 {offsets = [0, 256], sizes = [8, 128], strides = [1, 1]} : vector<8x512xf32> to vector<8x128xf32>
    %139 = vector.extract_strided_slice %127 {offsets = [0, 384], sizes = [8, 128], strides = [1, 1]} : vector<8x512xf32> to vector<8x128xf32>
    %cst_42 = arith.constant 5.000000e-01 : f32
    %140 = vector.broadcast %cst_42 : f32 to vector<8x128xf32>
    %141 = arith.mulf %140, %139 : vector<8x128xf32>
    %cst_43 = arith.constant 5.000000e-01 : f32
    %142 = vector.broadcast %cst_43 : f32 to vector<8x128xf32>
    %143 = arith.addf %141, %142 : vector<8x128xf32>
    %144 = arith.mulf %137, %118 : vector<8x128xf32>
    %145 = arith.mulf %132, %138 : vector<8x128xf32>
    %146 = arith.addf %144, %145 : vector<8x128xf32>
    %147 = math.tanh %146 : vector<8x128xf32>
    %148 = arith.mulf %143, %147 : vector<8x128xf32>
    %149 = vector.extract_strided_slice %5 {offsets = [40, 0], sizes = [8, 512], strides = [1, 1]} : vector<120x1024xf32> to vector<8x512xf32>
    %150 = vector.extract_strided_slice %5 {offsets = [72, 512], sizes = [8, 512], strides = [1, 1]} : vector<120x1024xf32> to vector<8x512xf32>
    %151 = arith.addf %149, %150 : vector<8x512xf32>
    %152 = arith.truncf %148 : vector<8x128xf32> to vector<8x128xbf16>
    %cst_44 = arith.constant dense<0.000000e+00> : vector<8x512xf32>
    %153 = tpu.matmul %152, %6, %cst_44 {dimension_numbers = #tpu.dot_dimension_numbers<[1], [0], [0], [1], [0, 0, 1, 1], [], []>} : vector<8x128xbf16>, vector<128x512xbf16>, vector<8x512xf32> -> vector<8x512xf32>
    %154 = arith.addf %151, %153 : vector<8x512xf32>
    %155 = math.tanh %154 : vector<8x512xf32>
    %156 = vector.extract_strided_slice %155 {offsets = [0, 0], sizes = [8, 128], strides = [1, 1]} : vector<8x512xf32> to vector<8x128xf32>
    %cst_45 = arith.constant 5.000000e-01 : f32
    %157 = vector.broadcast %cst_45 : f32 to vector<8x128xf32>
    %158 = arith.mulf %157, %156 : vector<8x128xf32>
    %cst_46 = arith.constant 5.000000e-01 : f32
    %159 = vector.broadcast %cst_46 : f32 to vector<8x128xf32>
    %160 = arith.addf %158, %159 : vector<8x128xf32>
    %161 = vector.extract_strided_slice %155 {offsets = [0, 128], sizes = [8, 128], strides = [1, 1]} : vector<8x512xf32> to vector<8x128xf32>
    %cst_47 = arith.constant 5.000000e-01 : f32
    %162 = vector.broadcast %cst_47 : f32 to vector<8x128xf32>
    %163 = arith.mulf %162, %161 : vector<8x128xf32>
    %cst_48 = arith.constant 5.000000e-01 : f32
    %164 = vector.broadcast %cst_48 : f32 to vector<8x128xf32>
    %165 = arith.addf %163, %164 : vector<8x128xf32>
    %166 = vector.extract_strided_slice %155 {offsets = [0, 256], sizes = [8, 128], strides = [1, 1]} : vector<8x512xf32> to vector<8x128xf32>
    %167 = vector.extract_strided_slice %155 {offsets = [0, 384], sizes = [8, 128], strides = [1, 1]} : vector<8x512xf32> to vector<8x128xf32>
    %cst_49 = arith.constant 5.000000e-01 : f32
    %168 = vector.broadcast %cst_49 : f32 to vector<8x128xf32>
    %169 = arith.mulf %168, %167 : vector<8x128xf32>
    %cst_50 = arith.constant 5.000000e-01 : f32
    %170 = vector.broadcast %cst_50 : f32 to vector<8x128xf32>
    %171 = arith.addf %169, %170 : vector<8x128xf32>
    %172 = arith.mulf %165, %146 : vector<8x128xf32>
    %173 = arith.mulf %160, %166 : vector<8x128xf32>
    %174 = arith.addf %172, %173 : vector<8x128xf32>
    %175 = math.tanh %174 : vector<8x128xf32>
    %176 = arith.mulf %171, %175 : vector<8x128xf32>
    %177 = vector.extract_strided_slice %5 {offsets = [48, 0], sizes = [8, 512], strides = [1, 1]} : vector<120x1024xf32> to vector<8x512xf32>
    %178 = vector.extract_strided_slice %5 {offsets = [64, 512], sizes = [8, 512], strides = [1, 1]} : vector<120x1024xf32> to vector<8x512xf32>
    %179 = arith.addf %177, %178 : vector<8x512xf32>
    %180 = arith.truncf %176 : vector<8x128xf32> to vector<8x128xbf16>
    %cst_51 = arith.constant dense<0.000000e+00> : vector<8x512xf32>
    %181 = tpu.matmul %180, %6, %cst_51 {dimension_numbers = #tpu.dot_dimension_numbers<[1], [0], [0], [1], [0, 0, 1, 1], [], []>} : vector<8x128xbf16>, vector<128x512xbf16>, vector<8x512xf32> -> vector<8x512xf32>
    %182 = arith.addf %179, %181 : vector<8x512xf32>
    %183 = math.tanh %182 : vector<8x512xf32>
    %184 = vector.extract_strided_slice %183 {offsets = [0, 0], sizes = [8, 128], strides = [1, 1]} : vector<8x512xf32> to vector<8x128xf32>
    %cst_52 = arith.constant 5.000000e-01 : f32
    %185 = vector.broadcast %cst_52 : f32 to vector<8x128xf32>
    %186 = arith.mulf %185, %184 : vector<8x128xf32>
    %cst_53 = arith.constant 5.000000e-01 : f32
    %187 = vector.broadcast %cst_53 : f32 to vector<8x128xf32>
    %188 = arith.addf %186, %187 : vector<8x128xf32>
    %189 = vector.extract_strided_slice %183 {offsets = [0, 128], sizes = [8, 128], strides = [1, 1]} : vector<8x512xf32> to vector<8x128xf32>
    %cst_54 = arith.constant 5.000000e-01 : f32
    %190 = vector.broadcast %cst_54 : f32 to vector<8x128xf32>
    %191 = arith.mulf %190, %189 : vector<8x128xf32>
    %cst_55 = arith.constant 5.000000e-01 : f32
    %192 = vector.broadcast %cst_55 : f32 to vector<8x128xf32>
    %193 = arith.addf %191, %192 : vector<8x128xf32>
    %194 = vector.extract_strided_slice %183 {offsets = [0, 256], sizes = [8, 128], strides = [1, 1]} : vector<8x512xf32> to vector<8x128xf32>
    %195 = vector.extract_strided_slice %183 {offsets = [0, 384], sizes = [8, 128], strides = [1, 1]} : vector<8x512xf32> to vector<8x128xf32>
    %cst_56 = arith.constant 5.000000e-01 : f32
    %196 = vector.broadcast %cst_56 : f32 to vector<8x128xf32>
    %197 = arith.mulf %196, %195 : vector<8x128xf32>
    %cst_57 = arith.constant 5.000000e-01 : f32
    %198 = vector.broadcast %cst_57 : f32 to vector<8x128xf32>
    %199 = arith.addf %197, %198 : vector<8x128xf32>
    %200 = arith.mulf %193, %174 : vector<8x128xf32>
    %201 = arith.mulf %188, %194 : vector<8x128xf32>
    %202 = arith.addf %200, %201 : vector<8x128xf32>
    %203 = math.tanh %202 : vector<8x128xf32>
    %204 = arith.mulf %199, %203 : vector<8x128xf32>
    %205 = vector.extract_strided_slice %5 {offsets = [56, 0], sizes = [8, 512], strides = [1, 1]} : vector<120x1024xf32> to vector<8x512xf32>
    %206 = vector.extract_strided_slice %5 {offsets = [56, 512], sizes = [8, 512], strides = [1, 1]} : vector<120x1024xf32> to vector<8x512xf32>
    %207 = arith.addf %205, %206 : vector<8x512xf32>
    %208 = arith.truncf %204 : vector<8x128xf32> to vector<8x128xbf16>
    %cst_58 = arith.constant dense<0.000000e+00> : vector<8x512xf32>
    %209 = tpu.matmul %208, %6, %cst_58 {dimension_numbers = #tpu.dot_dimension_numbers<[1], [0], [0], [1], [0, 0, 1, 1], [], []>} : vector<8x128xbf16>, vector<128x512xbf16>, vector<8x512xf32> -> vector<8x512xf32>
    %210 = arith.addf %207, %209 : vector<8x512xf32>
    %211 = math.tanh %210 : vector<8x512xf32>
    %212 = vector.extract_strided_slice %211 {offsets = [0, 0], sizes = [8, 128], strides = [1, 1]} : vector<8x512xf32> to vector<8x128xf32>
    %cst_59 = arith.constant 5.000000e-01 : f32
    %213 = vector.broadcast %cst_59 : f32 to vector<8x128xf32>
    %214 = arith.mulf %213, %212 : vector<8x128xf32>
    %cst_60 = arith.constant 5.000000e-01 : f32
    %215 = vector.broadcast %cst_60 : f32 to vector<8x128xf32>
    %216 = arith.addf %214, %215 : vector<8x128xf32>
    %217 = vector.extract_strided_slice %211 {offsets = [0, 128], sizes = [8, 128], strides = [1, 1]} : vector<8x512xf32> to vector<8x128xf32>
    %cst_61 = arith.constant 5.000000e-01 : f32
    %218 = vector.broadcast %cst_61 : f32 to vector<8x128xf32>
    %219 = arith.mulf %218, %217 : vector<8x128xf32>
    %cst_62 = arith.constant 5.000000e-01 : f32
    %220 = vector.broadcast %cst_62 : f32 to vector<8x128xf32>
    %221 = arith.addf %219, %220 : vector<8x128xf32>
    %222 = vector.extract_strided_slice %211 {offsets = [0, 256], sizes = [8, 128], strides = [1, 1]} : vector<8x512xf32> to vector<8x128xf32>
    %223 = vector.extract_strided_slice %211 {offsets = [0, 384], sizes = [8, 128], strides = [1, 1]} : vector<8x512xf32> to vector<8x128xf32>
    %cst_63 = arith.constant 5.000000e-01 : f32
    %224 = vector.broadcast %cst_63 : f32 to vector<8x128xf32>
    %225 = arith.mulf %224, %223 : vector<8x128xf32>
    %cst_64 = arith.constant 5.000000e-01 : f32
    %226 = vector.broadcast %cst_64 : f32 to vector<8x128xf32>
    %227 = arith.addf %225, %226 : vector<8x128xf32>
    %228 = arith.mulf %221, %202 : vector<8x128xf32>
    %229 = arith.mulf %216, %222 : vector<8x128xf32>
    %230 = arith.addf %228, %229 : vector<8x128xf32>
    %231 = math.tanh %230 : vector<8x128xf32>
    %232 = arith.mulf %227, %231 : vector<8x128xf32>
    %233 = vector.extract_strided_slice %5 {offsets = [64, 0], sizes = [8, 512], strides = [1, 1]} : vector<120x1024xf32> to vector<8x512xf32>
    %234 = vector.extract_strided_slice %5 {offsets = [48, 512], sizes = [8, 512], strides = [1, 1]} : vector<120x1024xf32> to vector<8x512xf32>
    %235 = arith.addf %233, %234 : vector<8x512xf32>
    %236 = arith.truncf %232 : vector<8x128xf32> to vector<8x128xbf16>
    %cst_65 = arith.constant dense<0.000000e+00> : vector<8x512xf32>
    %237 = tpu.matmul %236, %6, %cst_65 {dimension_numbers = #tpu.dot_dimension_numbers<[1], [0], [0], [1], [0, 0, 1, 1], [], []>} : vector<8x128xbf16>, vector<128x512xbf16>, vector<8x512xf32> -> vector<8x512xf32>
    %238 = arith.addf %235, %237 : vector<8x512xf32>
    %239 = math.tanh %238 : vector<8x512xf32>
    %240 = vector.extract_strided_slice %239 {offsets = [0, 0], sizes = [8, 128], strides = [1, 1]} : vector<8x512xf32> to vector<8x128xf32>
    %cst_66 = arith.constant 5.000000e-01 : f32
    %241 = vector.broadcast %cst_66 : f32 to vector<8x128xf32>
    %242 = arith.mulf %241, %240 : vector<8x128xf32>
    %cst_67 = arith.constant 5.000000e-01 : f32
    %243 = vector.broadcast %cst_67 : f32 to vector<8x128xf32>
    %244 = arith.addf %242, %243 : vector<8x128xf32>
    %245 = vector.extract_strided_slice %239 {offsets = [0, 128], sizes = [8, 128], strides = [1, 1]} : vector<8x512xf32> to vector<8x128xf32>
    %cst_68 = arith.constant 5.000000e-01 : f32
    %246 = vector.broadcast %cst_68 : f32 to vector<8x128xf32>
    %247 = arith.mulf %246, %245 : vector<8x128xf32>
    %cst_69 = arith.constant 5.000000e-01 : f32
    %248 = vector.broadcast %cst_69 : f32 to vector<8x128xf32>
    %249 = arith.addf %247, %248 : vector<8x128xf32>
    %250 = vector.extract_strided_slice %239 {offsets = [0, 256], sizes = [8, 128], strides = [1, 1]} : vector<8x512xf32> to vector<8x128xf32>
    %251 = vector.extract_strided_slice %239 {offsets = [0, 384], sizes = [8, 128], strides = [1, 1]} : vector<8x512xf32> to vector<8x128xf32>
    %cst_70 = arith.constant 5.000000e-01 : f32
    %252 = vector.broadcast %cst_70 : f32 to vector<8x128xf32>
    %253 = arith.mulf %252, %251 : vector<8x128xf32>
    %cst_71 = arith.constant 5.000000e-01 : f32
    %254 = vector.broadcast %cst_71 : f32 to vector<8x128xf32>
    %255 = arith.addf %253, %254 : vector<8x128xf32>
    %256 = arith.mulf %249, %230 : vector<8x128xf32>
    %257 = arith.mulf %244, %250 : vector<8x128xf32>
    %258 = arith.addf %256, %257 : vector<8x128xf32>
    %259 = math.tanh %258 : vector<8x128xf32>
    %260 = arith.mulf %255, %259 : vector<8x128xf32>
    %261 = vector.extract_strided_slice %5 {offsets = [72, 0], sizes = [8, 512], strides = [1, 1]} : vector<120x1024xf32> to vector<8x512xf32>
    %262 = vector.extract_strided_slice %5 {offsets = [40, 512], sizes = [8, 512], strides = [1, 1]} : vector<120x1024xf32> to vector<8x512xf32>
    %263 = arith.addf %261, %262 : vector<8x512xf32>
    %264 = arith.truncf %260 : vector<8x128xf32> to vector<8x128xbf16>
    %cst_72 = arith.constant dense<0.000000e+00> : vector<8x512xf32>
    %265 = tpu.matmul %264, %6, %cst_72 {dimension_numbers = #tpu.dot_dimension_numbers<[1], [0], [0], [1], [0, 0, 1, 1], [], []>} : vector<8x128xbf16>, vector<128x512xbf16>, vector<8x512xf32> -> vector<8x512xf32>
    %266 = arith.addf %263, %265 : vector<8x512xf32>
    %267 = math.tanh %266 : vector<8x512xf32>
    %268 = vector.extract_strided_slice %267 {offsets = [0, 0], sizes = [8, 128], strides = [1, 1]} : vector<8x512xf32> to vector<8x128xf32>
    %cst_73 = arith.constant 5.000000e-01 : f32
    %269 = vector.broadcast %cst_73 : f32 to vector<8x128xf32>
    %270 = arith.mulf %269, %268 : vector<8x128xf32>
    %cst_74 = arith.constant 5.000000e-01 : f32
    %271 = vector.broadcast %cst_74 : f32 to vector<8x128xf32>
    %272 = arith.addf %270, %271 : vector<8x128xf32>
    %273 = vector.extract_strided_slice %267 {offsets = [0, 128], sizes = [8, 128], strides = [1, 1]} : vector<8x512xf32> to vector<8x128xf32>
    %cst_75 = arith.constant 5.000000e-01 : f32
    %274 = vector.broadcast %cst_75 : f32 to vector<8x128xf32>
    %275 = arith.mulf %274, %273 : vector<8x128xf32>
    %cst_76 = arith.constant 5.000000e-01 : f32
    %276 = vector.broadcast %cst_76 : f32 to vector<8x128xf32>
    %277 = arith.addf %275, %276 : vector<8x128xf32>
    %278 = vector.extract_strided_slice %267 {offsets = [0, 256], sizes = [8, 128], strides = [1, 1]} : vector<8x512xf32> to vector<8x128xf32>
    %279 = vector.extract_strided_slice %267 {offsets = [0, 384], sizes = [8, 128], strides = [1, 1]} : vector<8x512xf32> to vector<8x128xf32>
    %cst_77 = arith.constant 5.000000e-01 : f32
    %280 = vector.broadcast %cst_77 : f32 to vector<8x128xf32>
    %281 = arith.mulf %280, %279 : vector<8x128xf32>
    %cst_78 = arith.constant 5.000000e-01 : f32
    %282 = vector.broadcast %cst_78 : f32 to vector<8x128xf32>
    %283 = arith.addf %281, %282 : vector<8x128xf32>
    %284 = arith.mulf %277, %258 : vector<8x128xf32>
    %285 = arith.mulf %272, %278 : vector<8x128xf32>
    %286 = arith.addf %284, %285 : vector<8x128xf32>
    %287 = math.tanh %286 : vector<8x128xf32>
    %288 = arith.mulf %283, %287 : vector<8x128xf32>
    %289 = vector.extract_strided_slice %5 {offsets = [80, 0], sizes = [8, 512], strides = [1, 1]} : vector<120x1024xf32> to vector<8x512xf32>
    %290 = vector.extract_strided_slice %5 {offsets = [32, 512], sizes = [8, 512], strides = [1, 1]} : vector<120x1024xf32> to vector<8x512xf32>
    %291 = arith.addf %289, %290 : vector<8x512xf32>
    %292 = arith.truncf %288 : vector<8x128xf32> to vector<8x128xbf16>
    %cst_79 = arith.constant dense<0.000000e+00> : vector<8x512xf32>
    %293 = tpu.matmul %292, %6, %cst_79 {dimension_numbers = #tpu.dot_dimension_numbers<[1], [0], [0], [1], [0, 0, 1, 1], [], []>} : vector<8x128xbf16>, vector<128x512xbf16>, vector<8x512xf32> -> vector<8x512xf32>
    %294 = arith.addf %291, %293 : vector<8x512xf32>
    %295 = math.tanh %294 : vector<8x512xf32>
    %296 = vector.extract_strided_slice %295 {offsets = [0, 0], sizes = [8, 128], strides = [1, 1]} : vector<8x512xf32> to vector<8x128xf32>
    %cst_80 = arith.constant 5.000000e-01 : f32
    %297 = vector.broadcast %cst_80 : f32 to vector<8x128xf32>
    %298 = arith.mulf %297, %296 : vector<8x128xf32>
    %cst_81 = arith.constant 5.000000e-01 : f32
    %299 = vector.broadcast %cst_81 : f32 to vector<8x128xf32>
    %300 = arith.addf %298, %299 : vector<8x128xf32>
    %301 = vector.extract_strided_slice %295 {offsets = [0, 128], sizes = [8, 128], strides = [1, 1]} : vector<8x512xf32> to vector<8x128xf32>
    %cst_82 = arith.constant 5.000000e-01 : f32
    %302 = vector.broadcast %cst_82 : f32 to vector<8x128xf32>
    %303 = arith.mulf %302, %301 : vector<8x128xf32>
    %cst_83 = arith.constant 5.000000e-01 : f32
    %304 = vector.broadcast %cst_83 : f32 to vector<8x128xf32>
    %305 = arith.addf %303, %304 : vector<8x128xf32>
    %306 = vector.extract_strided_slice %295 {offsets = [0, 256], sizes = [8, 128], strides = [1, 1]} : vector<8x512xf32> to vector<8x128xf32>
    %307 = vector.extract_strided_slice %295 {offsets = [0, 384], sizes = [8, 128], strides = [1, 1]} : vector<8x512xf32> to vector<8x128xf32>
    %cst_84 = arith.constant 5.000000e-01 : f32
    %308 = vector.broadcast %cst_84 : f32 to vector<8x128xf32>
    %309 = arith.mulf %308, %307 : vector<8x128xf32>
    %cst_85 = arith.constant 5.000000e-01 : f32
    %310 = vector.broadcast %cst_85 : f32 to vector<8x128xf32>
    %311 = arith.addf %309, %310 : vector<8x128xf32>
    %312 = arith.mulf %305, %286 : vector<8x128xf32>
    %313 = arith.mulf %300, %306 : vector<8x128xf32>
    %314 = arith.addf %312, %313 : vector<8x128xf32>
    %315 = math.tanh %314 : vector<8x128xf32>
    %316 = arith.mulf %311, %315 : vector<8x128xf32>
    %317 = vector.extract_strided_slice %5 {offsets = [88, 0], sizes = [8, 512], strides = [1, 1]} : vector<120x1024xf32> to vector<8x512xf32>
    %318 = vector.extract_strided_slice %5 {offsets = [24, 512], sizes = [8, 512], strides = [1, 1]} : vector<120x1024xf32> to vector<8x512xf32>
    %319 = arith.addf %317, %318 : vector<8x512xf32>
    %320 = arith.truncf %316 : vector<8x128xf32> to vector<8x128xbf16>
    %cst_86 = arith.constant dense<0.000000e+00> : vector<8x512xf32>
    %321 = tpu.matmul %320, %6, %cst_86 {dimension_numbers = #tpu.dot_dimension_numbers<[1], [0], [0], [1], [0, 0, 1, 1], [], []>} : vector<8x128xbf16>, vector<128x512xbf16>, vector<8x512xf32> -> vector<8x512xf32>
    %322 = arith.addf %319, %321 : vector<8x512xf32>
    %323 = math.tanh %322 : vector<8x512xf32>
    %324 = vector.extract_strided_slice %323 {offsets = [0, 0], sizes = [8, 128], strides = [1, 1]} : vector<8x512xf32> to vector<8x128xf32>
    %cst_87 = arith.constant 5.000000e-01 : f32
    %325 = vector.broadcast %cst_87 : f32 to vector<8x128xf32>
    %326 = arith.mulf %325, %324 : vector<8x128xf32>
    %cst_88 = arith.constant 5.000000e-01 : f32
    %327 = vector.broadcast %cst_88 : f32 to vector<8x128xf32>
    %328 = arith.addf %326, %327 : vector<8x128xf32>
    %329 = vector.extract_strided_slice %323 {offsets = [0, 128], sizes = [8, 128], strides = [1, 1]} : vector<8x512xf32> to vector<8x128xf32>
    %cst_89 = arith.constant 5.000000e-01 : f32
    %330 = vector.broadcast %cst_89 : f32 to vector<8x128xf32>
    %331 = arith.mulf %330, %329 : vector<8x128xf32>
    %cst_90 = arith.constant 5.000000e-01 : f32
    %332 = vector.broadcast %cst_90 : f32 to vector<8x128xf32>
    %333 = arith.addf %331, %332 : vector<8x128xf32>
    %334 = vector.extract_strided_slice %323 {offsets = [0, 256], sizes = [8, 128], strides = [1, 1]} : vector<8x512xf32> to vector<8x128xf32>
    %335 = vector.extract_strided_slice %323 {offsets = [0, 384], sizes = [8, 128], strides = [1, 1]} : vector<8x512xf32> to vector<8x128xf32>
    %cst_91 = arith.constant 5.000000e-01 : f32
    %336 = vector.broadcast %cst_91 : f32 to vector<8x128xf32>
    %337 = arith.mulf %336, %335 : vector<8x128xf32>
    %cst_92 = arith.constant 5.000000e-01 : f32
    %338 = vector.broadcast %cst_92 : f32 to vector<8x128xf32>
    %339 = arith.addf %337, %338 : vector<8x128xf32>
    %340 = arith.mulf %333, %314 : vector<8x128xf32>
    %341 = arith.mulf %328, %334 : vector<8x128xf32>
    %342 = arith.addf %340, %341 : vector<8x128xf32>
    %343 = math.tanh %342 : vector<8x128xf32>
    %344 = arith.mulf %339, %343 : vector<8x128xf32>
    %345 = vector.extract_strided_slice %5 {offsets = [96, 0], sizes = [8, 512], strides = [1, 1]} : vector<120x1024xf32> to vector<8x512xf32>
    %346 = vector.extract_strided_slice %5 {offsets = [16, 512], sizes = [8, 512], strides = [1, 1]} : vector<120x1024xf32> to vector<8x512xf32>
    %347 = arith.addf %345, %346 : vector<8x512xf32>
    %348 = arith.truncf %344 : vector<8x128xf32> to vector<8x128xbf16>
    %cst_93 = arith.constant dense<0.000000e+00> : vector<8x512xf32>
    %349 = tpu.matmul %348, %6, %cst_93 {dimension_numbers = #tpu.dot_dimension_numbers<[1], [0], [0], [1], [0, 0, 1, 1], [], []>} : vector<8x128xbf16>, vector<128x512xbf16>, vector<8x512xf32> -> vector<8x512xf32>
    %350 = arith.addf %347, %349 : vector<8x512xf32>
    %351 = math.tanh %350 : vector<8x512xf32>
    %352 = vector.extract_strided_slice %351 {offsets = [0, 0], sizes = [8, 128], strides = [1, 1]} : vector<8x512xf32> to vector<8x128xf32>
    %cst_94 = arith.constant 5.000000e-01 : f32
    %353 = vector.broadcast %cst_94 : f32 to vector<8x128xf32>
    %354 = arith.mulf %353, %352 : vector<8x128xf32>
    %cst_95 = arith.constant 5.000000e-01 : f32
    %355 = vector.broadcast %cst_95 : f32 to vector<8x128xf32>
    %356 = arith.addf %354, %355 : vector<8x128xf32>
    %357 = vector.extract_strided_slice %351 {offsets = [0, 128], sizes = [8, 128], strides = [1, 1]} : vector<8x512xf32> to vector<8x128xf32>
    %cst_96 = arith.constant 5.000000e-01 : f32
    %358 = vector.broadcast %cst_96 : f32 to vector<8x128xf32>
    %359 = arith.mulf %358, %357 : vector<8x128xf32>
    %cst_97 = arith.constant 5.000000e-01 : f32
    %360 = vector.broadcast %cst_97 : f32 to vector<8x128xf32>
    %361 = arith.addf %359, %360 : vector<8x128xf32>
    %362 = vector.extract_strided_slice %351 {offsets = [0, 256], sizes = [8, 128], strides = [1, 1]} : vector<8x512xf32> to vector<8x128xf32>
    %363 = vector.extract_strided_slice %351 {offsets = [0, 384], sizes = [8, 128], strides = [1, 1]} : vector<8x512xf32> to vector<8x128xf32>
    %cst_98 = arith.constant 5.000000e-01 : f32
    %364 = vector.broadcast %cst_98 : f32 to vector<8x128xf32>
    %365 = arith.mulf %364, %363 : vector<8x128xf32>
    %cst_99 = arith.constant 5.000000e-01 : f32
    %366 = vector.broadcast %cst_99 : f32 to vector<8x128xf32>
    %367 = arith.addf %365, %366 : vector<8x128xf32>
    %368 = arith.mulf %361, %342 : vector<8x128xf32>
    %369 = arith.mulf %356, %362 : vector<8x128xf32>
    %370 = arith.addf %368, %369 : vector<8x128xf32>
    %371 = math.tanh %370 : vector<8x128xf32>
    %372 = arith.mulf %367, %371 : vector<8x128xf32>
    %373 = vector.extract_strided_slice %5 {offsets = [104, 0], sizes = [8, 512], strides = [1, 1]} : vector<120x1024xf32> to vector<8x512xf32>
    %374 = vector.extract_strided_slice %5 {offsets = [8, 512], sizes = [8, 512], strides = [1, 1]} : vector<120x1024xf32> to vector<8x512xf32>
    %375 = arith.addf %373, %374 : vector<8x512xf32>
    %376 = arith.truncf %372 : vector<8x128xf32> to vector<8x128xbf16>
    %cst_100 = arith.constant dense<0.000000e+00> : vector<8x512xf32>
    %377 = tpu.matmul %376, %6, %cst_100 {dimension_numbers = #tpu.dot_dimension_numbers<[1], [0], [0], [1], [0, 0, 1, 1], [], []>} : vector<8x128xbf16>, vector<128x512xbf16>, vector<8x512xf32> -> vector<8x512xf32>
    %378 = arith.addf %375, %377 : vector<8x512xf32>
    %379 = math.tanh %378 : vector<8x512xf32>
    %380 = vector.extract_strided_slice %379 {offsets = [0, 0], sizes = [8, 128], strides = [1, 1]} : vector<8x512xf32> to vector<8x128xf32>
    %cst_101 = arith.constant 5.000000e-01 : f32
    %381 = vector.broadcast %cst_101 : f32 to vector<8x128xf32>
    %382 = arith.mulf %381, %380 : vector<8x128xf32>
    %cst_102 = arith.constant 5.000000e-01 : f32
    %383 = vector.broadcast %cst_102 : f32 to vector<8x128xf32>
    %384 = arith.addf %382, %383 : vector<8x128xf32>
    %385 = vector.extract_strided_slice %379 {offsets = [0, 128], sizes = [8, 128], strides = [1, 1]} : vector<8x512xf32> to vector<8x128xf32>
    %cst_103 = arith.constant 5.000000e-01 : f32
    %386 = vector.broadcast %cst_103 : f32 to vector<8x128xf32>
    %387 = arith.mulf %386, %385 : vector<8x128xf32>
    %cst_104 = arith.constant 5.000000e-01 : f32
    %388 = vector.broadcast %cst_104 : f32 to vector<8x128xf32>
    %389 = arith.addf %387, %388 : vector<8x128xf32>
    %390 = vector.extract_strided_slice %379 {offsets = [0, 256], sizes = [8, 128], strides = [1, 1]} : vector<8x512xf32> to vector<8x128xf32>
    %391 = vector.extract_strided_slice %379 {offsets = [0, 384], sizes = [8, 128], strides = [1, 1]} : vector<8x512xf32> to vector<8x128xf32>
    %cst_105 = arith.constant 5.000000e-01 : f32
    %392 = vector.broadcast %cst_105 : f32 to vector<8x128xf32>
    %393 = arith.mulf %392, %391 : vector<8x128xf32>
    %cst_106 = arith.constant 5.000000e-01 : f32
    %394 = vector.broadcast %cst_106 : f32 to vector<8x128xf32>
    %395 = arith.addf %393, %394 : vector<8x128xf32>
    %396 = arith.mulf %389, %370 : vector<8x128xf32>
    %397 = arith.mulf %384, %390 : vector<8x128xf32>
    %398 = arith.addf %396, %397 : vector<8x128xf32>
    %399 = math.tanh %398 : vector<8x128xf32>
    %400 = arith.mulf %395, %399 : vector<8x128xf32>
    %401 = vector.extract_strided_slice %5 {offsets = [112, 0], sizes = [8, 512], strides = [1, 1]} : vector<120x1024xf32> to vector<8x512xf32>
    %402 = vector.extract_strided_slice %5 {offsets = [0, 512], sizes = [8, 512], strides = [1, 1]} : vector<120x1024xf32> to vector<8x512xf32>
    %403 = arith.addf %401, %402 : vector<8x512xf32>
    %404 = arith.truncf %400 : vector<8x128xf32> to vector<8x128xbf16>
    %cst_107 = arith.constant dense<0.000000e+00> : vector<8x512xf32>
    %405 = tpu.matmul %404, %6, %cst_107 {dimension_numbers = #tpu.dot_dimension_numbers<[1], [0], [0], [1], [0, 0, 1, 1], [], []>} : vector<8x128xbf16>, vector<128x512xbf16>, vector<8x512xf32> -> vector<8x512xf32>
    %406 = arith.addf %403, %405 : vector<8x512xf32>
    %407 = math.tanh %406 : vector<8x512xf32>
    %408 = vector.extract_strided_slice %407 {offsets = [0, 0], sizes = [8, 128], strides = [1, 1]} : vector<8x512xf32> to vector<8x128xf32>
    %cst_108 = arith.constant 5.000000e-01 : f32
    %409 = vector.broadcast %cst_108 : f32 to vector<8x128xf32>
    %410 = arith.mulf %409, %408 : vector<8x128xf32>
    %cst_109 = arith.constant 5.000000e-01 : f32
    %411 = vector.broadcast %cst_109 : f32 to vector<8x128xf32>
    %412 = arith.addf %410, %411 : vector<8x128xf32>
    %413 = vector.extract_strided_slice %407 {offsets = [0, 128], sizes = [8, 128], strides = [1, 1]} : vector<8x512xf32> to vector<8x128xf32>
    %cst_110 = arith.constant 5.000000e-01 : f32
    %414 = vector.broadcast %cst_110 : f32 to vector<8x128xf32>
    %415 = arith.mulf %414, %413 : vector<8x128xf32>
    %cst_111 = arith.constant 5.000000e-01 : f32
    %416 = vector.broadcast %cst_111 : f32 to vector<8x128xf32>
    %417 = arith.addf %415, %416 : vector<8x128xf32>
    %418 = vector.extract_strided_slice %407 {offsets = [0, 256], sizes = [8, 128], strides = [1, 1]} : vector<8x512xf32> to vector<8x128xf32>
    %419 = vector.extract_strided_slice %407 {offsets = [0, 384], sizes = [8, 128], strides = [1, 1]} : vector<8x512xf32> to vector<8x128xf32>
    %cst_112 = arith.constant 5.000000e-01 : f32
    %420 = vector.broadcast %cst_112 : f32 to vector<8x128xf32>
    %421 = arith.mulf %420, %419 : vector<8x128xf32>
    %cst_113 = arith.constant 5.000000e-01 : f32
    %422 = vector.broadcast %cst_113 : f32 to vector<8x128xf32>
    %423 = arith.addf %421, %422 : vector<8x128xf32>
    %424 = arith.mulf %417, %398 : vector<8x128xf32>
    %425 = arith.mulf %412, %418 : vector<8x128xf32>
    %426 = arith.addf %424, %425 : vector<8x128xf32>
    %427 = math.tanh %426 : vector<8x128xf32>
    %428 = arith.mulf %423, %427 : vector<8x128xf32>
    %429 = arith.truncf %428 : vector<8x128xf32> to vector<8x128xbf16>
    %c0_114 = arith.constant 0 : index
    %c0_115 = arith.constant 0 : index
    %430 = vector.load %arg4[%c0_114, %c0_115] : memref<128x128xbf16, #tpu.memory_space<vmem>>, vector<128x128xbf16>
    %cst_116 = arith.constant dense<0.000000e+00> : vector<8x128xf32>
    %431 = tpu.matmul %429, %430, %cst_116 {dimension_numbers = #tpu.dot_dimension_numbers<[1], [0], [0], [1], [0, 0, 1, 1], [], []>} : vector<8x128xbf16>, vector<128x128xbf16>, vector<8x128xf32> -> vector<8x128xf32>
    %c0_117 = arith.constant 0 : index
    %c0_118 = arith.constant 0 : index
    %432 = vector.load %arg5[%c0_117, %c0_118] : memref<1x128xf32, #tpu.memory_space<vmem>>, vector<1x128xf32>
    %433 = vector.broadcast %432 : vector<1x128xf32> to vector<8x128xf32>
    %434 = arith.addf %431, %433 : vector<8x128xf32>
    %c0_119 = arith.constant 0 : index
    %c0_120 = arith.constant 0 : index
    %435 = vector.load %arg6[%c0_119, %c0_120] : memref<8x128xf32, #tpu.memory_space<vmem>>, vector<8x128xf32>
    tpu.vector_store %arg6[%c0_119, %c0_120], %434 {strides = array<i32>} : memref<8x128xf32, #tpu.memory_space<vmem>>, vector<8x128xf32>,
    return
  }
}

</mosaic_0001>

<bundles_post_ra>
// kernel: activity_detection.1
= control target key start
LH: loop header
LB: loop body
LE: loop exit
PB: predicated region body
PF: predicated region fallthrough
CT: control target
= control target key end

     0   :  { %11 = vsyncpa [#allocation3], 0  ;;  %s4714_s0 = inlined_call_operand.vmem [shape: bf16[120,80], index: 0, kind: input, shape index: {}]   ;;  %s4715_s1 = inlined_call_operand.hbm [shape: bf16[80,1024], index: 1, kind: input, shape index: {}]   ;;  %s4716_s2 = inlined_call_operand.vmem [shape: f32[1,1024], index: 2, kind: input, shape index: {}]   ;;  %s4717_s3 = inlined_call_operand.hbm [shape: bf16[128,512], index: 3, kind: input, shape index: {}]   ;;  %s4718_s4 = inlined_call_operand.vmem [shape: bf16[128,128], index: 4, kind: input, shape index: {}]   ;;  %s4719_s5 = inlined_call_operand.vmem [shape: f32[1,128], index: 5, kind: input, shape index: {}]   ;;  %s4720_s6 = inlined_call_operand.vmem [shape: f32[8,128], index: 6, kind: output, shape index: {}]  }
   0x1   :  { %12 = vsyncpa [#allocation5], 0  ;;  %s3241_s21 = smov [#allocation2]   ;;  %s3193_s25 = scalar_lea.hbm %s4715_s1, 5120 }
   0x2   :  { %s20_s22 = sshll.u32 %s3241_s21, 4  ;;  %p3194_p0 = scmp.ne.s32.totalorder %s4715_s1, %s3193_s25  ;;  %s21_s22 = int_to_ptr.vmem [resolvable:$true] %s20_s22 }
   0x3   :  { %p3197_p1 = scmp.lt.u32.totalorder %s3193_s25, %s4715_s1 }
   0x5   :  { %p3199_p2 = pnand %p3197_p1, %p3194_p0 }
   0x7   :  { %3202 = shalt.err (!%p3199_p2)
}
   0x8   :  { %s3203_s30 = scalar_lea.vmem %s21_s22, 5120  ;;  %p3208_p4 = scmp.lt.s32.totalorder %s21_s22, %s21_s22 }
   0x9   :  { %p3204_p3 = scmp.ne.s32.totalorder %s21_s22, %s3203_s30  ;;  %p3209_p5 = scmp.lt.s32.totalorder %s3203_s30, %s3203_s30 }
   0xb   :  { %p3210_p6 = por %p3209_p5, %p3208_p4 }
   0xd   :  { %p3211_p7 = pnand %p3210_p6, %p3204_p3 }
   0xf   :  { %3214 = shalt.err (!%p3211_p7)
}
  0x10   :  { %s3242_s7 = smov 512   ;;  %s3243_s8 = smov 32  }
  0x11   :  { %26 = dma.hbm_to_vmem [thread:$0]  %s4715_s1, 5120, %s21_s22, [#allocation3], %s3242_s7, %s3242_s7, %s3243_s8  }
  0x12   :  { %s3244_s11 = smov [#allocation4]   ;;  %s3215_s15 = scalar_lea.hbm %s4717_s3, 4096 }
  0x13   :  { %s34_s12 = sshll.u32 %s3244_s11, 4  ;;  %p3216_p8 = scmp.ne.s32.totalorder %s4717_s3, %s3215_s15  ;;  %s35_s12 = int_to_ptr.vmem [resolvable:$true] %s34_s12 }
  0x14   :  { %p3219_p9 = scmp.lt.u32.totalorder %s3215_s15, %s4717_s3 }
  0x16   :  { %p3221_p10 = pnand %p3219_p9, %p3216_p8 }
  0x18   :  { %3224 = shalt.err (!%p3221_p10)
}
  0x19   :  { %s3225_s20 = scalar_lea.vmem %s35_s12, 4096  ;;  %p3230_p12 = scmp.lt.s32.totalorder %s35_s12, %s35_s12 }
  0x1a   :  { %p3226_p11 = scmp.ne.s32.totalorder %s35_s12, %s3225_s20  ;;  %p3231_p13 = scmp.lt.s32.totalorder %s3225_s20, %s3225_s20 }
  0x1c   :  { %p3232_p0 = por %p3231_p13, %p3230_p12 }
  0x1e   :  { %p3233_p1 = pnand %p3232_p0, %p3226_p11 }
  0x20   :  { %3236 = shalt.err (!%p3233_p1)
}
  0x21   :  { %s3245_s1 = smov 256   ;;  %s3246_s21 = smov 16  }
  0x22   :  { %40 = dma.hbm_to_vmem [thread:$0]  %s4717_s3, 4096, %s35_s12, [#allocation5], %s3245_s1, %s3245_s1, %s3246_s21  }
  0x23   :  { %3237 = dma.done.wait [#allocation3], 5120  }
  0x24   :  { %3238 = vsyncadd [#allocation3], 4294962176 }
  0x25   :  { %3239 = dma.done.wait [#allocation5], 4096  }
  0x26   :  { %3240 = vsyncadd [#allocation5], 4294963200  ;;  %v4721_v0 = vmov 0   ;;  %v67_v1 = vld [vmem:[#allocation2] sm:$0xff]  ;;  %v68_v3 = vld [vmem:[#allocation2 + $0x8] sm:$0xff]  ;;  %vm387_vm0 = vcmask 654336  }
  0x27   :  { %444 = vmatprep.mubr.bf16.mxu0 %v4721_v0  ;;  %555 = vmatprep.mubr.bf16.mxu1 %v4721_v0  ;;  %v71_v2 = vld [vmem:[#allocation2 + $0x20] sm:$0xff]  ;;  %v72_v5 = vld [vmem:[#allocation2 + $0x28] sm:$0xff]  ;;  %v69_v39 = vld [vmem:[#allocation2 + $0x10] sm:$0xff]  ;;  %vm3249_vm1 = vmmov 0  }
  0x28   :  { %v2765_v4 = vcombine.high %v67_v1, %v71_v2  ;;  %v2764_v6 = vcombine.low %v67_v1, %v71_v2  ;;  %v75_v7 = vld [vmem:[#allocation2 + $0x40] sm:$0xff]  ;;  %v2767_v9 = vcombine.high %v68_v3, %v72_v5  ;;  %v2766_v10 = vcombine.low %v68_v3, %v72_v5  ;;  %v76_v12 = vld [vmem:[#allocation2 + $0x48] sm:$0xff]  ;;  %v73_v40 = vld [vmem:[#allocation2 + $0x30] sm:$0xff] }
  0x29   :  { %v79_v8 = vld [vmem:[#allocation2 + $0x60] sm:$0xff]  ;;  %v80_v13 = vld [vmem:[#allocation2 + $0x68] sm:$0xff]  ;;  %v70_v41 = vld [vmem:[#allocation2 + $0x18] sm:$0xff]  ;;  %v2769_v45 = vcombine.high %v69_v39, %v73_v40  ;;  %v2768_v50 = vcombine.low %v69_v39, %v73_v40 }
  0x2a   :  { %v2773_v11 = vcombine.high %v75_v7, %v79_v8  ;;  %v83_v14 = vld [vmem:[#allocation2 + $0x80] sm:$0xff]  ;;  %412 = vmatprep.subr.bf16.mxu0 %v2765_v4  ;;  %v2775_v15 = vcombine.high %v76_v12, %v80_v13  ;;  %v84_v17 = vld [vmem:[#allocation2 + $0x88] sm:$0xff]  ;;  %523 = vmatprep.subr.bf16.mxu1 %v2767_v9  ;;  %v2772_v19 = vcombine.low %v75_v7, %v79_v8  ;;  %v74_v42 = vld [vmem:[#allocation2 + $0x38] sm:$0xff] }
  0x2b   :  { %v87_v16 = vld [vmem:[#allocation2 + $0xa0] sm:$0xff]  ;;  %v88_v18 = vld [vmem:[#allocation2 + $0xa8] sm:$0xff]  ;;  %413 = vmatpush1.bf16.msra.mxu0 %v2764_v6  ;;  %524 = vmatpush1.bf16.msra.mxu1 %v2766_v10  ;;  %v2774_v20 = vcombine.low %v76_v12, %v80_v13  ;;  %v2771_v47 = vcombine.high %v70_v41, %v74_v42  ;;  %v77_v48 = vld [vmem:[#allocation2 + $0x50] sm:$0xff]  ;;  %v2770_v53 = vcombine.low %v70_v41, %v74_v42 }
  0x2c   :  { %414 = vmatprep.subr.bf16.mxu0 %v2773_v11  ;;  %v2781_v21 = vcombine.high %v83_v14, %v87_v16  ;;  %525 = vmatprep.subr.bf16.mxu1 %v2775_v15  ;;  %v2783_v22 = vcombine.high %v84_v17, %v88_v18  ;;  %v91_v23 = vld [vmem:[#allocation2 + $0xc0] sm:$0xff]  ;;  %v92_v25 = vld [vmem:[#allocation2 + $0xc8] sm:$0xff]  ;;  %v2780_v27 = vcombine.low %v83_v14, %v87_v16  ;;  %v81_v49 = vld [vmem:[#allocation2 + $0x70] sm:$0xff] }
  0x2d   :  { %v95_v24 = vld [vmem:[#allocation2 + $0xe0] sm:$0xff]  ;;  %v96_v26 = vld [vmem:[#allocation2 + $0xe8] sm:$0xff]  ;;  %v2782_v28 = vcombine.low %v84_v17, %v88_v18  ;;  %v78_v51 = vld [vmem:[#allocation2 + $0x58] sm:$0xff]  ;;  %v2777_v55 = vcombine.high %v77_v48, %v81_v49  ;;  %v2776_v60 = vcombine.low %v77_v48, %v81_v49 }
  0x2e   :  { %v2789_v29 = vcombine.high %v91_v23, %v95_v24  ;;  %v2791_v30 = vcombine.high %v92_v25, %v96_v26  ;;  %v99_v31 = vld [vmem:[#allocation2 + $0x100] sm:$0xff]  ;;  %v100_v33 = vld [vmem:[#allocation2 + $0x108] sm:$0xff]  ;;  %v2788_v35 = vcombine.low %v91_v23, %v95_v24  ;;  %v2790_v36 = vcombine.low %v92_v25, %v96_v26  ;;  %v82_v52 = vld [vmem:[#allocation2 + $0x78] sm:$0xff] }
  0x2f   :  { %415 = vmatpush1.bf16.msra.mxu0 %v2772_v19  ;;  %526 = vmatpush1.bf16.msra.mxu1 %v2774_v20  ;;  %v103_v32 = vld [vmem:[#allocation2 + $0x120] sm:$0xff]  ;;  %v104_v34 = vld [vmem:[#allocation2 + $0x128] sm:$0xff]  ;;  %v85_v54 = vld [vmem:[#allocation2 + $0x90] sm:$0xff]  ;;  %v2779_v57 = vcombine.high %v78_v51, %v82_v52  ;;  %v2778_v61 = vcombine.low %v78_v51, %v82_v52 }
  0x30   :  { %416 = vmatprep.subr.bf16.mxu0 %v2781_v21  ;;  %527 = vmatprep.subr.bf16.mxu1 %v2783_v22  ;;  %v2797_v37 = vcombine.high %v99_v31, %v103_v32  ;;  %v2799_v38 = vcombine.high %v100_v33, %v104_v34  ;;  %v2796_v43 = vcombine.low %v99_v31, %v103_v32  ;;  %v3314_v46 = vld [vmem:[%s4714_s0] sm:$0xff]   ;;  %v89_v56 = vld [vmem:[#allocation2 + $0xb0] sm:$0xff]  ;;  %v86_v58 = vld [vmem:[#allocation2 + $0x98] sm:$0xff] }
  0x31   :  { %v2798_v44 = vcombine.low %v100_v33, %v104_v34  ;;  %v90_v59 = vld [vmem:[#allocation2 + $0xb8] sm:$0xff]  ;;  %v2785_v62 = vcombine.high %v85_v54, %v89_v56  ;;  %v3325_v63 = vld [vmem:[%s4714_s0 + $0x8] sm:$0xff]   ;;  %v93_v2 = vld [vmem:[#allocation2 + $0xd0] sm:$0xff]  ;;  %v2784_v6 = vcombine.low %v85_v54, %v89_v56 }
  0x32   :  { %v2787_v1 = vcombine.high %v86_v58, %v90_v59  ;;  %v97_v3 = vld [vmem:[#allocation2 + $0xf0] sm:$0xff]  ;;  %v94_v4 = vld [vmem:[#allocation2 + $0xd8] sm:$0xff]  ;;  %v2786_v7 = vcombine.low %v86_v58, %v90_v59  ;;  %v3364_v24 = vld [vmem:[%s4714_s0 + $0x20] sm:$0xff]   ;;  %v109_v58 = vlaneseq }
  0x33   :  { %417 = vmatpush1.bf16.msra.mxu0 %v2780_v27  ;;  %528 = vmatpush1.bf16.msra.mxu1 %v2782_v28  ;;  %v98_v5 = vld [vmem:[#allocation2 + $0xf8] sm:$0xff]  ;;  %v2793_v8 = vcombine.high %v93_v2, %v97_v3  ;;  %v101_v10 = vld [vmem:[#allocation2 + $0x110] sm:$0xff]  ;;  %v2792_v14 = vcombine.low %v93_v2, %v97_v3  ;;  %v3375_v25 = vld [vmem:[%s4714_s0 + $0x28] sm:$0xff]  }
  0x34   :  { %418 = vmatprep.subr.bf16.mxu0 %v2789_v29  ;;  %529 = vmatprep.subr.bf16.mxu1 %v2791_v30  ;;  %v2795_v9 = vcombine.high %v94_v4, %v98_v5  ;;  %v105_v11 = vld [vmem:[#allocation2 + $0x130] sm:$0xff]  ;;  %v102_v12 = vld [vmem:[#allocation2 + $0x118] sm:$0xff]  ;;  %v2794_v15 = vcombine.low %v94_v4, %v98_v5  ;;  %v3581_v59 = vshrl.u32 %v109_v58, 7 }
  0x35   :  { %v106_v13 = vld [vmem:[#allocation2 + $0x138] sm:$0xff]  ;;  %v2801_v16 = vcombine.high %v101_v10, %v105_v11  ;;  %v3336_v17 = vld [vmem:[%s4714_s0 + $0x10] sm:$0xff]   ;;  %v2800_v19 = vcombine.low %v101_v10, %v105_v11 }
  0x36   :  { %v2803_v18 = vcombine.high %v102_v12, %v106_v13  ;;  %v2802_v20 = vcombine.low %v102_v12, %v106_v13  ;;  %v3338_v21 = vld [vmem:[#allocation4 + $0x4] ss:$16 sps:$4 sm:$0xff]   ;;  %v3342_v22 = vld [vmem:[#allocation4 + $0xc] ss:$16 sps:$4 sm:$0xff]   ;;  %v3397_v27 = vld [vmem:[%s4714_s0 + $0x38] ss:$0 sps:$4 sm:$0xff]  }
  0x37   :  { %419 = vmatpush1.bf16.msra.mxu0 %v2788_v35  ;;  %530 = vmatpush1.bf16.msra.mxu1 %v2790_v36  ;;  %v3351_v23 = vld [vmem:[%s4714_s0 + $0x18] sm:$0xff]   ;;  %v3386_v26 = vld [vmem:[%s4714_s0 + $0x30] sm:$0xff]  }
  0x38   :  { %420 = vmatprep.subr.bf16.mxu0 %v2797_v37  ;;  %531 = vmatprep.subr.bf16.mxu1 %v2799_v38  ;;  %v3405_v28 = vld [vmem:[#allocation4] ss:$16 sps:$4 sm:$0xff]   ;;  %v3407_v29 = vld [vmem:[#allocation4 + $0x8] ss:$16 sps:$4 sm:$0xff]   ;;  %v3409_v30 = vld [vmem:[#allocation4 + $0x24] ss:$16 sps:$4 sm:$0xff]  }
  0x39   :  { %4757 = vst [vmem:[#allocation8_spill] sm:$0xff] %v3405_v28  ;;  %4758 = vst [vmem:[#allocation9_spill] sm:$0xff] %v3407_v29  ;;  %v3413_v31 = vld [vmem:[#allocation4 + $0x2c] ss:$16 sps:$4 sm:$0xff]   ;;  %v3418_v32 = vld [vmem:[#allocation4 + $0x20] ss:$16 sps:$4 sm:$0xff]  }
  0x3a   :  { %4759 = vst [vmem:[#allocation10_spill] sm:$0xff] %v3409_v30  ;;  %4760 = vst [vmem:[#allocation11_spill] sm:$0xff] %v3413_v31  ;;  %v3422_v33 = vld [vmem:[#allocation4 + $0x28] ss:$16 sps:$4 sm:$0xff]   ;;  %v3424_v34 = vld [vmem:[#allocation4 + $0x44] ss:$16 sps:$4 sm:$0xff]  }
  0x3b   :  { %421 = vmatpush1.bf16.msra.mxu0 %v2796_v43  ;;  %532 = vmatpush1.bf16.msra.mxu1 %v2798_v44  ;;  %4761 = vst [vmem:[#allocation12_spill] sm:$0xff] %v3418_v32  ;;  %4762 = vst [vmem:[#allocation13_spill] sm:$0xff] %v3422_v33  ;;  %v3428_v35 = vld [vmem:[#allocation4 + $0x4c] ss:$16 sps:$4 sm:$0xff]   ;;  %v3434_v36 = vld [vmem:[#allocation4 + $0x40] ss:$16 sps:$4 sm:$0xff]  }
  0x3c   :  { %634 = vmatprep.subr.bf16.mxu0 %v2769_v45  ;;  %745 = vmatprep.subr.bf16.mxu1 %v2771_v47  ;;  %4763 = vst [vmem:[#allocation14_spill] sm:$0xff] %v3424_v34  ;;  %4764 = vst [vmem:[#allocation15_spill] sm:$0xff] %v3428_v35  ;;  %v3437_v37 = vld [vmem:[#allocation4 + $0x48] ss:$16 sps:$4 sm:$0xff]   ;;  %v3439_v38 = vld [vmem:[#allocation4 + $0x64] ss:$16 sps:$4 sm:$0xff]  }
  0x3d   :  { %4765 = vst [vmem:[#allocation16_spill] sm:$0xff] %v3434_v36  ;;  %4766 = vst [vmem:[#allocation17_spill] sm:$0xff] %v3437_v37  ;;  %v3443_v39 = vld [vmem:[#allocation4 + $0x6c] ss:$16 sps:$4 sm:$0xff]   ;;  %v3450_v40 = vld [vmem:[#allocation4 + $0x60] ss:$16 sps:$4 sm:$0xff]  }
  0x3e   :  { %2804 = vmatmul.mubr.msk.bf16.vlgmr.msra.gmra.mrb[0].mxu0 %vm387_vm0, %v3314_v46  ;;  %2812 = vmatmul.mubr.msk.bf16.vlgmr.msra.gmra.mrb[0].mxu1 %vm387_vm0, %v3314_v46  ;;  %4767 = vst [vmem:[#allocation18_spill] sm:$0xff] %v3439_v38  ;;  %4768 = vst [vmem:[#allocation19_spill] sm:$0xff] %v3443_v39  ;;  %v3454_v41 = vld [vmem:[#allocation4 + $0x68] ss:$16 sps:$4 sm:$0xff]   ;;  %v3456_v42 = vld [vmem:[#allocation4 + $0x84] ss:$16 sps:$4 sm:$0xff]  }
  0x3f   :  { %635 = vmatpush1.bf16.msra.mxu0 %v2768_v50  ;;  %746 = vmatpush1.bf16.msra.mxu1 %v2770_v53  ;;  %4769 = vst [vmem:[#allocation20_spill] sm:$0xff] %v3450_v40  ;;  %4770 = vst [vmem:[#allocation21_spill] sm:$0xff] %v3454_v41  ;;  %v3459_v43 = vld [vmem:[#allocation4 + $0x8c] ss:$16 sps:$4 sm:$0xff]   ;;  %v3462_v44 = vld [vmem:[#allocation4 + $0x80] ss:$16 sps:$4 sm:$0xff]  }
  0x40   :  { %454 = vmatprep.mubr.bf16.mxu0 %v4721_v0  ;;  %565 = vmatprep.mubr.bf16.mxu1 %v4721_v0  ;;  %4771 = vst [vmem:[#allocation22_spill] sm:$0xff] %v3456_v42  ;;  %4772 = vst [vmem:[#allocation23_spill] sm:$0xff] %v3459_v43  ;;  %v3466_v45 = vld [vmem:[#allocation4 + $0x88] ss:$16 sps:$4 sm:$0xff]   ;;  %v3473_v47 = vld [vmem:[#allocation4 + $0xac] ss:$16 sps:$4 sm:$0xff]  }
  0x41   :  { %636 = vmatprep.subr.bf16.mxu0 %v2777_v55  ;;  %747 = vmatprep.subr.bf16.mxu1 %v2779_v57  ;;  %4773 = vst [vmem:[#allocation24_spill] sm:$0xff] %v3462_v44  ;;  %4774 = vst [vmem:[#allocation25_spill] sm:$0xff] %v3466_v45  ;;  %v3480_v48 = vld [vmem:[#allocation4 + $0xa0] ss:$16 sps:$4 sm:$0xff]   ;;  %v3484_v49 = vld [vmem:[#allocation4 + $0xa8] ss:$16 sps:$4 sm:$0xff]  }
  0x42   :  { %4776 = vst [vmem:[#allocation27_spill] sm:$0xff] %v3473_v47  ;;  %4777 = vst [vmem:[#allocation28_spill] sm:$0xff] %v3480_v48  ;;  %v3486_v50 = vld [vmem:[#allocation4 + $0xc4] ss:$16 sps:$4 sm:$0xff]   ;;  %v3489_v51 = vld [vmem:[#allocation4 + $0xcc] ss:$16 sps:$4 sm:$0xff]  }
  0x43   :  { %637 = vmatpush1.bf16.msra.mxu0 %v2776_v60  ;;  %748 = vmatpush1.bf16.msra.mxu1 %v2778_v61  ;;  %4778 = vst [vmem:[#allocation29_spill] sm:$0xff] %v3484_v49  ;;  %4779 = vst [vmem:[#allocation30_spill] sm:$0xff] %v3486_v50  ;;  %v3492_v52 = vld [vmem:[#allocation4 + $0xc0] ss:$16 sps:$4 sm:$0xff]   ;;  %v3496_v53 = vld [vmem:[#allocation4 + $0xc8] ss:$16 sps:$4 sm:$0xff]  }
  0x44   :  { %638 = vmatprep.subr.bf16.mxu0 %v2785_v62  ;;  %749 = vmatprep.subr.bf16.mxu1 %v2787_v1  ;;  %4780 = vst [vmem:[#allocation31_spill] sm:$0xff] %v3489_v51  ;;  %4781 = vst [vmem:[#allocation32_spill] sm:$0xff] %v3492_v52  ;;  %v3498_v54 = vld [vmem:[#allocation4 + $0xe4] ss:$16 sps:$4 sm:$0xff]   ;;  %v3503_v55 = vld [vmem:[#allocation4 + $0xec] ss:$16 sps:$4 sm:$0xff]  }
  0x45   :  { %4782 = vst [vmem:[#allocation33_spill] sm:$0xff] %v3496_v53  ;;  %4783 = vst [vmem:[#allocation34_spill] sm:$0xff] %v3498_v54  ;;  %v3510_v56 = vld [vmem:[#allocation4 + $0xe0] ss:$16 sps:$4 sm:$0xff]   ;;  %v3514_v57 = vld [vmem:[#allocation4 + $0xe8] ss:$16 sps:$4 sm:$0xff]  }
  0x46   :  { %2805 = vmatmul.mubr.msk.bf16.gmra.mrb[4].mxu0 %vm387_vm0, %v3325_v63  ;;  %2813 = vmatmul.mubr.msk.bf16.gmra.mrb[4].mxu1 %vm387_vm0, %v3325_v63  ;;  %4784 = vst [vmem:[#allocation35_spill] sm:$0xff] %v3503_v55  ;;  %4785 = vst [vmem:[#allocation36_spill] sm:$0xff] %v3510_v56  ;;  %v119_v60 = vsub.s32 2, %v3581_v59  ;;  %v111_v61 = vsub.s32 0, %v3581_v59  ;;  %v123_v62 = vsub.s32 3, %v3581_v59  ;;  %v115_v1 = vsub.s32 1, %v3581_v59 }
  0x47   :  { %464 = vmatprep.mubr.bf16.mxu0 %v4721_v0  ;;  %575 = vmatprep.mubr.bf16.mxu1 %v4721_v0  ;;  %4786 = vst [vmem:[#allocation37_spill] sm:$0xff] %v3514_v57 }
  0x48   :  { %639 = vmatpush1.bf16.msra.mxu0 %v2784_v6  ;;  %750 = vmatpush1.bf16.msra.mxu1 %v2786_v7 }
  0x49   :  { %640 = vmatprep.subr.bf16.mxu0 %v2793_v8  ;;  %751 = vmatprep.subr.bf16.mxu1 %v2795_v9 }
  0x4c   :  { %641 = vmatpush1.bf16.msra.mxu0 %v2792_v14  ;;  %752 = vmatpush1.bf16.msra.mxu1 %v2794_v15 }
  0x4d   :  { %642 = vmatprep.subr.bf16.mxu0 %v2801_v16  ;;  %753 = vmatprep.subr.bf16.mxu1 %v2803_v18 }
  0x4e   :  { %2806 = vmatmul.mubr.msk.bf16.gmra.mrb[8].mxu0 %vm387_vm0, %v3336_v17  ;;  %2814 = vmatmul.mubr.msk.bf16.gmra.mrb[8].mxu1 %vm387_vm0, %v3336_v17 }
  0x4f   :  { %474 = vmatprep.mubr.bf16.mxu0 %v4721_v0  ;;  %585 = vmatprep.mubr.bf16.mxu1 %v4721_v0 }
  0x50   :  { %643 = vmatpush1.bf16.msra.mxu0 %v2800_v19  ;;  %754 = vmatpush1.bf16.msra.mxu1 %v2802_v20 }
  0x51   :  { %1052 = vmatprep.subr.bf16.mxu0 %v3338_v21  ;;  %1093 = vmatprep.subr.bf16.mxu1 %v3342_v22 }
  0x56   :  { %2807 = vmatmul.mubr.msk.bf16.gmra.mrb[12].mxu0 %vm387_vm0, %v3351_v23  ;;  %2815 = vmatmul.mubr.msk.bf16.gmra.mrb[12].mxu1 %vm387_vm0, %v3351_v23 }
  0x57   :  { %484 = vmatprep.mubr.bf16.mxu0 %v4721_v0  ;;  %595 = vmatprep.mubr.bf16.mxu1 %v4721_v0 }
  0x5e   :  { %2808 = vmatmul.mubr.msk.bf16.gmra.mrb[16].mxu0 %vm387_vm0, %v3364_v24  ;;  %2816 = vmatmul.mubr.msk.bf16.gmra.mrb[16].mxu1 %vm387_vm0, %v3364_v24 }
  0x5f   :  { %494 = vmatprep.mubr.bf16.mxu0 %v4721_v0  ;;  %605 = vmatprep.mubr.bf16.mxu1 %v4721_v0 }
  0x66   :  { %2809 = vmatmul.mubr.msk.bf16.gmra.mrb[20].mxu0 %vm387_vm0, %v3375_v25  ;;  %2817 = vmatmul.mubr.msk.bf16.gmra.mrb[20].mxu1 %vm387_vm0, %v3375_v25 }
  0x67   :  { %504 = vmatprep.mubr.bf16.mxu0 %v4721_v0  ;;  %615 = vmatprep.mubr.bf16.mxu1 %v4721_v0 }
  0x6e   :  { %2810 = vmatmul.mubr.msk.bf16.gmra.mrb[24].mxu0 %vm387_vm0, %v3386_v26  ;;  %2818 = vmatmul.mubr.msk.bf16.gmra.mrb[24].mxu1 %vm387_vm0, %v3386_v26 }
  0x6f   :  { %514 = vmatprep.mubr.bf16.mxu0 %v4721_v0  ;;  %625 = vmatprep.mubr.bf16.mxu1 %v4721_v0 }
  0x76   :  { %2811 = vmatmul.mubr.msk.bf16.gmra.mrb[28].mxu0 %vm387_vm0, %v3397_v27  ;;  %2819 = vmatmul.mubr.msk.bf16.gmra.mrb[28].mxu1 %vm387_vm0, %v3397_v27 }
  0x77   :  { %666 = vmatprep.mubr.bf16.mxu0 %v4721_v0  ;;  %777 = vmatprep.mubr.bf16.mxu1 %v4721_v0 }
  0x7e   :  { %2820 = vmatmul.mubr.msk.bf16.vlgmr.msra.gmra.mrb[32].mxu0 %vm387_vm0, %v3314_v46  ;;  %2828 = vmatmul.mubr.msk.bf16.vlgmr.msra.gmra.mrb[32].mxu1 %vm387_vm0, %v3314_v46  ;;  %v3468_v46 = vld [vmem:[#allocation4 + $0xa4] ss:$16 sps:$4 sm:$0xff]  }
  0x7f   :  { %1053 = vmatpush1.bf16.msra.mxu0 %v3405_v28  ;;  %1094 = vmatpush1.bf16.msra.mxu1 %v3407_v29  ;;  %4775 = vst [vmem:[#allocation26_spill] sm:$0xff] %v3468_v46 }
  0x80   :  { %676 = vmatprep.mubr.bf16.mxu0 %v4721_v0  ;;  %787 = vmatprep.mubr.bf16.mxu1 %v4721_v0 }
  0x81   :  { %1054 = vmatprep.subr.bf16.mxu0 %v3409_v30  ;;  %1095 = vmatprep.subr.bf16.mxu1 %v3413_v31 }
  0x83   :  { %1055 = vmatpush1.bf16.msra.mxu0 %v3418_v32  ;;  %1096 = vmatpush1.bf16.msra.mxu1 %v3422_v33 }
  0x84   :  { %1056 = vmatprep.subr.bf16.mxu0 %v3424_v34  ;;  %1097 = vmatprep.subr.bf16.mxu1 %v3428_v35 }
  0x86   :  { %2821 = vmatmul.mubr.msk.bf16.gmra.mrb[36].mxu0 %vm387_vm0, %v3325_v63  ;;  %2829 = vmatmul.mubr.msk.bf16.gmra.mrb[36].mxu1 %vm387_vm0, %v3325_v63  ;;  %v3589_v63 = vld [vmem:[%s4716_s2] sm:$0xff] }
  0x87   :  { %686 = vmatprep.mubr.bf16.mxu0 %v4721_v0  ;;  %797 = vmatprep.mubr.bf16.mxu1 %v4721_v0  ;;  %v3595_v3 = vrot.slane %v3589_v63, %v119_v60  ;;  %v3598_v4 = vrot.slane %v3589_v63, %v111_v61  ;;  %v3605_v7 = vrot.slane %v3589_v63, %v123_v62 }
  0x88   :  { %1057 = vmatpush1.bf16.msra.mxu0 %v3434_v36  ;;  %1098 = vmatpush1.bf16.msra.mxu1 %v3437_v37  ;;  %v3608_v8 = vrot.slane %v3589_v63, %v115_v1 }
  0x89   :  { %1058 = vmatprep.subr.bf16.mxu0 %v3439_v38  ;;  %1099 = vmatprep.subr.bf16.mxu1 %v3443_v39  ;;  %4788 = vst [vmem:[#allocation39_spill] sm:$0xff] %v3595_v3  ;;  %4789 = vst [vmem:[#allocation40_spill] sm:$0xff] %v3598_v4 }
  0x8a   :  { %4792 = vst [vmem:[#allocation43_spill] sm:$0xff] %v3605_v7  ;;  %4793 = vst [vmem:[#allocation44_spill] sm:$0xff] %v3608_v8 }
  0x8c   :  { %1059 = vmatpush1.bf16.msra.mxu0 %v3450_v40  ;;  %1100 = vmatpush1.bf16.msra.mxu1 %v3454_v41 }
  0x8d   :  { %1060 = vmatprep.subr.bf16.mxu0 %v3456_v42  ;;  %1101 = vmatprep.subr.bf16.mxu1 %v3459_v43 }
  0x8e   :  { %2822 = vmatmul.mubr.msk.bf16.gmra.mrb[40].mxu0 %vm387_vm0, %v3336_v17  ;;  %2830 = vmatmul.mubr.msk.bf16.gmra.mrb[40].mxu1 %vm387_vm0, %v3336_v17 }
  0x8f   :  { %696 = vmatprep.mubr.bf16.mxu0 %v4721_v0  ;;  %807 = vmatprep.mubr.bf16.mxu1 %v4721_v0 }
  0x90   :  { %1061 = vmatpush1.bf16.msra.mxu0 %v3462_v44  ;;  %1102 = vmatpush1.bf16.msra.mxu1 %v3466_v45 }
  0x91   :  { %1062 = vmatprep.subr.bf16.mxu0 %v3468_v46  ;;  %1103 = vmatprep.subr.bf16.mxu1 %v3473_v47 }
  0x94   :  { %1063 = vmatpush1.bf16.msra.mxu0 %v3480_v48  ;;  %1104 = vmatpush1.bf16.msra.mxu1 %v3484_v49 }
  0x95   :  { %1064 = vmatprep.subr.bf16.mxu0 %v3486_v50  ;;  %1105 = vmatprep.subr.bf16.mxu1 %v3489_v51 }
  0x96   :  { %2823 = vmatmul.mubr.msk.bf16.gmra.mrb[44].mxu0 %vm387_vm0, %v3351_v23  ;;  %2831 = vmatmul.mubr.msk.bf16.gmra.mrb[44].mxu1 %vm387_vm0, %v3351_v23 }
  0x97   :  { %706 = vmatprep.mubr.bf16.mxu0 %v4721_v0  ;;  %817 = vmatprep.mubr.bf16.mxu1 %v4721_v0 }
  0x98   :  { %1065 = vmatpush1.bf16.msra.mxu0 %v3492_v52  ;;  %1106 = vmatpush1.bf16.msra.mxu1 %v3496_v53 }
  0x99   :  { %1066 = vmatprep.subr.bf16.mxu0 %v3498_v54  ;;  %1107 = vmatprep.subr.bf16.mxu1 %v3503_v55 }
  0x9c   :  { %1067 = vmatpush1.bf16.msra.mxu0 %v3510_v56  ;;  %1108 = vmatpush1.bf16.msra.mxu1 %v3514_v57 }
  0x9d   :  { %1158 = vmatprep.subr.bf16.mxu0 %v3338_v21  ;;  %1199 = vmatprep.subr.bf16.mxu1 %v3342_v22 }
  0x9e   :  { %2824 = vmatmul.mubr.msk.bf16.gmra.mrb[48].mxu0 %vm387_vm0, %v3364_v24  ;;  %2832 = vmatmul.mubr.msk.bf16.gmra.mrb[48].mxu1 %vm387_vm0, %v3364_v24 }
  0x9f   :  { %716 = vmatprep.mubr.bf16.mxu0 %v4721_v0  ;;  %827 = vmatprep.mubr.bf16.mxu1 %v4721_v0 }
  0xa6   :  { %2825 = vmatmul.mubr.msk.bf16.gmra.mrb[52].mxu0 %vm387_vm0, %v3375_v25  ;;  %2833 = vmatmul.mubr.msk.bf16.gmra.mrb[52].mxu1 %vm387_vm0, %v3375_v25 }
  0xa7   :  { %726 = vmatprep.mubr.bf16.mxu0 %v4721_v0  ;;  %837 = vmatprep.mubr.bf16.mxu1 %v4721_v0 }
  0xae   :  { %2826 = vmatmul.mubr.msk.bf16.gmra.mrb[56].mxu0 %vm387_vm0, %v3386_v26  ;;  %2834 = vmatmul.mubr.msk.bf16.gmra.mrb[56].mxu1 %vm387_vm0, %v3386_v26 }
  0xaf   :  { %736 = vmatprep.mubr.bf16.mxu0 %v4721_v0  ;;  %847 = vmatprep.mubr.bf16.mxu1 %v4721_v0 }
  0xb6   :  { %2827 = vmatmul.mubr.msk.bf16.gmra.mrb[60].mxu0 %vm387_vm0, %v3397_v27  ;;  %2835 = vmatmul.mubr.msk.bf16.gmra.mrb[60].mxu1 %vm387_vm0, %v3397_v27 }
  0xb7   :  { %1084 = vmatprep.mubr.bf16.mxu0 %v4721_v0  ;;  %1125 = vmatprep.mubr.bf16.mxu1 %v4721_v0 }
  0xbe   :  { %1085 = vmatmul.mubr.bf16.vlgmr.msra.gmra.mrb[64].mxu0 %v4721_v0  ;;  %1126 = vmatmul.mubr.bf16.vlgmr.msra.gmra.mrb[64].mxu1 %v4721_v0 }
  0xbf   :  { %1159 = vmatpush1.bf16.msra.mxu0 %v3405_v28  ;;  %1200 = vmatpush1.bf16.msra.mxu1 %v3407_v29 }
  0xc0   :  { %1160 = vmatprep.subr.bf16.mxu0 %v3409_v30  ;;  %1201 = vmatprep.subr.bf16.mxu1 %v3413_v31 }
  0xc1   :  { %1190 = vmatprep.mubr.bf16.mxu0 %v4721_v0  ;;  %1231 = vmatprep.mubr.bf16.mxu1 %v4721_v0 }
  0xc3   :  { %1161 = vmatpush1.bf16.msra.mxu0 %v3418_v32  ;;  %1202 = vmatpush1.bf16.msra.mxu1 %v3422_v33 }
  0xc4   :  { %1162 = vmatprep.subr.bf16.mxu0 %v3424_v34  ;;  %1203 = vmatprep.subr.bf16.mxu1 %v3428_v35 }
  0xc7   :  { %1163 = vmatpush1.bf16.msra.mxu0 %v3434_v36  ;;  %1204 = vmatpush1.bf16.msra.mxu1 %v3437_v37 }
  0xc8   :  { %1164 = vmatprep.subr.bf16.mxu0 %v3439_v38  ;;  %1205 = vmatprep.subr.bf16.mxu1 %v3443_v39 }
  0xcb   :  { %1165 = vmatpush1.bf16.msra.mxu0 %v3450_v40  ;;  %1206 = vmatpush1.bf16.msra.mxu1 %v3454_v41 }
  0xcc   :  { %1166 = vmatprep.subr.bf16.mxu0 %v3456_v42  ;;  %1207 = vmatprep.subr.bf16.mxu1 %v3459_v43 }
  0xcf   :  { %1167 = vmatpush1.bf16.msra.mxu0 %v3462_v44  ;;  %1208 = vmatpush1.bf16.msra.mxu1 %v3466_v45 }
  0xd0   :  { %1168 = vmatprep.subr.bf16.mxu0 %v3468_v46  ;;  %1209 = vmatprep.subr.bf16.mxu1 %v3473_v47 }
  0xd3   :  { %1169 = vmatpush1.bf16.msra.mxu0 %v3480_v48  ;;  %1210 = vmatpush1.bf16.msra.mxu1 %v3484_v49 }
  0xd4   :  { %1170 = vmatprep.subr.bf16.mxu0 %v3486_v50  ;;  %1211 = vmatprep.subr.bf16.mxu1 %v3489_v51 }
  0xd7   :  { %1171 = vmatpush1.bf16.msra.mxu0 %v3492_v52  ;;  %1212 = vmatpush1.bf16.msra.mxu1 %v3496_v53 }
  0xd8   :  { %1172 = vmatprep.subr.bf16.mxu0 %v3498_v54  ;;  %1213 = vmatprep.subr.bf16.mxu1 %v3503_v55 }
  0xdb   :  { %1173 = vmatpush1.bf16.msra.mxu0 %v3510_v56  ;;  %1214 = vmatpush1.bf16.msra.mxu1 %v3514_v57 }
  0xdc   :  { %1264 = vmatprep.subr.bf16.mxu0 %v3338_v21  ;;  %1305 = vmatprep.subr.bf16.mxu1 %v3342_v22 }
 0x111   :  { %v3592_v2 = vpop.f32.mrb[0].mxu0  ;;  %v3602_v6 = vpop.f32.mrb[0].mxu1 }
 0x112   :  { %4787 = vst [vmem:[#allocation38_spill] sm:$0xff] %v3592_v2  ;;  %v3600_v5 = vpop.f32.mrb[1].mxu0  ;;  %4791 = vst [vmem:[#allocation42_spill] sm:$0xff] %v3602_v6  ;;  %v3610_v10 = vpop.f32.mrb[1].mxu1 }
 0x113   :  { %4790 = vst [vmem:[#allocation41_spill] sm:$0xff] %v3600_v5  ;;  %v450_v9 = vpop.f32.mrb[2].mxu0  ;;  %4794 = vst [vmem:[#allocation45_spill] sm:$0xff] %v3610_v10  ;;  %v561_v13 = vpop.f32.mrb[2].mxu1 }
 0x114   :  { %v3613_v11 = vadd.f32 %v450_v9, %v3598_v4  ;;  %v452_v12 = vpop.f32.mrb[3].mxu0  ;;  %v3619_v15 = vadd.f32 %v561_v13, %v3595_v3  ;;  %v563_v16 = vpop.f32.mrb[3].mxu1 }
 0x115   :  { %v3616_v14 = vadd.f32 %v452_v12, %v3608_v8  ;;  %v3622_v17 = vadd.f32 %v563_v16, %v3605_v7 }
 0x116   :  { %4795 = vst [vmem:[#allocation46_spill] sm:$0xff] %v3613_v11  ;;  %4797 = vst [vmem:[#allocation48_spill] sm:$0xff] %v3619_v15 }
 0x117   :  { %4796 = vst [vmem:[#allocation47_spill] sm:$0xff] %v3616_v14  ;;  %4798 = vst [vmem:[#allocation49_spill] sm:$0xff] %v3622_v17 }
 0x119   :  { %v456_v18 = vpop.f32.mrb[4].mxu0  ;;  %v567_v21 = vpop.f32.mrb[4].mxu1 }
 0x11a   :  { %v3625_v19 = vadd.f32 %v456_v18, %v3598_v4  ;;  %v458_v20 = vpop.f32.mrb[5].mxu0  ;;  %v3631_v24 = vadd.f32 %v567_v21, %v3595_v3  ;;  %v569_v25 = vpop.f32.mrb[5].mxu1 }
 0x11b   :  { %v3628_v22 = vadd.f32 %v458_v20, %v3608_v8  ;;  %v460_v23 = vpop.f32.mrb[6].mxu0  ;;  %v3637_v58 = vadd.f32 %v569_v25, %v3605_v7  ;;  %v571_v60 = vpop.f32.mrb[6].mxu1 }
 0x11c   :  { %4799 = vst [vmem:[#allocation50_spill] sm:$0xff] %v3625_v19  ;;  %4801 = vst [vmem:[#allocation52_spill] sm:$0xff] %v3631_v24  ;;  %v3634_v26 = vadd.f32 %v460_v23, %v3598_v4  ;;  %v462_v27 = vpop.f32.mrb[7].mxu0  ;;  %v3643_v62 = vadd.f32 %v571_v60, %v3595_v3  ;;  %v573_v1 = vpop.f32.mrb[7].mxu1 }
 0x11d   :  { %4800 = vst [vmem:[#allocation51_spill] sm:$0xff] %v3628_v22  ;;  %4803 = vst [vmem:[#allocation54_spill] sm:$0xff] %v3637_v58  ;;  %v3640_v61 = vadd.f32 %v462_v27, %v3608_v8  ;;  %v3646_v9 = vadd.f32 %v573_v1, %v3605_v7  ;;  %v127_v58 = vsub.s32 4, %v3581_v59 }
 0x11e   :  { %4802 = vst [vmem:[#allocation53_spill] sm:$0xff] %v3634_v26  ;;  %4805 = vst [vmem:[#allocation56_spill] sm:$0xff] %v3643_v62 }
 0x11f   :  { %4804 = vst [vmem:[#allocation55_spill] sm:$0xff] %v3640_v61  ;;  %4806 = vst [vmem:[#allocation57_spill] sm:$0xff] %v3646_v9  ;;  %v3769_v9 = vrot.slane %v3589_v63, %v127_v58 }
 0x121   :  { %v466_v12 = vpop.f32.mrb[8].mxu0  ;;  %v577_v18 = vpop.f32.mrb[8].mxu1 }
 0x122   :  { %v3649_v13 = vadd.f32 %v466_v12, %v3598_v4  ;;  %v468_v16 = vpop.f32.mrb[9].mxu0  ;;  %v3655_v23 = vadd.f32 %v577_v18, %v3595_v3  ;;  %v579_v25 = vpop.f32.mrb[9].mxu1 }
 0x123   :  { %v3652_v20 = vadd.f32 %v468_v16, %v3608_v8  ;;  %v470_v21 = vpop.f32.mrb[10].mxu0  ;;  %v3661_v1 = vadd.f32 %v579_v25, %v3605_v7  ;;  %v581_v0 = vpop.f32.mrb[10].mxu1 }
 0x124   :  { %v3658_v27 = vadd.f32 %v470_v21, %v3598_v4  ;;  %v472_v60 = vpop.f32.mrb[11].mxu0  ;;  %v3667_v57 = vadd.f32 %v581_v0, %v3595_v3  ;;  %v583_v16 = vpop.f32.mrb[11].mxu1 }
 0x125   :  { %4807 = vst [vmem:[#allocation58_spill] sm:$0xff] %v3652_v20  ;;  %4808 = vst [vmem:[#allocation59_spill] sm:$0xff] %v3661_v1  ;;  %v3664_v12 = vadd.f32 %v472_v60, %v3608_v8  ;;  %v3670_v56 = vadd.f32 %v583_v16, %v3605_v7 }
 0x129   :  { %v476_v18 = vpop.f32.mrb[12].mxu0  ;;  %v587_v54 = vpop.f32.mrb[12].mxu1 }
 0x12a   :  { %v3673_v55 = vadd.f32 %v476_v18, %v3598_v4  ;;  %v478_v21 = vpop.f32.mrb[13].mxu0  ;;  %v3679_v60 = vadd.f32 %v587_v54, %v3595_v3  ;;  %v589_v52 = vpop.f32.mrb[13].mxu1 }
 0x12b   :  { %v3676_v25 = vadd.f32 %v478_v21, %v3608_v8  ;;  %v480_v53 = vpop.f32.mrb[14].mxu0  ;;  %v3685_v16 = vadd.f32 %v589_v52, %v3605_v7  ;;  %v591_v50 = vpop.f32.mrb[14].mxu1 }
 0x12c   :  { %v3682_v0 = vadd.f32 %v480_v53, %v3598_v4  ;;  %v482_v51 = vpop.f32.mrb[15].mxu0  ;;  %v3691_v49 = vadd.f32 %v591_v50, %v3595_v3  ;;  %v593_v21 = vpop.f32.mrb[15].mxu1 }
 0x12d   :  { %v3688_v18 = vadd.f32 %v482_v51, %v3608_v8  ;;  %v3694_v48 = vadd.f32 %v593_v21, %v3605_v7 }
 0x131   :  { %v486_v54 = vpop.f32.mrb[16].mxu0  ;;  %v597_v46 = vpop.f32.mrb[16].mxu1 }
 0x132   :  { %v3697_v47 = vadd.f32 %v486_v54, %v3598_v4  ;;  %v488_v53 = vpop.f32.mrb[17].mxu0  ;;  %v3703_v51 = vadd.f32 %v597_v46, %v3595_v3  ;;  %v599_v44 = vpop.f32.mrb[17].mxu1 }
 0x133   :  { %v3700_v52 = vadd.f32 %v488_v53, %v3608_v8  ;;  %v490_v45 = vpop.f32.mrb[18].mxu0  ;;  %v3709_v21 = vadd.f32 %v599_v44, %v3605_v7  ;;  %v601_v42 = vpop.f32.mrb[18].mxu1 }
 0x134   :  { %v3706_v50 = vadd.f32 %v490_v45, %v3598_v4  ;;  %v492_v43 = vpop.f32.mrb[19].mxu0  ;;  %v3715_v41 = vadd.f32 %v601_v42, %v3595_v3  ;;  %v603_v53 = vpop.f32.mrb[19].mxu1 }
 0x135   :  { %v3712_v54 = vadd.f32 %v492_v43, %v3608_v8  ;;  %v3718_v40 = vadd.f32 %v603_v53, %v3605_v7 }
 0x139   :  { %v496_v46 = vpop.f32.mrb[20].mxu0  ;;  %v607_v38 = vpop.f32.mrb[20].mxu1 }
 0x13a   :  { %v3721_v39 = vadd.f32 %v496_v46, %v3598_v4  ;;  %v498_v45 = vpop.f32.mrb[21].mxu0  ;;  %v3727_v43 = vadd.f32 %v607_v38, %v3595_v3  ;;  %v609_v36 = vpop.f32.mrb[21].mxu1 }
 0x13b   :  { %v3724_v44 = vadd.f32 %v498_v45, %v3608_v8  ;;  %v500_v37 = vpop.f32.mrb[22].mxu0  ;;  %v3733_v53 = vadd.f32 %v609_v36, %v3605_v7  ;;  %v611_v34 = vpop.f32.mrb[22].mxu1 }
 0x13c   :  { %v3730_v42 = vadd.f32 %v500_v37, %v3598_v4  ;;  %v502_v35 = vpop.f32.mrb[23].mxu0  ;;  %v3739_v33 = vadd.f32 %v611_v34, %v3595_v3  ;;  %v613_v45 = vpop.f32.mrb[23].mxu1 }
 0x13d   :  { %v3736_v46 = vadd.f32 %v502_v35, %v3608_v8  ;;  %v3742_v32 = vadd.f32 %v613_v45, %v3605_v7 }
 0x141   :  { %v506_v38 = vpop.f32.mrb[24].mxu0  ;;  %v617_v30 = vpop.f32.mrb[24].mxu1 }
 0x142   :  { %v3745_v31 = vadd.f32 %v506_v38, %v3598_v4  ;;  %v508_v37 = vpop.f32.mrb[25].mxu0  ;;  %v3751_v35 = vadd.f32 %v617_v30, %v3595_v3  ;;  %v619_v28 = vpop.f32.mrb[25].mxu1 }
 0x143   :  { %v3748_v36 = vadd.f32 %v508_v37, %v3608_v8  ;;  %v510_v29 = vpop.f32.mrb[26].mxu0  ;;  %v3755_v45 = vadd.f32 %v619_v28, %v3605_v7  ;;  %v621_v6 = vpop.f32.mrb[26].mxu1 }
 0x144   :  { %v511_v34 = vadd.f32 %v510_v29, %v3598_v4  ;;  %v512_v10 = vpop.f32.mrb[27].mxu0  ;;  %v622_v5 = vadd.f32 %v621_v6, %v3595_v3  ;;  %v623_v2 = vpop.f32.mrb[27].mxu1  ;;  %v131_v6 = vsub.s32 5, %v3581_v59 }
 0x145   :  { %v513_v38 = vadd.f32 %v512_v10, %v3608_v8  ;;  %v624_v37 = vadd.f32 %v623_v2, %v3605_v7  ;;  %v135_v10 = vsub.s32 6, %v3581_v59 }
 0x149   :  { %v516_v17 = vpop.f32.mrb[28].mxu0  ;;  %v627_v15 = vpop.f32.mrb[28].mxu1 }
 0x14a   :  { %v517_v14 = vadd.f32 %v516_v17, %v3598_v4  ;;  %v518_v30 = vpop.f32.mrb[29].mxu0  ;;  %v628_v28 = vadd.f32 %v627_v15, %v3595_v3  ;;  %v629_v22 = vpop.f32.mrb[29].mxu1  ;;  %v139_v17 = vsub.s32 7, %v3581_v59 }
 0x14b   :  { %v519_v29 = vadd.f32 %v518_v30, %v3608_v8  ;;  %v520_v11 = vpop.f32.mrb[30].mxu0  ;;  %v630_v2 = vadd.f32 %v629_v22, %v3605_v7  ;;  %v631_v19 = vpop.f32.mrb[30].mxu1  ;;  %v3772_v30 = vrot.slane %v3589_v63, %v135_v10 }
 0x14c   :  { %v521_v24 = vpop.f32.mrb[31].mxu0  ;;  %v632_v4 = vpop.f32.mrb[31].mxu1  ;;  %v3775_v11 = vrot.slane %v3589_v63, %v131_v6  ;;  %v3778_v15 = vrot.slane %v3589_v63, %v139_v17 }
 0x151   :  { %v668_v3 = vpop.f32.mrb[32].mxu0  ;;  %v779_v22 = vpop.f32.mrb[32].mxu1 }
 0x152   :  { %v669_v24 = vadd.f32 %v668_v3, %v3769_v9  ;;  %v670_v19 = vpop.f32.mrb[33].mxu0  ;;  %v780_v59 = vadd.f32 %v779_v22, %v3772_v30  ;;  %v781_v58 = vpop.f32.mrb[33].mxu1 }
 0x153   :  { %v671_v4 = vadd.f32 %v670_v19, %v3775_v11  ;;  %v672_v7 = vpop.f32.mrb[34].mxu0  ;;  %v782_v10 = vadd.f32 %v781_v58, %v3778_v15  ;;  %v783_v6 = vpop.f32.mrb[34].mxu1 }
 0x154   :  { %v673_v8 = vadd.f32 %v672_v7, %v3769_v9  ;;  %v674_v61 = vpop.f32.mrb[35].mxu0  ;;  %v3785_v62 = vadd.f32 %v669_v24, %v517_v14  ;;  %v784_v63 = vadd.f32 %v783_v6, %v3772_v30  ;;  %v785_v17 = vpop.f32.mrb[35].mxu1  ;;  %v3789_v1 = vadd.f32 %v780_v59, %v628_v28 }
 0x155   :  { %v675_v3 = vadd.f32 %v674_v61, %v3775_v11  ;;  %v3791_v22 = vadd.f32 %v671_v4, %v519_v29  ;;  %v786_v19 = vadd.f32 %v785_v17, %v3778_v15  ;;  %v3796_v58 = vadd.f32 %v782_v10, %v630_v2 }
 0x156   :  { %4809 = vst [vmem:[#allocation60_spill] sm:$0xff] %v3785_v62  ;;  %4810 = vst [vmem:[#allocation61_spill] sm:$0xff] %v3789_v1  ;;  %v3794_v26 = vadd.f32 %v673_v8, %v511_v34  ;;  %v3798_v7 = vadd.f32 %v784_v63, %v622_v5  ;;  %v4853_v1 = vld [vmem:[#allocation50_spill] sm:$0xff] }
 0x157   :  { %4811 = vst [vmem:[#allocation62_spill] sm:$0xff] %v3791_v22  ;;  %4813 = vst [vmem:[#allocation64_spill] sm:$0xff] %v3796_v58  ;;  %v3800_v20 = vadd.f32 %v675_v3, %v513_v38  ;;  %v3802_v14 = vadd.f32 %v786_v19, %v624_v37  ;;  %v4852_v22 = vld [vmem:[#allocation57_spill] sm:$0xff] }
 0x158   :  { %4812 = vst [vmem:[#allocation63_spill] sm:$0xff] %v3794_v26  ;;  %4814 = vst [vmem:[#allocation65_spill] sm:$0xff] %v3798_v7  ;;  %v4856_v7 = vld [vmem:[#allocation46_spill] sm:$0xff] }
 0x159   :  { %4815 = vst [vmem:[#allocation66_spill] sm:$0xff] %v3800_v20  ;;  %4816 = vst [vmem:[#allocation67_spill] sm:$0xff] %v3802_v14  ;;  %v678_v24 = vpop.f32.mrb[36].mxu0  ;;  %v789_v6 = vpop.f32.mrb[36].mxu1  ;;  %v4854_v14 = vld [vmem:[#allocation52_spill] sm:$0xff]  ;;  %v4857_v26 = vld [vmem:[#allocation54_spill] sm:$0xff] }
 0x15a   :  { %v679_v61 = vadd.f32 %v678_v24, %v3769_v9  ;;  %v680_v28 = vpop.f32.mrb[37].mxu0  ;;  %v790_v29 = vadd.f32 %v789_v6, %v3772_v30  ;;  %v791_v4 = vpop.f32.mrb[37].mxu1 }
 0x15b   :  { %v681_v59 = vadd.f32 %v680_v28, %v3775_v11  ;;  %v682_v8 = vpop.f32.mrb[38].mxu0  ;;  %v792_v34 = vadd.f32 %v791_v4, %v3778_v15  ;;  %v793_v2 = vpop.f32.mrb[38].mxu1 }
 0x15c   :  { %v683_v5 = vadd.f32 %v682_v8, %v3769_v9  ;;  %v684_v38 = vpop.f32.mrb[39].mxu0  ;;  %v3810_v37 = vadd.f32 %v679_v61, %v3745_v31  ;;  %v794_v10 = vadd.f32 %v793_v2, %v3772_v30  ;;  %v795_v3 = vpop.f32.mrb[39].mxu1  ;;  %v3815_v17 = vadd.f32 %v790_v29, %v3751_v35 }
 0x15d   :  { %v685_v63 = vadd.f32 %v684_v38, %v3775_v11  ;;  %v3818_v19 = vadd.f32 %v681_v59, %v3748_v36  ;;  %v796_v24 = vadd.f32 %v795_v3, %v3778_v15  ;;  %v3825_v28 = vadd.f32 %v792_v34, %v3755_v45 }
 0x15e   :  { %4817 = vst [vmem:[#allocation68_spill] sm:$0xff] %v3810_v37  ;;  %4818 = vst [vmem:[#allocation69_spill] sm:$0xff] %v3815_v17  ;;  %v3822_v6 = vadd.f32 %v683_v5, %v3730_v42  ;;  %v3828_v31 = vadd.f32 %v794_v10, %v3739_v33  ;;  %v4863_v37 = vld [vmem:[#allocation44_spill] sm:$0xff] }
 0x15f   :  { %4819 = vst [vmem:[#allocation70_spill] sm:$0xff] %v3818_v19  ;;  %4821 = vst [vmem:[#allocation72_spill] sm:$0xff] %v3825_v28  ;;  %v3831_v61 = vadd.f32 %v685_v63, %v3736_v46  ;;  %v3834_v35 = vadd.f32 %v796_v24, %v3742_v32  ;;  %v4860_v19 = vld [vmem:[#allocation49_spill] sm:$0xff] }
 0x160   :  { %4820 = vst [vmem:[#allocation71_spill] sm:$0xff] %v3822_v6  ;;  %4822 = vst [vmem:[#allocation73_spill] sm:$0xff] %v3828_v31  ;;  %v4868_v31 = vld [vmem:[#allocation45_spill] sm:$0xff] }
 0x161   :  { %4823 = vst [vmem:[#allocation74_spill] sm:$0xff] %v3831_v61  ;;  %4824 = vst [vmem:[#allocation75_spill] sm:$0xff] %v3834_v35  ;;  %v688_v29 = vpop.f32.mrb[40].mxu0  ;;  %v799_v59 = vpop.f32.mrb[40].mxu1  ;;  %v4865_v35 = vld [vmem:[#allocation39_spill] sm:$0xff] }
 0x162   :  { %v689_v36 = vadd.f32 %v688_v29, %v3769_v9  ;;  %v690_v4 = vpop.f32.mrb[41].mxu0  ;;  %v800_v42 = vadd.f32 %v799_v59, %v3772_v30  ;;  %v801_v45 = vpop.f32.mrb[41].mxu1  ;;  %v4867_v61 = vld [vmem:[#allocation43_spill] sm:$0xff] }
 0x163   :  { %v691_v8 = vadd.f32 %v690_v4, %v3775_v11  ;;  %v692_v34 = vpop.f32.mrb[42].mxu0  ;;  %v802_v33 = vadd.f32 %v801_v45, %v3778_v15  ;;  %v803_v46 = vpop.f32.mrb[42].mxu1  ;;  %v560_v6 = vadd.f32 %v4868_v31, %v4867_v61 }
 0x164   :  { %v693_v5 = vadd.f32 %v692_v34, %v3769_v9  ;;  %v694_v2 = vpop.f32.mrb[43].mxu0  ;;  %v3842_v32 = vadd.f32 %v689_v36, %v3721_v39  ;;  %v804_v38 = vadd.f32 %v803_v46, %v3772_v30  ;;  %v805_v63 = vpop.f32.mrb[43].mxu1  ;;  %v3847_v3 = vadd.f32 %v800_v42, %v3727_v43 }
 0x165   :  { %v695_v10 = vadd.f32 %v694_v2, %v3775_v11  ;;  %v3850_v24 = vadd.f32 %v691_v8, %v3724_v44  ;;  %v806_v29 = vadd.f32 %v805_v63, %v3778_v15  ;;  %v3857_v4 = vadd.f32 %v802_v33, %v3733_v53 }
 0x166   :  { %4825 = vst [vmem:[#allocation76_spill] sm:$0xff] %v3842_v32  ;;  %4826 = vst [vmem:[#allocation77_spill] sm:$0xff] %v3847_v3  ;;  %v3854_v59 = vadd.f32 %v693_v5, %v3706_v50  ;;  %v3860_v39 = vadd.f32 %v804_v38, %v3715_v41 }
 0x167   :  { %4827 = vst [vmem:[#allocation78_spill] sm:$0xff] %v3850_v24  ;;  %4829 = vst [vmem:[#allocation80_spill] sm:$0xff] %v3857_v4  ;;  %v3863_v36 = vadd.f32 %v695_v10, %v3712_v54  ;;  %v3866_v43 = vadd.f32 %v806_v29, %v3718_v40 }
 0x168   :  { %4828 = vst [vmem:[#allocation79_spill] sm:$0xff] %v3854_v59  ;;  %4830 = vst [vmem:[#allocation81_spill] sm:$0xff] %v3860_v39 }
 0x169   :  { %4831 = vst [vmem:[#allocation82_spill] sm:$0xff] %v3863_v36  ;;  %4832 = vst [vmem:[#allocation83_spill] sm:$0xff] %v3866_v43  ;;  %v698_v42 = vpop.f32.mrb[44].mxu0  ;;  %v809_v8 = vpop.f32.mrb[44].mxu1  ;;  %v4143_v43 = vld [vmem:[#allocation4 + $0xe0] ss:$16 sps:$4 sm:$0xff]  }
 0x16a   :  { %v699_v44 = vadd.f32 %v698_v42, %v3769_v9  ;;  %v700_v45 = vpop.f32.mrb[45].mxu0  ;;  %v810_v50 = vadd.f32 %v809_v8, %v3772_v30  ;;  %v811_v53 = vpop.f32.mrb[45].mxu1  ;;  %v4146_v36 = vld [vmem:[#allocation4 + $0xe8] ss:$16 sps:$4 sm:$0xff]  }
 0x16b   :  { %v701_v34 = vadd.f32 %v700_v45, %v3775_v11  ;;  %v702_v33 = vpop.f32.mrb[46].mxu0  ;;  %v812_v41 = vadd.f32 %v811_v53, %v3778_v15  ;;  %v813_v54 = vpop.f32.mrb[46].mxu1 }
 0x16c   :  { %v703_v5 = vadd.f32 %v702_v33, %v3769_v9  ;;  %v704_v46 = vpop.f32.mrb[47].mxu0  ;;  %v3874_v40 = vadd.f32 %v699_v44, %v3697_v47  ;;  %v814_v2 = vadd.f32 %v813_v54, %v3772_v30  ;;  %v815_v10 = vpop.f32.mrb[47].mxu1  ;;  %v3879_v63 = vadd.f32 %v810_v50, %v3703_v51 }
 0x16d   :  { %v705_v38 = vadd.f32 %v704_v46, %v3775_v11  ;;  %v3882_v29 = vadd.f32 %v701_v34, %v3700_v52  ;;  %v816_v42 = vadd.f32 %v815_v10, %v3778_v15  ;;  %v3889_v45 = vadd.f32 %v812_v41, %v3709_v21 }
 0x16e   :  { %4833 = vst [vmem:[#allocation84_spill] sm:$0xff] %v3874_v40  ;;  %4834 = vst [vmem:[#allocation85_spill] sm:$0xff] %v3879_v63  ;;  %v3886_v8 = vadd.f32 %v703_v5, %v3682_v0  ;;  %v3892_v47 = vadd.f32 %v814_v2, %v3691_v49 }
 0x16f   :  { %4835 = vst [vmem:[#allocation86_spill] sm:$0xff] %v3882_v29  ;;  %4837 = vst [vmem:[#allocation88_spill] sm:$0xff] %v3889_v45  ;;  %v3895_v44 = vadd.f32 %v705_v38, %v3688_v18  ;;  %v3898_v51 = vadd.f32 %v816_v42, %v3694_v48 }
 0x170   :  { %4836 = vst [vmem:[#allocation87_spill] sm:$0xff] %v3886_v8  ;;  %4838 = vst [vmem:[#allocation89_spill] sm:$0xff] %v3892_v47 }
 0x171   :  { %4839 = vst [vmem:[#allocation90_spill] sm:$0xff] %v3895_v44  ;;  %4840 = vst [vmem:[#allocation91_spill] sm:$0xff] %v3898_v51  ;;  %v708_v50 = vpop.f32.mrb[48].mxu0  ;;  %v819_v34 = vpop.f32.mrb[48].mxu1 }
 0x172   :  { %v709_v52 = vadd.f32 %v708_v50, %v3769_v9  ;;  %v710_v53 = vpop.f32.mrb[49].mxu0  ;;  %v820_v0 = vadd.f32 %v819_v34, %v3772_v30  ;;  %v821_v21 = vpop.f32.mrb[49].mxu1 }
 0x173   :  { %v711_v33 = vadd.f32 %v710_v53, %v3775_v11  ;;  %v712_v41 = vpop.f32.mrb[50].mxu0  ;;  %v822_v49 = vadd.f32 %v821_v21, %v3778_v15  ;;  %v823_v18 = vpop.f32.mrb[50].mxu1 }
 0x174   :  { %v713_v5 = vadd.f32 %v712_v41, %v3769_v9  ;;  %v714_v54 = vpop.f32.mrb[51].mxu0  ;;  %v3906_v48 = vadd.f32 %v709_v52, %v3673_v55  ;;  %v824_v46 = vadd.f32 %v823_v18, %v3772_v30  ;;  %v825_v38 = vpop.f32.mrb[51].mxu1  ;;  %v3911_v10 = vadd.f32 %v820_v0, %v3679_v60 }
 0x175   :  { %v715_v2 = vadd.f32 %v714_v54, %v3775_v11  ;;  %v3914_v42 = vadd.f32 %v711_v33, %v3676_v25  ;;  %v826_v50 = vadd.f32 %v825_v38, %v3778_v15  ;;  %v3921_v53 = vadd.f32 %v822_v49, %v3685_v16 }
 0x176   :  { %4841 = vst [vmem:[#allocation92_spill] sm:$0xff] %v3906_v48  ;;  %4842 = vst [vmem:[#allocation93_spill] sm:$0xff] %v3911_v10  ;;  %v3918_v34 = vadd.f32 %v713_v5, %v3658_v27  ;;  %v3924_v55 = vadd.f32 %v824_v46, %v3667_v57 }
 0x177   :  { %4843 = vst [vmem:[#allocation94_spill] sm:$0xff] %v3914_v42  ;;  %4844 = vst [vmem:[#allocation95_spill] sm:$0xff] %v3921_v53  ;;  %v3927_v52 = vadd.f32 %v715_v2, %v3664_v12  ;;  %v3930_v60 = vadd.f32 %v826_v50, %v3670_v56  ;;  %v4847_v50 = vld [vmem:[#allocation58_spill] sm:$0xff] }
 0x179   :  { %4845 = vst [vmem:[#allocation96_spill] sm:$0xff] %v3927_v52  ;;  %4846 = vst [vmem:[#allocation97_spill] sm:$0xff] %v3930_v60  ;;  %v718_v0 = vpop.f32.mrb[52].mxu0  ;;  %v829_v33 = vpop.f32.mrb[52].mxu1 }
 0x17a   :  { %v719_v25 = vadd.f32 %v718_v0, %v3769_v9  ;;  %v720_v21 = vpop.f32.mrb[53].mxu0  ;;  %v830_v27 = vadd.f32 %v829_v33, %v3772_v30  ;;  %v831_v16 = vpop.f32.mrb[53].mxu1 }
 0x17b   :  { %v721_v41 = vadd.f32 %v720_v21, %v3775_v11  ;;  %v722_v49 = vpop.f32.mrb[54].mxu0  ;;  %v832_v57 = vadd.f32 %v831_v16, %v3778_v15  ;;  %v833_v12 = vpop.f32.mrb[54].mxu1  ;;  %v4848_v21 = vld [vmem:[#allocation53_spill] sm:$0xff] }
 0x17c   :  { %v723_v5 = vadd.f32 %v722_v49, %v3769_v9  ;;  %v724_v18 = vpop.f32.mrb[55].mxu0  ;;  %v3938_v56 = vadd.f32 %v719_v25, %v3649_v13  ;;  %v834_v54 = vadd.f32 %v833_v12, %v3772_v30  ;;  %v835_v2 = vpop.f32.mrb[55].mxu1  ;;  %v3943_v38 = vadd.f32 %v830_v27, %v3655_v23  ;;  %v4849_v49 = vld [vmem:[#allocation59_spill] sm:$0xff]  ;;  %v4850_v13 = vld [vmem:[#allocation56_spill] sm:$0xff] }
 0x17d   :  { %v725_v46 = vadd.f32 %v724_v18, %v3775_v11  ;;  %v3946_v0 = vadd.f32 %v721_v41, %v4847_v50  ;;  %v836_v33 = vadd.f32 %v835_v2, %v3778_v15  ;;  %v3953_v58 = vadd.f32 %v832_v57, %v4849_v49  ;;  %v4851_v12 = vld [vmem:[#allocation55_spill] sm:$0xff] }
 0x17e   :  { %v3950_v16 = vadd.f32 %v723_v5, %v4848_v21  ;;  %v3956_v25 = vadd.f32 %v834_v54, %v4850_v13 }
 0x17f   :  { %v3959_v18 = vadd.f32 %v725_v46, %v4851_v12  ;;  %v3962_v23 = vadd.f32 %v836_v33, %v4852_v22 }
 0x181   :  { %v728_v27 = vpop.f32.mrb[56].mxu0  ;;  %v839_v50 = vpop.f32.mrb[56].mxu1 }
 0x182   :  { %v729_v41 = vadd.f32 %v728_v27, %v3769_v9  ;;  %v730_v2 = vpop.f32.mrb[57].mxu0  ;;  %v840_v5 = vadd.f32 %v839_v50, %v3772_v30  ;;  %v841_v57 = vpop.f32.mrb[57].mxu1 }
 0x183   :  { %v731_v21 = vadd.f32 %v730_v2, %v3775_v11  ;;  %v732_v49 = vpop.f32.mrb[58].mxu0  ;;  %v842_v54 = vadd.f32 %v841_v57, %v3778_v15  ;;  %v843_v46 = vpop.f32.mrb[58].mxu1  ;;  %v4855_v2 = vld [vmem:[#allocation51_spill] sm:$0xff] }
 0x184   :  { %v733_v13 = vadd.f32 %v732_v49, %v3769_v9  ;;  %v734_v12 = vpop.f32.mrb[59].mxu0  ;;  %v3970_v22 = vadd.f32 %v729_v41, %v4853_v1  ;;  %v844_v33 = vadd.f32 %v843_v46, %v3772_v30  ;;  %v845_v62 = vpop.f32.mrb[59].mxu1  ;;  %v3975_v50 = vadd.f32 %v840_v5, %v4854_v14  ;;  %v4858_v1 = vld [vmem:[#allocation48_spill] sm:$0xff]  ;;  %v4859_v46 = vld [vmem:[#allocation47_spill] sm:$0xff] }
 0x185   :  { %v735_v27 = vadd.f32 %v734_v12, %v3775_v11  ;;  %v3978_v20 = vadd.f32 %v731_v21, %v4855_v2  ;;  %v846_v57 = vadd.f32 %v845_v62, %v3778_v15  ;;  %v3985_v28 = vadd.f32 %v842_v54, %v4857_v26  ;;  %v4861_v21 = vld [vmem:[#allocation40_spill] sm:$0xff]  ;;  %v4862_v2 = vld [vmem:[#allocation38_spill] sm:$0xff]  ;;  %v4864_v26 = vld [vmem:[#allocation41_spill] sm:$0xff] }
 0x186   :  { %v3982_v49 = vadd.f32 %v733_v13, %v4856_v7  ;;  %v3988_v41 = vadd.f32 %v844_v33, %v4858_v1  ;;  %v447_v17 = vadd.f32 %v4862_v2, %v4861_v21  ;;  %v449_v54 = vadd.f32 %v4864_v26, %v4863_v37  ;;  %v4866_v33 = vld [vmem:[#allocation42_spill] sm:$0xff] }
 0x187   :  { %v3991_v12 = vadd.f32 %v735_v27, %v4859_v46  ;;  %v3994_v14 = vadd.f32 %v846_v57, %v4860_v19  ;;  %v558_v1 = vadd.f32 %v4866_v33, %v4865_v35 }
 0x189   :  { %v738_v5 = vpop.f32.mrb[60].mxu0  ;;  %v849_v7 = vpop.f32.mrb[60].mxu1 }
 0x18a   :  { %v739_v62 = vadd.f32 %v738_v5, %v3769_v9  ;;  %v740_v13 = vpop.f32.mrb[61].mxu0  ;;  %v850_v27 = vadd.f32 %v849_v7, %v3772_v30  ;;  %v851_v19 = vpop.f32.mrb[61].mxu1 }
 0x18b   :  { %v741_v46 = vadd.f32 %v740_v13, %v3775_v11  ;;  %v742_v57 = vpop.f32.mrb[62].mxu0  ;;  %v852_v21 = vadd.f32 %v851_v19, %v3778_v15  ;;  %v853_v5 = vpop.f32.mrb[62].mxu1 }
 0x18c   :  { %v743_v9 = vpop.f32.mrb[63].mxu0  ;;  %v888_v2 = vadd.f32 %v739_v62, %v447_v17  ;;  %v854_v4 = vpop.f32.mrb[63].mxu1  ;;  %v890_v24 = vadd.f32 %v850_v27, %v558_v1 }
 0x18d   :  { %v889_v37 = vadd.f32 %v741_v46, %v449_v54  ;;  %v891_v26 = vadd.f32 %v852_v21, %v560_v6 }
 0x191   :  { %v1086_v3 = vpop.f32.mrb[64].mxu0  ;;  %v1127_v33 = vpop.f32.mrb[64].mxu1 }
 0x192   :  { %v1134_v35 = vadd.f32 %v1086_v3, %v888_v2  ;;  %v1088_v30 = vpop.f32.mrb[65].mxu0  ;;  %v1136_v7 = vadd.f32 %v1127_v33, %v890_v24  ;;  %v1129_v13 = vpop.f32.mrb[65].mxu1  ;;  %v4872_v33 = vld [vmem:[#allocation11_spill] sm:$0xff] }
 0x193   :  { %v1135_v11 = vadd.f32 %v1088_v30, %v889_v37  ;;  %v1090_v57 = vpop.f32.mrb[66].mxu0  ;;  %v1137_v32 = vadd.f32 %v1129_v13, %v891_v26  ;;  %v1131_v61 = vpop.f32.mrb[66].mxu1  ;;  %v4869_v26 = vld [vmem:[#allocation8_spill] sm:$0xff]  ;;  %v4873_v30 = vmov 0   ;;  %v4876_v13 = vld [vmem:[#allocation14_spill] sm:$0xff] }
 0x194   :  { %2979 = vtanh.f32 %v1134_v35  ;;  %v1091_v31 = vpop.f32.mrb[67].mxu0  ;;  %v1132_v15 = vpop.f32.mrb[67].mxu1  ;;  %v4870_v35 = vld [vmem:[#allocation9_spill] sm:$0xff]  ;;  %v4877_v57 = vld [vmem:[#allocation15_spill] sm:$0xff] }
 0x195   :  { %2981 = vtanh.f32 %v1135_v11  ;;  %v4875_v11 = vld [vmem:[#allocation13_spill] sm:$0xff]  ;;  %v4878_v31 = vld [vmem:[#allocation16_spill] sm:$0xff]  ;;  %v4880_v15 = vld [vmem:[#allocation18_spill] sm:$0xff] }
 0x196   :  { %2983 = vtanh.f32 %v1136_v7  ;;  %v4874_v7 = vld [vmem:[#allocation12_spill] sm:$0xff]  ;;  %v4879_v61 = vld [vmem:[#allocation17_spill] sm:$0xff] }
 0x197   :  { %2985 = vtanh.f32 %v1137_v32  ;;  %v4871_v32 = vld [vmem:[#allocation10_spill] sm:$0xff] }
 0x19e   :  { %v2980_v17 = vpop.eup %2979 }
 0x19f   :  { %v1142_v4 = vmul.f32 0.5, %v2980_v17  ;;  %v2982_v62 = vpop.eup %2981  ;;  %v4881_v17 = vld [vmem:[#allocation19_spill] sm:$0xff] }
 0x1a0   :  { %v1144_v6 = vmul.f32 0.5, %v2982_v62  ;;  %v2984_v3 = vpop.eup %2983  ;;  %v4883_v62 = vld [vmem:[#allocation21_spill] sm:$0xff] }
 0x1a1   :  { %v1143_v54 = vadd.f32 0.5, %v1142_v4  ;;  %v2986_v19 = vpop.eup %2985  ;;  %v4882_v4 = vld [vmem:[#allocation20_spill] sm:$0xff] }
 0x1a2   :  { %v1145_v1 = vadd.f32 0.5, %v1144_v6  ;;  %v1146_v21 = vmul.f32 0.5, %v2986_v19  ;;  %v4885_v6 = vld [vmem:[#allocation23_spill] sm:$0xff]  ;;  %v4890_v19 = vld [vmem:[#allocation28_spill] sm:$0xff] }
 0x1a3   :  { %v1149_v27 = vmul.f32 %v2984_v3, %v1143_v54  ;;  %v4884_v54 = vld [vmem:[#allocation22_spill] sm:$0xff]  ;;  %v4886_v3 = vld [vmem:[#allocation24_spill] sm:$0xff] }
 0x1a4   :  { %v1148_v24 = vmul.f32 0.0, %v1145_v1  ;;  %v1147_v9 = vadd.f32 0.5, %v1146_v21  ;;  %v4887_v1 = vld [vmem:[#allocation25_spill] sm:$0xff] }
 0x1a5   :  { %v4891_v21 = vld [vmem:[#allocation29_spill] sm:$0xff] }
 0x1a6   :  { %v4008_v46 = vadd.f32 %v1149_v27, %v1148_v24  ;;  %v4888_v27 = vld [vmem:[#allocation26_spill] sm:$0xff]  ;;  %v4889_v24 = vld [vmem:[#allocation27_spill] sm:$0xff] }
 0x1a8   :  { %2987 = vtanh.f32 %v4008_v46 }
 0x1b2   :  { %v2988_v5 = vpop.eup %2987 }
 0x1b3   :  { %v1152_v2 = vmul.f32 %v2988_v5, %v1147_v9  ;;  %v4892_v9 = vld [vmem:[#allocation30_spill] sm:$0xff]  ;;  %v4893_v5 = vld [vmem:[#allocation31_spill] sm:$0xff] }
 0x1b5   :  { %v1157_v37 = vpack.c.bf16 %v1152_v2, %v1152_v2  ;;  %v4894_v2 = vld [vmem:[#allocation32_spill] sm:$0xff] }
 0x1b7   :  { %1191 = vmatmul.mubr.bf16.vlgmr.msra.gmra.mrb[68].mxu0 %v1157_v37  ;;  %1232 = vmatmul.mubr.bf16.vlgmr.msra.gmra.mrb[68].mxu1 %v1157_v37  ;;  %v4895_v37 = vld [vmem:[#allocation33_spill] sm:$0xff] }
 0x1b8   :  { %1265 = vmatpush1.bf16.msra.mxu0 %v4869_v26  ;;  %1306 = vmatpush1.bf16.msra.mxu1 %v4870_v35  ;;  %v4896_v26 = vld [vmem:[#allocation34_spill] sm:$0xff]  ;;  %v4897_v35 = vld [vmem:[#allocation35_spill] sm:$0xff] }
 0x1b9   :  { %1266 = vmatprep.subr.bf16.mxu0 %v4871_v32  ;;  %1307 = vmatprep.subr.bf16.mxu1 %v4872_v33  ;;  %v4898_v32 = vld [vmem:[#allocation36_spill] sm:$0xff]  ;;  %v4899_v33 = vld [vmem:[#allocation37_spill] sm:$0xff] }
 0x1ba   :  { %1296 = vmatprep.mubr.bf16.mxu0 %v4873_v30  ;;  %1337 = vmatprep.mubr.bf16.mxu1 %v4873_v30 }
 0x1bc   :  { %1267 = vmatpush1.bf16.msra.mxu0 %v4874_v7  ;;  %1308 = vmatpush1.bf16.msra.mxu1 %v4875_v11  ;;  %v4043_v7 = vld [vmem:[#allocation4 + $0x4] ss:$16 sps:$4 sm:$0xff]   ;;  %v4046_v11 = vld [vmem:[#allocation4 + $0xc] ss:$16 sps:$4 sm:$0xff]  }
 0x1bd   :  { %1268 = vmatprep.subr.bf16.mxu0 %v4876_v13  ;;  %1309 = vmatprep.subr.bf16.mxu1 %v4877_v57 }
 0x1c0   :  { %1269 = vmatpush1.bf16.msra.mxu0 %v4878_v31  ;;  %1310 = vmatpush1.bf16.msra.mxu1 %v4879_v61 }
 0x1c1   :  { %1270 = vmatprep.subr.bf16.mxu0 %v4880_v15  ;;  %1311 = vmatprep.subr.bf16.mxu1 %v4881_v17 }
 0x1c4   :  { %1271 = vmatpush1.bf16.msra.mxu0 %v4882_v4  ;;  %1312 = vmatpush1.bf16.msra.mxu1 %v4883_v62 }
 0x1c5   :  { %1272 = vmatprep.subr.bf16.mxu0 %v4884_v54  ;;  %1313 = vmatprep.subr.bf16.mxu1 %v4885_v6 }
 0x1c8   :  { %1273 = vmatpush1.bf16.msra.mxu0 %v4886_v3  ;;  %1314 = vmatpush1.bf16.msra.mxu1 %v4887_v1 }
 0x1c9   :  { %1274 = vmatprep.subr.bf16.mxu0 %v4888_v27  ;;  %1315 = vmatprep.subr.bf16.mxu1 %v4889_v24 }
 0x1cc   :  { %1275 = vmatpush1.bf16.msra.mxu0 %v4890_v19  ;;  %1316 = vmatpush1.bf16.msra.mxu1 %v4891_v21 }
 0x1cd   :  { %1276 = vmatprep.subr.bf16.mxu0 %v4892_v9  ;;  %1317 = vmatprep.subr.bf16.mxu1 %v4893_v5 }
 0x1d0   :  { %1277 = vmatpush1.bf16.msra.mxu0 %v4894_v2  ;;  %1318 = vmatpush1.bf16.msra.mxu1 %v4895_v37 }
 0x1d1   :  { %1278 = vmatprep.subr.bf16.mxu0 %v4896_v26  ;;  %1319 = vmatprep.subr.bf16.mxu1 %v4897_v35 }
 0x1d4   :  { %1279 = vmatpush1.bf16.msra.mxu0 %v4898_v32  ;;  %1320 = vmatpush1.bf16.msra.mxu1 %v4899_v33 }
 0x1d5   :  { %1370 = vmatprep.subr.bf16.mxu0 %v4043_v7  ;;  %1411 = vmatprep.subr.bf16.mxu1 %v4046_v11 }
 0x28a   :  { %v1192_v13 = vpop.f32.mrb[68].mxu0  ;;  %v1233_v57 = vpop.f32.mrb[68].mxu1 }
 0x28b   :  { %v1240_v31 = vadd.f32 %v1192_v13, %v3982_v49  ;;  %v1242_v61 = vadd.f32 %v1233_v57, %v3988_v41  ;;  %v1194_v15 = vpop.f32.mrb[69].mxu0  ;;  %v1235_v17 = vpop.f32.mrb[69].mxu1  ;;  %v4057_v13 = vld [vmem:[#allocation4] ss:$16 sps:$4 sm:$0xff]   ;;  %v4060_v57 = vld [vmem:[#allocation4 + $0x8] ss:$16 sps:$4 sm:$0xff]  }
 0x28c   :  { %v1241_v4 = vadd.f32 %v1194_v15, %v3991_v12  ;;  %v1243_v62 = vadd.f32 %v1235_v17, %v3994_v14  ;;  %v1196_v54 = vpop.f32.mrb[70].mxu0  ;;  %v1237_v6 = vpop.f32.mrb[70].mxu1  ;;  %v4074_v15 = vld [vmem:[#allocation4 + $0x28] ss:$16 sps:$4 sm:$0xff]   ;;  %v4077_v17 = vld [vmem:[#allocation4 + $0x44] ss:$16 sps:$4 sm:$0xff]  }
 0x28d   :  { %2989 = vtanh.f32 %v1240_v31  ;;  %v1197_v3 = vpop.f32.mrb[71].mxu0  ;;  %v1238_v1 = vpop.f32.mrb[71].mxu1  ;;  %v4066_v31 = vld [vmem:[#allocation4 + $0x2c] ss:$16 sps:$4 sm:$0xff]   ;;  %v4086_v54 = vld [vmem:[#allocation4 + $0x48] ss:$16 sps:$4 sm:$0xff]  }
 0x28e   :  { %2991 = vtanh.f32 %v1241_v4  ;;  %v4080_v4 = vld [vmem:[#allocation4 + $0x4c] ss:$16 sps:$4 sm:$0xff]   ;;  %v4089_v6 = vld [vmem:[#allocation4 + $0x64] ss:$16 sps:$4 sm:$0xff]   ;;  %v4095_v1 = vld [vmem:[#allocation4 + $0x60] ss:$16 sps:$4 sm:$0xff]  }
 0x28f   :  { %2993 = vtanh.f32 %v1242_v61  ;;  %v4071_v61 = vld [vmem:[#allocation4 + $0x20] ss:$16 sps:$4 sm:$0xff]   ;;  %v4092_v3 = vld [vmem:[#allocation4 + $0x6c] ss:$16 sps:$4 sm:$0xff]  }
 0x290   :  { %2995 = vtanh.f32 %v1243_v62  ;;  %v4083_v62 = vld [vmem:[#allocation4 + $0x40] ss:$16 sps:$4 sm:$0xff]  }
 0x297   :  { %v2990_v27 = vpop.eup %2989 }
 0x298   :  { %v1248_v24 = vmul.f32 0.5, %v2990_v27  ;;  %v2992_v19 = vpop.eup %2991  ;;  %v4098_v27 = vld [vmem:[#allocation4 + $0x68] ss:$16 sps:$4 sm:$0xff]  }
 0x299   :  { %v1250_v49 = vmul.f32 0.5, %v2992_v19  ;;  %v2994_v41 = vpop.eup %2993  ;;  %v4104_v19 = vld [vmem:[#allocation4 + $0x8c] ss:$16 sps:$4 sm:$0xff]  }
 0x29a   :  { %v1249_v21 = vadd.f32 0.5, %v1248_v24  ;;  %v2996_v14 = vpop.eup %2995  ;;  %v4101_v24 = vld [vmem:[#allocation4 + $0x84] ss:$16 sps:$4 sm:$0xff]  }
 0x29b   :  { %v1251_v9 = vadd.f32 0.5, %v1250_v49  ;;  %v1252_v37 = vmul.f32 0.5, %v2996_v14  ;;  %v4110_v49 = vld [vmem:[#allocation4 + $0x88] ss:$16 sps:$4 sm:$0xff]   ;;  %v4125_v14 = vld [vmem:[#allocation4 + $0xc4] ss:$16 sps:$4 sm:$0xff]  }
 0x29c   :  { %v1255_v5 = vmul.f32 %v2994_v41, %v1249_v21  ;;  %v4107_v21 = vld [vmem:[#allocation4 + $0x80] ss:$16 sps:$4 sm:$0xff]   ;;  %v4113_v41 = vld [vmem:[#allocation4 + $0xa4] ss:$16 sps:$4 sm:$0xff]  }
 0x29d   :  { %v1254_v12 = vmul.f32 %v1251_v9, %v4008_v46  ;;  %v1253_v26 = vadd.f32 0.5, %v1252_v37  ;;  %v4063_v46 = vld [vmem:[#allocation4 + $0x24] ss:$16 sps:$4 sm:$0xff]   ;;  %v4116_v9 = vld [vmem:[#allocation4 + $0xac] ss:$16 sps:$4 sm:$0xff]  }
 0x29e   :  { %v4128_v37 = vld [vmem:[#allocation4 + $0xcc] ss:$16 sps:$4 sm:$0xff]  }
 0x29f   :  { %v4054_v2 = vadd.f32 %v1255_v5, %v1254_v12  ;;  %v4119_v5 = vld [vmem:[#allocation4 + $0xa0] ss:$16 sps:$4 sm:$0xff]   ;;  %v4122_v12 = vld [vmem:[#allocation4 + $0xa8] ss:$16 sps:$4 sm:$0xff]  }
 0x2a1   :  { %2997 = vtanh.f32 %v4054_v2 }
 0x2ab   :  { %v2998_v35 = vpop.eup %2997 }
 0x2ac   :  { %v1258_v32 = vmul.f32 %v2998_v35, %v1253_v26  ;;  %v4131_v26 = vld [vmem:[#allocation4 + $0xc0] ss:$16 sps:$4 sm:$0xff]   ;;  %v4134_v35 = vld [vmem:[#allocation4 + $0xc8] ss:$16 sps:$4 sm:$0xff]  }
 0x2ae   :  { %v1263_v33 = vpack.c.bf16 %v1258_v32, %v1258_v32  ;;  %v4137_v32 = vld [vmem:[#allocation4 + $0xe4] ss:$16 sps:$4 sm:$0xff]  }
 0x2b0   :  { %1297 = vmatmul.mubr.bf16.vlgmr.msra.gmra.mrb[72].mxu0 %v1263_v33  ;;  %1338 = vmatmul.mubr.bf16.vlgmr.msra.gmra.mrb[72].mxu1 %v1263_v33  ;;  %v4140_v33 = vld [vmem:[#allocation4 + $0xec] ss:$16 sps:$4 sm:$0xff]  }
 0x2b1   :  { %1371 = vmatpush1.bf16.msra.mxu0 %v4057_v13  ;;  %1412 = vmatpush1.bf16.msra.mxu1 %v4060_v57 }
 0x2b2   :  { %1372 = vmatprep.subr.bf16.mxu0 %v4063_v46  ;;  %1413 = vmatprep.subr.bf16.mxu1 %v4066_v31 }
 0x2b3   :  { %1402 = vmatprep.mubr.bf16.mxu0 %v4873_v30  ;;  %1443 = vmatprep.mubr.bf16.mxu1 %v4873_v30 }
 0x2b5   :  { %1373 = vmatpush1.bf16.msra.mxu0 %v4071_v61  ;;  %1414 = vmatpush1.bf16.msra.mxu1 %v4074_v15 }
 0x2b6   :  { %1374 = vmatprep.subr.bf16.mxu0 %v4077_v17  ;;  %1415 = vmatprep.subr.bf16.mxu1 %v4080_v4 }
 0x2b9   :  { %1375 = vmatpush1.bf16.msra.mxu0 %v4083_v62  ;;  %1416 = vmatpush1.bf16.msra.mxu1 %v4086_v54 }
 0x2ba   :  { %1376 = vmatprep.subr.bf16.mxu0 %v4089_v6  ;;  %1417 = vmatprep.subr.bf16.mxu1 %v4092_v3 }
 0x2bd   :  { %1377 = vmatpush1.bf16.msra.mxu0 %v4095_v1  ;;  %1418 = vmatpush1.bf16.msra.mxu1 %v4098_v27 }
 0x2be   :  { %1378 = vmatprep.subr.bf16.mxu0 %v4101_v24  ;;  %1419 = vmatprep.subr.bf16.mxu1 %v4104_v19 }
 0x2c1   :  { %1379 = vmatpush1.bf16.msra.mxu0 %v4107_v21  ;;  %1420 = vmatpush1.bf16.msra.mxu1 %v4110_v49 }
 0x2c2   :  { %1380 = vmatprep.subr.bf16.mxu0 %v4113_v41  ;;  %1421 = vmatprep.subr.bf16.mxu1 %v4116_v9 }
 0x2c5   :  { %1381 = vmatpush1.bf16.msra.mxu0 %v4119_v5  ;;  %1422 = vmatpush1.bf16.msra.mxu1 %v4122_v12 }
 0x2c6   :  { %1382 = vmatprep.subr.bf16.mxu0 %v4125_v14  ;;  %1423 = vmatprep.subr.bf16.mxu1 %v4128_v37 }
 0x2c9   :  { %1383 = vmatpush1.bf16.msra.mxu0 %v4131_v26  ;;  %1424 = vmatpush1.bf16.msra.mxu1 %v4134_v35 }
 0x2ca   :  { %1384 = vmatprep.subr.bf16.mxu0 %v4137_v32  ;;  %1425 = vmatprep.subr.bf16.mxu1 %v4140_v33 }
 0x2cd   :  { %1385 = vmatpush1.bf16.msra.mxu0 %v4143_v43  ;;  %1426 = vmatpush1.bf16.msra.mxu1 %v4146_v36 }
 0x2ce   :  { %1476 = vmatprep.subr.bf16.mxu0 %v4043_v7  ;;  %1517 = vmatprep.subr.bf16.mxu1 %v4046_v11 }
 0x383   :  { %v1298_v39 = vpop.f32.mrb[72].mxu0  ;;  %v1339_v59 = vpop.f32.mrb[72].mxu1 }
 0x384   :  { %v1346_v45 = vadd.f32 %v1298_v39, %v3970_v22  ;;  %v1348_v29 = vadd.f32 %v1339_v59, %v3975_v50  ;;  %v1300_v63 = vpop.f32.mrb[73].mxu0  ;;  %v1341_v40 = vpop.f32.mrb[73].mxu1 }
 0x385   :  { %v1347_v51 = vadd.f32 %v1300_v63, %v3978_v20  ;;  %v1349_v44 = vadd.f32 %v1341_v40, %v3985_v28  ;;  %v1302_v47 = vpop.f32.mrb[74].mxu0  ;;  %v1343_v8 = vpop.f32.mrb[74].mxu1 }
 0x386   :  { %2999 = vtanh.f32 %v1346_v45  ;;  %v1303_v53 = vpop.f32.mrb[75].mxu0  ;;  %v1344_v42 = vpop.f32.mrb[75].mxu1 }
 0x387   :  { %3001 = vtanh.f32 %v1347_v51 }
 0x388   :  { %3003 = vtanh.f32 %v1348_v29 }
 0x389   :  { %3005 = vtanh.f32 %v1349_v44 }
 0x390   :  { %v3000_v10 = vpop.eup %2999 }
 0x391   :  { %v1354_v48 = vmul.f32 0.5, %v3000_v10  ;;  %v3002_v60 = vpop.eup %3001 }
 0x392   :  { %v1356_v39 = vmul.f32 0.5, %v3002_v60  ;;  %v3004_v59 = vpop.eup %3003 }
 0x393   :  { %v1355_v52 = vadd.f32 0.5, %v1354_v48  ;;  %v3006_v28 = vpop.eup %3005 }
 0x394   :  { %v1357_v22 = vadd.f32 0.5, %v1356_v39  ;;  %v1358_v40 = vmul.f32 0.5, %v3006_v28 }
 0x395   :  { %v1361_v50 = vmul.f32 %v3004_v59, %v1355_v52 }
 0x396   :  { %v1360_v20 = vmul.f32 %v1357_v22, %v4054_v2  ;;  %v1359_v8 = vadd.f32 0.5, %v1358_v40 }
 0x398   :  { %v4156_v63 = vadd.f32 %v1361_v50, %v1360_v20 }
 0x39a   :  { %3007 = vtanh.f32 %v4156_v63 }
 0x3a4   :  { %v3008_v45 = vpop.eup %3007 }
 0x3a5   :  { %v1364_v29 = vmul.f32 %v3008_v45, %v1359_v8 }
 0x3a7   :  { %v1369_v47 = vpack.c.bf16 %v1364_v29, %v1364_v29 }
 0x3a9   :  { %1403 = vmatmul.mubr.bf16.vlgmr.msra.gmra.mrb[76].mxu0 %v1369_v47  ;;  %1444 = vmatmul.mubr.bf16.vlgmr.msra.gmra.mrb[76].mxu1 %v1369_v47 }
 0x3aa   :  { %1477 = vmatpush1.bf16.msra.mxu0 %v4057_v13  ;;  %1518 = vmatpush1.bf16.msra.mxu1 %v4060_v57 }
 0x3ab   :  { %1478 = vmatprep.subr.bf16.mxu0 %v4063_v46  ;;  %1519 = vmatprep.subr.bf16.mxu1 %v4066_v31 }
 0x3ac   :  { %1508 = vmatprep.mubr.bf16.mxu0 %v4873_v30  ;;  %1549 = vmatprep.mubr.bf16.mxu1 %v4873_v30 }
 0x3ae   :  { %1479 = vmatpush1.bf16.msra.mxu0 %v4071_v61  ;;  %1520 = vmatpush1.bf16.msra.mxu1 %v4074_v15 }
 0x3af   :  { %1480 = vmatprep.subr.bf16.mxu0 %v4077_v17  ;;  %1521 = vmatprep.subr.bf16.mxu1 %v4080_v4 }
 0x3b2   :  { %1481 = vmatpush1.bf16.msra.mxu0 %v4083_v62  ;;  %1522 = vmatpush1.bf16.msra.mxu1 %v4086_v54 }
 0x3b3   :  { %1482 = vmatprep.subr.bf16.mxu0 %v4089_v6  ;;  %1523 = vmatprep.subr.bf16.mxu1 %v4092_v3 }
 0x3b6   :  { %1483 = vmatpush1.bf16.msra.mxu0 %v4095_v1  ;;  %1524 = vmatpush1.bf16.msra.mxu1 %v4098_v27 }
 0x3b7   :  { %1484 = vmatprep.subr.bf16.mxu0 %v4101_v24  ;;  %1525 = vmatprep.subr.bf16.mxu1 %v4104_v19 }
 0x3ba   :  { %1485 = vmatpush1.bf16.msra.mxu0 %v4107_v21  ;;  %1526 = vmatpush1.bf16.msra.mxu1 %v4110_v49 }
 0x3bb   :  { %1486 = vmatprep.subr.bf16.mxu0 %v4113_v41  ;;  %1527 = vmatprep.subr.bf16.mxu1 %v4116_v9 }
 0x3be   :  { %1487 = vmatpush1.bf16.msra.mxu0 %v4119_v5  ;;  %1528 = vmatpush1.bf16.msra.mxu1 %v4122_v12 }
 0x3bf   :  { %1488 = vmatprep.subr.bf16.mxu0 %v4125_v14  ;;  %1529 = vmatprep.subr.bf16.mxu1 %v4128_v37 }
 0x3c2   :  { %1489 = vmatpush1.bf16.msra.mxu0 %v4131_v26  ;;  %1530 = vmatpush1.bf16.msra.mxu1 %v4134_v35 }
 0x3c3   :  { %1490 = vmatprep.subr.bf16.mxu0 %v4137_v32  ;;  %1531 = vmatprep.subr.bf16.mxu1 %v4140_v33 }
 0x3c6   :  { %1491 = vmatpush1.bf16.msra.mxu0 %v4143_v43  ;;  %1532 = vmatpush1.bf16.msra.mxu1 %v4146_v36 }
 0x3c7   :  { %1582 = vmatprep.subr.bf16.mxu0 %v4043_v7  ;;  %1623 = vmatprep.subr.bf16.mxu1 %v4046_v11 }
 0x47c   :  { %v1404_v44 = vpop.f32.mrb[76].mxu0  ;;  %v1445_v51 = vpop.f32.mrb[76].mxu1 }
 0x47d   :  { %v1452_v48 = vadd.f32 %v1404_v44, %v3950_v16  ;;  %v1454_v10 = vadd.f32 %v1445_v51, %v3956_v25  ;;  %v1406_v42 = vpop.f32.mrb[77].mxu0  ;;  %v1447_v53 = vpop.f32.mrb[77].mxu1 }
 0x47e   :  { %v1453_v52 = vadd.f32 %v1406_v42, %v3959_v18  ;;  %v1455_v60 = vadd.f32 %v1447_v53, %v3962_v23  ;;  %v1408_v2 = vpop.f32.mrb[78].mxu0  ;;  %v1449_v39 = vpop.f32.mrb[78].mxu1 }
 0x47f   :  { %3009 = vtanh.f32 %v1452_v48  ;;  %v1409_v59 = vpop.f32.mrb[79].mxu0  ;;  %v1450_v22 = vpop.f32.mrb[79].mxu1 }
 0x480   :  { %3011 = vtanh.f32 %v1453_v52 }
 0x481   :  { %3013 = vtanh.f32 %v1454_v10 }
 0x482   :  { %3015 = vtanh.f32 %v1455_v60 }
 0x489   :  { %v3010_v50 = vpop.eup %3009 }
 0x48a   :  { %v1460_v20 = vmul.f32 0.5, %v3010_v50  ;;  %v3012_v28 = vpop.eup %3011 }
 0x48b   :  { %v1462_v16 = vmul.f32 0.5, %v3012_v28  ;;  %v3014_v25 = vpop.eup %3013 }
 0x48c   :  { %v1461_v40 = vadd.f32 0.5, %v1460_v20  ;;  %v3016_v23 = vpop.eup %3015 }
 0x48d   :  { %v1463_v8 = vadd.f32 0.5, %v1462_v16  ;;  %v1464_v47 = vmul.f32 0.5, %v3016_v23 }
 0x48e   :  { %v1467_v45 = vmul.f32 %v3014_v25, %v1461_v40 }
 0x48f   :  { %v1466_v18 = vmul.f32 %v1463_v8, %v4156_v63  ;;  %v1465_v44 = vadd.f32 0.5, %v1464_v47 }
 0x491   :  { %v4198_v29 = vadd.f32 %v1467_v45, %v1466_v18 }
 0x493   :  { %3017 = vtanh.f32 %v4198_v29 }
 0x49d   :  { %v3018_v51 = vpop.eup %3017 }
 0x49e   :  { %v1470_v48 = vmul.f32 %v3018_v51, %v1465_v44 }
 0x4a0   :  { %v1475_v10 = vpack.c.bf16 %v1470_v48, %v1470_v48 }
 0x4a2   :  { %1509 = vmatmul.mubr.bf16.vlgmr.msra.gmra.mrb[80].mxu0 %v1475_v10  ;;  %1550 = vmatmul.mubr.bf16.vlgmr.msra.gmra.mrb[80].mxu1 %v1475_v10 }
 0x4a3   :  { %1583 = vmatpush1.bf16.msra.mxu0 %v4057_v13  ;;  %1624 = vmatpush1.bf16.msra.mxu1 %v4060_v57 }
 0x4a4   :  { %1584 = vmatprep.subr.bf16.mxu0 %v4063_v46  ;;  %1625 = vmatprep.subr.bf16.mxu1 %v4066_v31 }
 0x4a5   :  { %1614 = vmatprep.mubr.bf16.mxu0 %v4873_v30  ;;  %1655 = vmatprep.mubr.bf16.mxu1 %v4873_v30 }
 0x4a7   :  { %1585 = vmatpush1.bf16.msra.mxu0 %v4071_v61  ;;  %1626 = vmatpush1.bf16.msra.mxu1 %v4074_v15 }
 0x4a8   :  { %1586 = vmatprep.subr.bf16.mxu0 %v4077_v17  ;;  %1627 = vmatprep.subr.bf16.mxu1 %v4080_v4 }
 0x4ab   :  { %1587 = vmatpush1.bf16.msra.mxu0 %v4083_v62  ;;  %1628 = vmatpush1.bf16.msra.mxu1 %v4086_v54 }
 0x4ac   :  { %1588 = vmatprep.subr.bf16.mxu0 %v4089_v6  ;;  %1629 = vmatprep.subr.bf16.mxu1 %v4092_v3 }
 0x4af   :  { %1589 = vmatpush1.bf16.msra.mxu0 %v4095_v1  ;;  %1630 = vmatpush1.bf16.msra.mxu1 %v4098_v27 }
 0x4b0   :  { %1590 = vmatprep.subr.bf16.mxu0 %v4101_v24  ;;  %1631 = vmatprep.subr.bf16.mxu1 %v4104_v19 }
 0x4b3   :  { %1591 = vmatpush1.bf16.msra.mxu0 %v4107_v21  ;;  %1632 = vmatpush1.bf16.msra.mxu1 %v4110_v49 }
 0x4b4   :  { %1592 = vmatprep.subr.bf16.mxu0 %v4113_v41  ;;  %1633 = vmatprep.subr.bf16.mxu1 %v4116_v9 }
 0x4b7   :  { %1593 = vmatpush1.bf16.msra.mxu0 %v4119_v5  ;;  %1634 = vmatpush1.bf16.msra.mxu1 %v4122_v12 }
 0x4b8   :  { %1594 = vmatprep.subr.bf16.mxu0 %v4125_v14  ;;  %1635 = vmatprep.subr.bf16.mxu1 %v4128_v37 }
 0x4bb   :  { %1595 = vmatpush1.bf16.msra.mxu0 %v4131_v26  ;;  %1636 = vmatpush1.bf16.msra.mxu1 %v4134_v35 }
 0x4bc   :  { %1596 = vmatprep.subr.bf16.mxu0 %v4137_v32  ;;  %1637 = vmatprep.subr.bf16.mxu1 %v4140_v33 }
 0x4bf   :  { %1597 = vmatpush1.bf16.msra.mxu0 %v4143_v43  ;;  %1638 = vmatpush1.bf16.msra.mxu1 %v4146_v36 }
 0x4c0   :  { %1688 = vmatprep.subr.bf16.mxu0 %v4043_v7  ;;  %1729 = vmatprep.subr.bf16.mxu1 %v4046_v11 }
 0x575   :  { %v1510_v63 = vpop.f32.mrb[80].mxu0  ;;  %v1551_v42 = vpop.f32.mrb[80].mxu1 }
 0x576   :  { %v1558_v53 = vadd.f32 %v1510_v63, %v3938_v56  ;;  %v1560_v52 = vadd.f32 %v1551_v42, %v3943_v38  ;;  %v1512_v60 = vpop.f32.mrb[81].mxu0  ;;  %v1553_v2 = vpop.f32.mrb[81].mxu1 }
 0x577   :  { %v1559_v39 = vadd.f32 %v1512_v60, %v3946_v0  ;;  %v1561_v59 = vadd.f32 %v1553_v2, %v3953_v58  ;;  %v1514_v22 = vpop.f32.mrb[82].mxu0  ;;  %v1555_v50 = vpop.f32.mrb[82].mxu1  ;;  %v4900_v2 = vld [vmem:[#allocation96_spill] sm:$0xff] }
 0x578   :  { %3019 = vtanh.f32 %v1558_v53  ;;  %v1515_v20 = vpop.f32.mrb[83].mxu0  ;;  %v1556_v28 = vpop.f32.mrb[83].mxu1 }
 0x579   :  { %3021 = vtanh.f32 %v1559_v39 }
 0x57a   :  { %3023 = vtanh.f32 %v1560_v52 }
 0x57b   :  { %3025 = vtanh.f32 %v1561_v59  ;;  %v4901_v59 = vld [vmem:[#allocation97_spill] sm:$0xff] }
 0x582   :  { %v3020_v40 = vpop.eup %3019 }
 0x583   :  { %v1566_v16 = vmul.f32 0.5, %v3020_v40  ;;  %v3022_v25 = vpop.eup %3021 }
 0x584   :  { %v1568_v56 = vmul.f32 0.5, %v3022_v25  ;;  %v3024_v38 = vpop.eup %3023 }
 0x585   :  { %v1567_v8 = vadd.f32 0.5, %v1566_v16  ;;  %v3026_v58 = vpop.eup %3025 }
 0x586   :  { %v1569_v45 = vadd.f32 0.5, %v1568_v56  ;;  %v1570_v47 = vmul.f32 0.5, %v3026_v58 }
 0x587   :  { %v1573_v18 = vmul.f32 %v3024_v38, %v1567_v8 }
 0x588   :  { %v1572_v0 = vmul.f32 %v1569_v45, %v4198_v29  ;;  %v1571_v44 = vadd.f32 0.5, %v1570_v47 }
 0x58a   :  { %v4240_v23 = vadd.f32 %v1573_v18, %v1572_v0 }
 0x58c   :  { %3027 = vtanh.f32 %v4240_v23 }
 0x596   :  { %v3028_v51 = vpop.eup %3027 }
 0x597   :  { %v1576_v48 = vmul.f32 %v3028_v51, %v1571_v44 }
 0x599   :  { %v1581_v10 = vpack.c.bf16 %v1576_v48, %v1576_v48 }
 0x59b   :  { %1615 = vmatmul.mubr.bf16.vlgmr.msra.gmra.mrb[84].mxu0 %v1581_v10  ;;  %1656 = vmatmul.mubr.bf16.vlgmr.msra.gmra.mrb[84].mxu1 %v1581_v10 }
 0x59c   :  { %1689 = vmatpush1.bf16.msra.mxu0 %v4057_v13  ;;  %1730 = vmatpush1.bf16.msra.mxu1 %v4060_v57 }
 0x59d   :  { %1690 = vmatprep.subr.bf16.mxu0 %v4063_v46  ;;  %1731 = vmatprep.subr.bf16.mxu1 %v4066_v31 }
 0x59e   :  { %1720 = vmatprep.mubr.bf16.mxu0 %v4873_v30  ;;  %1761 = vmatprep.mubr.bf16.mxu1 %v4873_v30 }
 0x5a0   :  { %1691 = vmatpush1.bf16.msra.mxu0 %v4071_v61  ;;  %1732 = vmatpush1.bf16.msra.mxu1 %v4074_v15 }
 0x5a1   :  { %1692 = vmatprep.subr.bf16.mxu0 %v4077_v17  ;;  %1733 = vmatprep.subr.bf16.mxu1 %v4080_v4 }
 0x5a4   :  { %1693 = vmatpush1.bf16.msra.mxu0 %v4083_v62  ;;  %1734 = vmatpush1.bf16.msra.mxu1 %v4086_v54 }
 0x5a5   :  { %1694 = vmatprep.subr.bf16.mxu0 %v4089_v6  ;;  %1735 = vmatprep.subr.bf16.mxu1 %v4092_v3 }
 0x5a8   :  { %1695 = vmatpush1.bf16.msra.mxu0 %v4095_v1  ;;  %1736 = vmatpush1.bf16.msra.mxu1 %v4098_v27 }
 0x5a9   :  { %1696 = vmatprep.subr.bf16.mxu0 %v4101_v24  ;;  %1737 = vmatprep.subr.bf16.mxu1 %v4104_v19 }
 0x5ac   :  { %1697 = vmatpush1.bf16.msra.mxu0 %v4107_v21  ;;  %1738 = vmatpush1.bf16.msra.mxu1 %v4110_v49 }
 0x5ad   :  { %1698 = vmatprep.subr.bf16.mxu0 %v4113_v41  ;;  %1739 = vmatprep.subr.bf16.mxu1 %v4116_v9 }
 0x5b0   :  { %1699 = vmatpush1.bf16.msra.mxu0 %v4119_v5  ;;  %1740 = vmatpush1.bf16.msra.mxu1 %v4122_v12 }
 0x5b1   :  { %1700 = vmatprep.subr.bf16.mxu0 %v4125_v14  ;;  %1741 = vmatprep.subr.bf16.mxu1 %v4128_v37 }
 0x5b4   :  { %1701 = vmatpush1.bf16.msra.mxu0 %v4131_v26  ;;  %1742 = vmatpush1.bf16.msra.mxu1 %v4134_v35 }
 0x5b5   :  { %1702 = vmatprep.subr.bf16.mxu0 %v4137_v32  ;;  %1743 = vmatprep.subr.bf16.mxu1 %v4140_v33 }
 0x5b8   :  { %1703 = vmatpush1.bf16.msra.mxu0 %v4143_v43  ;;  %1744 = vmatpush1.bf16.msra.mxu1 %v4146_v36 }
 0x5b9   :  { %1794 = vmatprep.subr.bf16.mxu0 %v4043_v7  ;;  %1835 = vmatprep.subr.bf16.mxu1 %v4046_v11 }
 0x66e   :  { %v1616_v29 = vpop.f32.mrb[84].mxu0  ;;  %v1657_v63 = vpop.f32.mrb[84].mxu1 }
 0x66f   :  { %v1664_v42 = vadd.f32 %v1616_v29, %v3918_v34  ;;  %v1666_v53 = vadd.f32 %v1657_v63, %v3924_v55  ;;  %v1618_v52 = vpop.f32.mrb[85].mxu0  ;;  %v1659_v60 = vpop.f32.mrb[85].mxu1  ;;  %v4902_v63 = vld [vmem:[#allocation92_spill] sm:$0xff] }
 0x670   :  { %v1665_v39 = vadd.f32 %v1618_v52, %v4900_v2  ;;  %v1667_v22 = vadd.f32 %v1659_v60, %v4901_v59  ;;  %v1620_v50 = vpop.f32.mrb[86].mxu0  ;;  %v1661_v20 = vpop.f32.mrb[86].mxu1 }
 0x671   :  { %3029 = vtanh.f32 %v1664_v42  ;;  %v1621_v28 = vpop.f32.mrb[87].mxu0  ;;  %v1662_v40 = vpop.f32.mrb[87].mxu1 }
 0x672   :  { %3031 = vtanh.f32 %v1665_v39  ;;  %v4904_v39 = vld [vmem:[#allocation94_spill] sm:$0xff] }
 0x673   :  { %3033 = vtanh.f32 %v1666_v53  ;;  %v4903_v53 = vld [vmem:[#allocation93_spill] sm:$0xff] }
 0x674   :  { %3035 = vtanh.f32 %v1667_v22  ;;  %v4905_v22 = vld [vmem:[#allocation95_spill] sm:$0xff] }
 0x67b   :  { %v3030_v16 = vpop.eup %3029 }
 0x67c   :  { %v1672_v25 = vmul.f32 0.5, %v3030_v16  ;;  %v3032_v8 = vpop.eup %3031 }
 0x67d   :  { %v1674_v34 = vmul.f32 0.5, %v3032_v8  ;;  %v3034_v55 = vpop.eup %3033 }
 0x67e   :  { %v1673_v56 = vadd.f32 0.5, %v1672_v25  ;;  %v3036_v58 = vpop.eup %3035 }
 0x67f   :  { %v1675_v38 = vadd.f32 0.5, %v1674_v34  ;;  %v1676_v47 = vmul.f32 0.5, %v3036_v58 }
 0x680   :  { %v1679_v45 = vmul.f32 %v3034_v55, %v1673_v56 }
 0x681   :  { %v1678_v18 = vmul.f32 %v1675_v38, %v4240_v23  ;;  %v1677_v44 = vadd.f32 0.5, %v1676_v47 }
 0x683   :  { %v4282_v0 = vadd.f32 %v1679_v45, %v1678_v18 }
 0x685   :  { %3037 = vtanh.f32 %v4282_v0 }
 0x68f   :  { %v3038_v51 = vpop.eup %3037 }
 0x690   :  { %v1682_v48 = vmul.f32 %v3038_v51, %v1677_v44 }
 0x692   :  { %v1687_v10 = vpack.c.bf16 %v1682_v48, %v1682_v48 }
 0x694   :  { %1721 = vmatmul.mubr.bf16.vlgmr.msra.gmra.mrb[88].mxu0 %v1687_v10  ;;  %1762 = vmatmul.mubr.bf16.vlgmr.msra.gmra.mrb[88].mxu1 %v1687_v10 }
 0x695   :  { %1795 = vmatpush1.bf16.msra.mxu0 %v4057_v13  ;;  %1836 = vmatpush1.bf16.msra.mxu1 %v4060_v57 }
 0x696   :  { %1796 = vmatprep.subr.bf16.mxu0 %v4063_v46  ;;  %1837 = vmatprep.subr.bf16.mxu1 %v4066_v31 }
 0x697   :  { %1826 = vmatprep.mubr.bf16.mxu0 %v4873_v30  ;;  %1867 = vmatprep.mubr.bf16.mxu1 %v4873_v30 }
 0x699   :  { %1797 = vmatpush1.bf16.msra.mxu0 %v4071_v61  ;;  %1838 = vmatpush1.bf16.msra.mxu1 %v4074_v15 }
 0x69a   :  { %1798 = vmatprep.subr.bf16.mxu0 %v4077_v17  ;;  %1839 = vmatprep.subr.bf16.mxu1 %v4080_v4 }
 0x69d   :  { %1799 = vmatpush1.bf16.msra.mxu0 %v4083_v62  ;;  %1840 = vmatpush1.bf16.msra.mxu1 %v4086_v54 }
 0x69e   :  { %1800 = vmatprep.subr.bf16.mxu0 %v4089_v6  ;;  %1841 = vmatprep.subr.bf16.mxu1 %v4092_v3 }
 0x6a1   :  { %1801 = vmatpush1.bf16.msra.mxu0 %v4095_v1  ;;  %1842 = vmatpush1.bf16.msra.mxu1 %v4098_v27 }
 0x6a2   :  { %1802 = vmatprep.subr.bf16.mxu0 %v4101_v24  ;;  %1843 = vmatprep.subr.bf16.mxu1 %v4104_v19 }
 0x6a5   :  { %1803 = vmatpush1.bf16.msra.mxu0 %v4107_v21  ;;  %1844 = vmatpush1.bf16.msra.mxu1 %v4110_v49 }
 0x6a6   :  { %1804 = vmatprep.subr.bf16.mxu0 %v4113_v41  ;;  %1845 = vmatprep.subr.bf16.mxu1 %v4116_v9 }
 0x6a9   :  { %1805 = vmatpush1.bf16.msra.mxu0 %v4119_v5  ;;  %1846 = vmatpush1.bf16.msra.mxu1 %v4122_v12 }
 0x6aa   :  { %1806 = vmatprep.subr.bf16.mxu0 %v4125_v14  ;;  %1847 = vmatprep.subr.bf16.mxu1 %v4128_v37 }
 0x6ad   :  { %1807 = vmatpush1.bf16.msra.mxu0 %v4131_v26  ;;  %1848 = vmatpush1.bf16.msra.mxu1 %v4134_v35 }
 0x6ae   :  { %1808 = vmatprep.subr.bf16.mxu0 %v4137_v32  ;;  %1849 = vmatprep.subr.bf16.mxu1 %v4140_v33 }
 0x6b1   :  { %1809 = vmatpush1.bf16.msra.mxu0 %v4143_v43  ;;  %1850 = vmatpush1.bf16.msra.mxu1 %v4146_v36 }
 0x6b2   :  { %1900 = vmatprep.subr.bf16.mxu0 %v4043_v7  ;;  %1941 = vmatprep.subr.bf16.mxu1 %v4046_v11 }
 0x767   :  { %v1722_v23 = vpop.f32.mrb[88].mxu0  ;;  %v1763_v29 = vpop.f32.mrb[88].mxu1 }
 0x768   :  { %v1770_v42 = vadd.f32 %v1722_v23, %v4902_v63  ;;  %v1772_v52 = vadd.f32 %v1763_v29, %v4903_v53  ;;  %v1724_v60 = vpop.f32.mrb[89].mxu0  ;;  %v1765_v2 = vpop.f32.mrb[89].mxu1 }
 0x769   :  { %v1771_v59 = vadd.f32 %v1724_v60, %v4904_v39  ;;  %v1773_v50 = vadd.f32 %v1765_v2, %v4905_v22  ;;  %v1726_v20 = vpop.f32.mrb[90].mxu0  ;;  %v1767_v28 = vpop.f32.mrb[90].mxu1 }
 0x76a   :  { %3039 = vtanh.f32 %v1770_v42  ;;  %v1727_v40 = vpop.f32.mrb[91].mxu0  ;;  %v1768_v16 = vpop.f32.mrb[91].mxu1  ;;  %v4906_v42 = vld [vmem:[#allocation87_spill] sm:$0xff] }
 0x76b   :  { %3041 = vtanh.f32 %v1771_v59  ;;  %v4908_v59 = vld [vmem:[#allocation90_spill] sm:$0xff] }
 0x76c   :  { %3043 = vtanh.f32 %v1772_v52  ;;  %v4907_v52 = vld [vmem:[#allocation89_spill] sm:$0xff] }
 0x76d   :  { %3045 = vtanh.f32 %v1773_v50  ;;  %v4909_v50 = vld [vmem:[#allocation91_spill] sm:$0xff] }
 0x774   :  { %v3040_v25 = vpop.eup %3039 }
 0x775   :  { %v1778_v8 = vmul.f32 0.5, %v3040_v25  ;;  %v3042_v56 = vpop.eup %3041 }
 0x776   :  { %v1780_v55 = vmul.f32 0.5, %v3042_v56  ;;  %v3044_v38 = vpop.eup %3043 }
 0x777   :  { %v1779_v34 = vadd.f32 0.5, %v1778_v8  ;;  %v3046_v44 = vpop.eup %3045 }
 0x778   :  { %v1781_v45 = vadd.f32 0.5, %v1780_v55  ;;  %v1782_v51 = vmul.f32 0.5, %v3046_v44 }
 0x779   :  { %v1785_v18 = vmul.f32 %v3044_v38, %v1779_v34 }
 0x77a   :  { %v1784_v58 = vmul.f32 %v1781_v45, %v4282_v0  ;;  %v1783_v48 = vadd.f32 0.5, %v1782_v51 }
 0x77c   :  { %v4324_v47 = vadd.f32 %v1785_v18, %v1784_v58 }
 0x77e   :  { %3047 = vtanh.f32 %v4324_v47 }
 0x788   :  { %v3048_v10 = vpop.eup %3047 }
 0x789   :  { %v1788_v23 = vmul.f32 %v3048_v10, %v1783_v48 }
 0x78b   :  { %v1793_v29 = vpack.c.bf16 %v1788_v23, %v1788_v23 }
 0x78d   :  { %1827 = vmatmul.mubr.bf16.vlgmr.msra.gmra.mrb[92].mxu0 %v1793_v29  ;;  %1868 = vmatmul.mubr.bf16.vlgmr.msra.gmra.mrb[92].mxu1 %v1793_v29 }
 0x78e   :  { %1901 = vmatpush1.bf16.msra.mxu0 %v4057_v13  ;;  %1942 = vmatpush1.bf16.msra.mxu1 %v4060_v57 }
 0x78f   :  { %1902 = vmatprep.subr.bf16.mxu0 %v4063_v46  ;;  %1943 = vmatprep.subr.bf16.mxu1 %v4066_v31 }
 0x790   :  { %1932 = vmatprep.mubr.bf16.mxu0 %v4873_v30  ;;  %1973 = vmatprep.mubr.bf16.mxu1 %v4873_v30 }
 0x792   :  { %1903 = vmatpush1.bf16.msra.mxu0 %v4071_v61  ;;  %1944 = vmatpush1.bf16.msra.mxu1 %v4074_v15 }
 0x793   :  { %1904 = vmatprep.subr.bf16.mxu0 %v4077_v17  ;;  %1945 = vmatprep.subr.bf16.mxu1 %v4080_v4 }
 0x796   :  { %1905 = vmatpush1.bf16.msra.mxu0 %v4083_v62  ;;  %1946 = vmatpush1.bf16.msra.mxu1 %v4086_v54 }
 0x797   :  { %1906 = vmatprep.subr.bf16.mxu0 %v4089_v6  ;;  %1947 = vmatprep.subr.bf16.mxu1 %v4092_v3 }
 0x79a   :  { %1907 = vmatpush1.bf16.msra.mxu0 %v4095_v1  ;;  %1948 = vmatpush1.bf16.msra.mxu1 %v4098_v27 }
 0x79b   :  { %1908 = vmatprep.subr.bf16.mxu0 %v4101_v24  ;;  %1949 = vmatprep.subr.bf16.mxu1 %v4104_v19 }
 0x79e   :  { %1909 = vmatpush1.bf16.msra.mxu0 %v4107_v21  ;;  %1950 = vmatpush1.bf16.msra.mxu1 %v4110_v49 }
 0x79f   :  { %1910 = vmatprep.subr.bf16.mxu0 %v4113_v41  ;;  %1951 = vmatprep.subr.bf16.mxu1 %v4116_v9 }
 0x7a2   :  { %1911 = vmatpush1.bf16.msra.mxu0 %v4119_v5  ;;  %1952 = vmatpush1.bf16.msra.mxu1 %v4122_v12 }
 0x7a3   :  { %1912 = vmatprep.subr.bf16.mxu0 %v4125_v14  ;;  %1953 = vmatprep.subr.bf16.mxu1 %v4128_v37 }
 0x7a6   :  { %1913 = vmatpush1.bf16.msra.mxu0 %v4131_v26  ;;  %1954 = vmatpush1.bf16.msra.mxu1 %v4134_v35 }
 0x7a7   :  { %1914 = vmatprep.subr.bf16.mxu0 %v4137_v32  ;;  %1955 = vmatprep.subr.bf16.mxu1 %v4140_v33 }
 0x7aa   :  { %1915 = vmatpush1.bf16.msra.mxu0 %v4143_v43  ;;  %1956 = vmatpush1.bf16.msra.mxu1 %v4146_v36 }
 0x7ab   :  { %2006 = vmatprep.subr.bf16.mxu0 %v4043_v7  ;;  %2047 = vmatprep.subr.bf16.mxu1 %v4046_v11 }
 0x860   :  { %v1828_v0 = vpop.f32.mrb[92].mxu0  ;;  %v1869_v63 = vpop.f32.mrb[92].mxu1 }
 0x861   :  { %v1876_v53 = vadd.f32 %v1828_v0, %v4906_v42  ;;  %v1878_v60 = vadd.f32 %v1869_v63, %v4907_v52  ;;  %v1830_v2 = vpop.f32.mrb[93].mxu0  ;;  %v1871_v39 = vpop.f32.mrb[93].mxu1 }
 0x862   :  { %v1877_v22 = vadd.f32 %v1830_v2, %v4908_v59  ;;  %v1879_v20 = vadd.f32 %v1871_v39, %v4909_v50  ;;  %v1832_v28 = vpop.f32.mrb[94].mxu0  ;;  %v1873_v40 = vpop.f32.mrb[94].mxu1 }
 0x863   :  { %3049 = vtanh.f32 %v1876_v53  ;;  %v1833_v16 = vpop.f32.mrb[95].mxu0  ;;  %v1874_v25 = vpop.f32.mrb[95].mxu1  ;;  %v4910_v53 = vld [vmem:[#allocation84_spill] sm:$0xff] }
 0x864   :  { %3051 = vtanh.f32 %v1877_v22  ;;  %v4912_v22 = vld [vmem:[#allocation86_spill] sm:$0xff] }
 0x865   :  { %3053 = vtanh.f32 %v1878_v60  ;;  %v4911_v60 = vld [vmem:[#allocation85_spill] sm:$0xff] }
 0x866   :  { %3055 = vtanh.f32 %v1879_v20  ;;  %v4913_v20 = vld [vmem:[#allocation88_spill] sm:$0xff] }
 0x86d   :  { %v3050_v8 = vpop.eup %3049 }
 0x86e   :  { %v1884_v56 = vmul.f32 0.5, %v3050_v8  ;;  %v3052_v34 = vpop.eup %3051 }
 0x86f   :  { %v1886_v38 = vmul.f32 0.5, %v3052_v34  ;;  %v3054_v45 = vpop.eup %3053 }
 0x870   :  { %v1885_v55 = vadd.f32 0.5, %v1884_v56  ;;  %v3056_v48 = vpop.eup %3055 }
 0x871   :  { %v1887_v18 = vadd.f32 0.5, %v1886_v38  ;;  %v1888_v10 = vmul.f32 0.5, %v3056_v48 }
 0x872   :  { %v1891_v58 = vmul.f32 %v3054_v45, %v1885_v55 }
 0x873   :  { %v1890_v44 = vmul.f32 %v1887_v18, %v4324_v47  ;;  %v1889_v23 = vadd.f32 0.5, %v1888_v10 }
 0x875   :  { %v4366_v51 = vadd.f32 %v1891_v58, %v1890_v44 }
 0x877   :  { %3057 = vtanh.f32 %v4366_v51 }
 0x881   :  { %v3058_v29 = vpop.eup %3057 }
 0x882   :  { %v1894_v0 = vmul.f32 %v3058_v29, %v1889_v23 }
 0x884   :  { %v1899_v63 = vpack.c.bf16 %v1894_v0, %v1894_v0 }
 0x886   :  { %1933 = vmatmul.mubr.bf16.vlgmr.msra.gmra.mrb[96].mxu0 %v1899_v63  ;;  %1974 = vmatmul.mubr.bf16.vlgmr.msra.gmra.mrb[96].mxu1 %v1899_v63 }
 0x887   :  { %2007 = vmatpush1.bf16.msra.mxu0 %v4057_v13  ;;  %2048 = vmatpush1.bf16.msra.mxu1 %v4060_v57 }
 0x888   :  { %2008 = vmatprep.subr.bf16.mxu0 %v4063_v46  ;;  %2049 = vmatprep.subr.bf16.mxu1 %v4066_v31 }
 0x889   :  { %2038 = vmatprep.mubr.bf16.mxu0 %v4873_v30  ;;  %2079 = vmatprep.mubr.bf16.mxu1 %v4873_v30 }
 0x88b   :  { %2009 = vmatpush1.bf16.msra.mxu0 %v4071_v61  ;;  %2050 = vmatpush1.bf16.msra.mxu1 %v4074_v15 }
 0x88c   :  { %2010 = vmatprep.subr.bf16.mxu0 %v4077_v17  ;;  %2051 = vmatprep.subr.bf16.mxu1 %v4080_v4 }
 0x88f   :  { %2011 = vmatpush1.bf16.msra.mxu0 %v4083_v62  ;;  %2052 = vmatpush1.bf16.msra.mxu1 %v4086_v54 }
 0x890   :  { %2012 = vmatprep.subr.bf16.mxu0 %v4089_v6  ;;  %2053 = vmatprep.subr.bf16.mxu1 %v4092_v3 }
 0x893   :  { %2013 = vmatpush1.bf16.msra.mxu0 %v4095_v1  ;;  %2054 = vmatpush1.bf16.msra.mxu1 %v4098_v27 }
 0x894   :  { %2014 = vmatprep.subr.bf16.mxu0 %v4101_v24  ;;  %2055 = vmatprep.subr.bf16.mxu1 %v4104_v19 }
 0x897   :  { %2015 = vmatpush1.bf16.msra.mxu0 %v4107_v21  ;;  %2056 = vmatpush1.bf16.msra.mxu1 %v4110_v49 }
 0x898   :  { %2016 = vmatprep.subr.bf16.mxu0 %v4113_v41  ;;  %2057 = vmatprep.subr.bf16.mxu1 %v4116_v9 }
 0x89b   :  { %2017 = vmatpush1.bf16.msra.mxu0 %v4119_v5  ;;  %2058 = vmatpush1.bf16.msra.mxu1 %v4122_v12 }
 0x89c   :  { %2018 = vmatprep.subr.bf16.mxu0 %v4125_v14  ;;  %2059 = vmatprep.subr.bf16.mxu1 %v4128_v37 }
 0x89f   :  { %2019 = vmatpush1.bf16.msra.mxu0 %v4131_v26  ;;  %2060 = vmatpush1.bf16.msra.mxu1 %v4134_v35 }
 0x8a0   :  { %2020 = vmatprep.subr.bf16.mxu0 %v4137_v32  ;;  %2061 = vmatprep.subr.bf16.mxu1 %v4140_v33 }
 0x8a3   :  { %2021 = vmatpush1.bf16.msra.mxu0 %v4143_v43  ;;  %2062 = vmatpush1.bf16.msra.mxu1 %v4146_v36 }
 0x8a4   :  { %2112 = vmatprep.subr.bf16.mxu0 %v4043_v7  ;;  %2153 = vmatprep.subr.bf16.mxu1 %v4046_v11 }
 0x959   :  { %v1934_v47 = vpop.f32.mrb[96].mxu0  ;;  %v1975_v42 = vpop.f32.mrb[96].mxu1 }
 0x95a   :  { %v1982_v52 = vadd.f32 %v1934_v47, %v4910_v53  ;;  %v1984_v2 = vadd.f32 %v1975_v42, %v4911_v60  ;;  %v1936_v39 = vpop.f32.mrb[97].mxu0  ;;  %v1977_v59 = vpop.f32.mrb[97].mxu1  ;;  %v4460_v60 = vld [vmem:[#allocation4 + $0x8] ss:$16 sps:$4 sm:$0xff]  }
 0x95b   :  { %v1983_v50 = vadd.f32 %v1936_v39, %v4912_v22  ;;  %v1985_v28 = vadd.f32 %v1977_v59, %v4913_v20  ;;  %v1938_v40 = vpop.f32.mrb[98].mxu0  ;;  %v1979_v16 = vpop.f32.mrb[98].mxu1  ;;  %v4466_v39 = vld [vmem:[#allocation4 + $0x2c] ss:$16 sps:$4 sm:$0xff]   ;;  %v4471_v59 = vld [vmem:[#allocation4 + $0x20] ss:$16 sps:$4 sm:$0xff]  }
 0x95c   :  { %3059 = vtanh.f32 %v1982_v52  ;;  %v1939_v25 = vpop.f32.mrb[99].mxu0  ;;  %v1980_v8 = vpop.f32.mrb[99].mxu1  ;;  %v4457_v52 = vld [vmem:[#allocation4] ss:$16 sps:$4 sm:$0xff]   ;;  %v4474_v22 = vld [vmem:[#allocation4 + $0x28] ss:$16 sps:$4 sm:$0xff]  }
 0x95d   :  { %3061 = vtanh.f32 %v1983_v50  ;;  %v4477_v50 = vld [vmem:[#allocation4 + $0x44] ss:$16 sps:$4 sm:$0xff]   ;;  %v4480_v20 = vld [vmem:[#allocation4 + $0x4c] ss:$16 sps:$4 sm:$0xff]   ;;  %v4486_v40 = vld [vmem:[#allocation4 + $0x48] ss:$16 sps:$4 sm:$0xff]  }
 0x95e   :  { %3063 = vtanh.f32 %v1984_v2  ;;  %v4463_v2 = vld [vmem:[#allocation4 + $0x24] ss:$16 sps:$4 sm:$0xff]   ;;  %v4492_v25 = vld [vmem:[#allocation4 + $0x6c] ss:$16 sps:$4 sm:$0xff]   ;;  %v4495_v8 = vld [vmem:[#allocation4 + $0x60] ss:$16 sps:$4 sm:$0xff]  }
 0x95f   :  { %3065 = vtanh.f32 %v1985_v28  ;;  %v4483_v28 = vld [vmem:[#allocation4 + $0x40] ss:$16 sps:$4 sm:$0xff]   ;;  %v4489_v16 = vld [vmem:[#allocation4 + $0x64] ss:$16 sps:$4 sm:$0xff]  }
 0x966   :  { %v3060_v7 = vpop.eup %3059 }
 0x967   :  { %v1990_v11 = vmul.f32 0.5, %v3060_v7  ;;  %v3062_v56 = vpop.eup %3061  ;;  %v4498_v7 = vld [vmem:[#allocation4 + $0x68] ss:$16 sps:$4 sm:$0xff]  }
 0x968   :  { %v1992_v55 = vmul.f32 0.5, %v3062_v56  ;;  %v3064_v38 = vpop.eup %3063  ;;  %v4504_v56 = vld [vmem:[#allocation4 + $0x8c] ss:$16 sps:$4 sm:$0xff]  }
 0x969   :  { %v1991_v34 = vadd.f32 0.5, %v1990_v11  ;;  %v3066_v48 = vpop.eup %3065  ;;  %v4501_v11 = vld [vmem:[#allocation4 + $0x84] ss:$16 sps:$4 sm:$0xff]  }
 0x96a   :  { %v1993_v45 = vadd.f32 0.5, %v1992_v55  ;;  %v1994_v10 = vmul.f32 0.5, %v3066_v48  ;;  %v4510_v55 = vld [vmem:[#allocation4 + $0x88] ss:$16 sps:$4 sm:$0xff]   ;;  %v4528_v48 = vld [vmem:[#allocation4 + $0xcc] ss:$16 sps:$4 sm:$0xff]  }
 0x96b   :  { %v1997_v18 = vmul.f32 %v3064_v38, %v1991_v34  ;;  %v4507_v34 = vld [vmem:[#allocation4 + $0x80] ss:$16 sps:$4 sm:$0xff]   ;;  %v4513_v38 = vld [vmem:[#allocation4 + $0xa4] ss:$16 sps:$4 sm:$0xff]  }
 0x96c   :  { %v1996_v58 = vmul.f32 %v1993_v45, %v4366_v51  ;;  %v1995_v23 = vadd.f32 0.5, %v1994_v10  ;;  %v4516_v45 = vld [vmem:[#allocation4 + $0xac] ss:$16 sps:$4 sm:$0xff]   ;;  %v4531_v10 = vld [vmem:[#allocation4 + $0xc0] ss:$16 sps:$4 sm:$0xff]  }
 0x96e   :  { %v4408_v44 = vadd.f32 %v1997_v18, %v1996_v58  ;;  %v4519_v18 = vld [vmem:[#allocation4 + $0xa0] ss:$16 sps:$4 sm:$0xff]   ;;  %v4522_v58 = vld [vmem:[#allocation4 + $0xa8] ss:$16 sps:$4 sm:$0xff]  }
 0x970   :  { %3067 = vtanh.f32 %v4408_v44 }
 0x97a   :  { %v3068_v29 = vpop.eup %3067 }
 0x97b   :  { %v2000_v0 = vmul.f32 %v3068_v29, %v1995_v23  ;;  %v4534_v23 = vld [vmem:[#allocation4 + $0xc8] ss:$16 sps:$4 sm:$0xff]   ;;  %v4537_v29 = vld [vmem:[#allocation4 + $0xe4] ss:$16 sps:$4 sm:$0xff]  }
 0x97d   :  { %v2005_v63 = vpack.c.bf16 %v2000_v0, %v2000_v0  ;;  %v4540_v0 = vld [vmem:[#allocation4 + $0xec] ss:$16 sps:$4 sm:$0xff]  }
 0x97f   :  { %2039 = vmatmul.mubr.bf16.vlgmr.msra.gmra.mrb[100].mxu0 %v2005_v63  ;;  %2080 = vmatmul.mubr.bf16.vlgmr.msra.gmra.mrb[100].mxu1 %v2005_v63  ;;  %v4543_v63 = vld [vmem:[#allocation4 + $0xe0] ss:$16 sps:$4 sm:$0xff]  }
 0x980   :  { %2113 = vmatpush1.bf16.msra.mxu0 %v4057_v13  ;;  %2154 = vmatpush1.bf16.msra.mxu1 %v4060_v57  ;;  %v4443_v13 = vld [vmem:[#allocation4 + $0x4] ss:$16 sps:$4 sm:$0xff]   ;;  %v4446_v57 = vld [vmem:[#allocation4 + $0xc] ss:$16 sps:$4 sm:$0xff]  }
 0x981   :  { %2114 = vmatprep.subr.bf16.mxu0 %v4063_v46  ;;  %2155 = vmatprep.subr.bf16.mxu1 %v4066_v31 }
 0x982   :  { %2144 = vmatprep.mubr.bf16.mxu0 %v4873_v30  ;;  %2185 = vmatprep.mubr.bf16.mxu1 %v4873_v30 }
 0x984   :  { %2115 = vmatpush1.bf16.msra.mxu0 %v4071_v61  ;;  %2156 = vmatpush1.bf16.msra.mxu1 %v4074_v15  ;;  %v4914_v61 = vld [vmem:[#allocation79_spill] sm:$0xff] }
 0x985   :  { %2116 = vmatprep.subr.bf16.mxu0 %v4077_v17  ;;  %2157 = vmatprep.subr.bf16.mxu1 %v4080_v4  ;;  %v4915_v17 = vld [vmem:[#allocation81_spill] sm:$0xff] }
 0x988   :  { %2117 = vmatpush1.bf16.msra.mxu0 %v4083_v62  ;;  %2158 = vmatpush1.bf16.msra.mxu1 %v4086_v54 }
 0x989   :  { %2118 = vmatprep.subr.bf16.mxu0 %v4089_v6  ;;  %2159 = vmatprep.subr.bf16.mxu1 %v4092_v3  ;;  %v4916_v6 = vld [vmem:[#allocation82_spill] sm:$0xff]  ;;  %v4917_v3 = vld [vmem:[#allocation83_spill] sm:$0xff] }
 0x98c   :  { %2119 = vmatpush1.bf16.msra.mxu0 %v4095_v1  ;;  %2160 = vmatpush1.bf16.msra.mxu1 %v4098_v27 }
 0x98d   :  { %2120 = vmatprep.subr.bf16.mxu0 %v4101_v24  ;;  %2161 = vmatprep.subr.bf16.mxu1 %v4104_v19 }
 0x990   :  { %2121 = vmatpush1.bf16.msra.mxu0 %v4107_v21  ;;  %2162 = vmatpush1.bf16.msra.mxu1 %v4110_v49 }
 0x991   :  { %2122 = vmatprep.subr.bf16.mxu0 %v4113_v41  ;;  %2163 = vmatprep.subr.bf16.mxu1 %v4116_v9 }
 0x994   :  { %2123 = vmatpush1.bf16.msra.mxu0 %v4119_v5  ;;  %2164 = vmatpush1.bf16.msra.mxu1 %v4122_v12 }
 0x995   :  { %2124 = vmatprep.subr.bf16.mxu0 %v4125_v14  ;;  %2165 = vmatprep.subr.bf16.mxu1 %v4128_v37 }
 0x998   :  { %2125 = vmatpush1.bf16.msra.mxu0 %v4131_v26  ;;  %2166 = vmatpush1.bf16.msra.mxu1 %v4134_v35 }
 0x999   :  { %2126 = vmatprep.subr.bf16.mxu0 %v4137_v32  ;;  %2167 = vmatprep.subr.bf16.mxu1 %v4140_v33 }
 0x99c   :  { %2127 = vmatpush1.bf16.msra.mxu0 %v4143_v43  ;;  %2168 = vmatpush1.bf16.msra.mxu1 %v4146_v36 }
 0x99d   :  { %2218 = vmatprep.subr.bf16.mxu0 %v4443_v13  ;;  %2259 = vmatprep.subr.bf16.mxu1 %v4446_v57 }
 0xa52   :  { %v2040_v46 = vpop.f32.mrb[100].mxu0  ;;  %v2081_v31 = vpop.f32.mrb[100].mxu1 }
 0xa53   :  { %v2088_v15 = vadd.f32 %v2040_v46, %v4914_v61  ;;  %v2090_v4 = vadd.f32 %v2081_v31, %v4915_v17  ;;  %v2042_v62 = vpop.f32.mrb[101].mxu0  ;;  %v2083_v54 = vpop.f32.mrb[101].mxu1  ;;  %v4546_v46 = vld [vmem:[#allocation4 + $0xe8] ss:$16 sps:$4 sm:$0xff]  }
 0xa54   :  { %v2089_v43 = vadd.f32 %v2042_v62, %v4916_v6  ;;  %v2091_v36 = vadd.f32 %v2083_v54, %v4917_v3  ;;  %v2044_v1 = vpop.f32.mrb[102].mxu0  ;;  %v2085_v27 = vpop.f32.mrb[102].mxu1 }
 0xa55   :  { %3069 = vtanh.f32 %v2088_v15  ;;  %v2045_v24 = vpop.f32.mrb[103].mxu0  ;;  %v2086_v19 = vpop.f32.mrb[103].mxu1  ;;  %v4918_v15 = vld [vmem:[#allocation76_spill] sm:$0xff] }
 0xa56   :  { %3071 = vtanh.f32 %v2089_v43  ;;  %v4920_v43 = vld [vmem:[#allocation78_spill] sm:$0xff] }
 0xa57   :  { %3073 = vtanh.f32 %v2090_v4  ;;  %v4919_v4 = vld [vmem:[#allocation77_spill] sm:$0xff] }
 0xa58   :  { %3075 = vtanh.f32 %v2091_v36  ;;  %v4921_v36 = vld [vmem:[#allocation80_spill] sm:$0xff] }
 0xa5f   :  { %v3070_v21 = vpop.eup %3069 }
 0xa60   :  { %v2096_v49 = vmul.f32 0.5, %v3070_v21  ;;  %v3072_v41 = vpop.eup %3071 }
 0xa61   :  { %v2098_v5 = vmul.f32 0.5, %v3072_v41  ;;  %v3074_v12 = vpop.eup %3073 }
 0xa62   :  { %v2097_v9 = vadd.f32 0.5, %v2096_v49  ;;  %v3076_v32 = vpop.eup %3075 }
 0xa63   :  { %v2099_v14 = vadd.f32 0.5, %v2098_v5  ;;  %v2100_v33 = vmul.f32 0.5, %v3076_v32 }
 0xa64   :  { %v2103_v37 = vmul.f32 %v3074_v12, %v2097_v9 }
 0xa65   :  { %v2102_v26 = vmul.f32 %v2099_v14, %v4408_v44  ;;  %v2101_v51 = vadd.f32 0.5, %v2100_v33  ;;  %v4525_v44 = vld [vmem:[#allocation4 + $0xc4] ss:$16 sps:$4 sm:$0xff]  }
 0xa67   :  { %v4454_v35 = vadd.f32 %v2103_v37, %v2102_v26 }
 0xa69   :  { %3077 = vtanh.f32 %v4454_v35 }
 0xa73   :  { %v3078_v47 = vpop.eup %3077 }
 0xa74   :  { %v2106_v42 = vmul.f32 %v3078_v47, %v2101_v51 }
 0xa76   :  { %v2111_v53 = vpack.c.bf16 %v2106_v42, %v2106_v42 }
 0xa78   :  { %2145 = vmatmul.mubr.bf16.vlgmr.msra.gmra.mrb[104].mxu0 %v2111_v53  ;;  %2186 = vmatmul.mubr.bf16.vlgmr.msra.gmra.mrb[104].mxu1 %v2111_v53 }
 0xa79   :  { %2219 = vmatpush1.bf16.msra.mxu0 %v4457_v52  ;;  %2260 = vmatpush1.bf16.msra.mxu1 %v4460_v60 }
 0xa7a   :  { %2220 = vmatprep.subr.bf16.mxu0 %v4463_v2  ;;  %2261 = vmatprep.subr.bf16.mxu1 %v4466_v39 }
 0xa7b   :  { %2250 = vmatprep.mubr.bf16.mxu0 %v4873_v30  ;;  %2291 = vmatprep.mubr.bf16.mxu1 %v4873_v30 }
 0xa7d   :  { %2221 = vmatpush1.bf16.msra.mxu0 %v4471_v59  ;;  %2262 = vmatpush1.bf16.msra.mxu1 %v4474_v22 }
 0xa7e   :  { %2222 = vmatprep.subr.bf16.mxu0 %v4477_v50  ;;  %2263 = vmatprep.subr.bf16.mxu1 %v4480_v20 }
 0xa81   :  { %2223 = vmatpush1.bf16.msra.mxu0 %v4483_v28  ;;  %2264 = vmatpush1.bf16.msra.mxu1 %v4486_v40 }
 0xa82   :  { %2224 = vmatprep.subr.bf16.mxu0 %v4489_v16  ;;  %2265 = vmatprep.subr.bf16.mxu1 %v4492_v25 }
 0xa85   :  { %2225 = vmatpush1.bf16.msra.mxu0 %v4495_v8  ;;  %2266 = vmatpush1.bf16.msra.mxu1 %v4498_v7 }
 0xa86   :  { %2226 = vmatprep.subr.bf16.mxu0 %v4501_v11  ;;  %2267 = vmatprep.subr.bf16.mxu1 %v4504_v56 }
 0xa89   :  { %2227 = vmatpush1.bf16.msra.mxu0 %v4507_v34  ;;  %2268 = vmatpush1.bf16.msra.mxu1 %v4510_v55 }
 0xa8a   :  { %2228 = vmatprep.subr.bf16.mxu0 %v4513_v38  ;;  %2269 = vmatprep.subr.bf16.mxu1 %v4516_v45 }
 0xa8d   :  { %2229 = vmatpush1.bf16.msra.mxu0 %v4519_v18  ;;  %2270 = vmatpush1.bf16.msra.mxu1 %v4522_v58 }
 0xa8e   :  { %2230 = vmatprep.subr.bf16.mxu0 %v4525_v44  ;;  %2271 = vmatprep.subr.bf16.mxu1 %v4528_v48 }
 0xa91   :  { %2231 = vmatpush1.bf16.msra.mxu0 %v4531_v10  ;;  %2272 = vmatpush1.bf16.msra.mxu1 %v4534_v23 }
 0xa92   :  { %2232 = vmatprep.subr.bf16.mxu0 %v4537_v29  ;;  %2273 = vmatprep.subr.bf16.mxu1 %v4540_v0 }
 0xa95   :  { %2233 = vmatpush1.bf16.msra.mxu0 %v4543_v63  ;;  %2274 = vmatpush1.bf16.msra.mxu1 %v4546_v46 }
 0xa96   :  { %2324 = vmatprep.subr.bf16.mxu0 %v4443_v13  ;;  %2365 = vmatprep.subr.bf16.mxu1 %v4446_v57 }
 0xb4b   :  { %v2146_v31 = vpop.f32.mrb[104].mxu0  ;;  %v2187_v61 = vpop.f32.mrb[104].mxu1 }
 0xb4c   :  { %v2194_v17 = vadd.f32 %v2146_v31, %v4918_v15  ;;  %v2196_v62 = vadd.f32 %v2187_v61, %v4919_v4  ;;  %v2148_v54 = vpop.f32.mrb[105].mxu0  ;;  %v2189_v6 = vpop.f32.mrb[105].mxu1 }
 0xb4d   :  { %v2195_v3 = vadd.f32 %v2148_v54, %v4920_v43  ;;  %v2197_v1 = vadd.f32 %v2189_v6, %v4921_v36  ;;  %v2150_v27 = vpop.f32.mrb[106].mxu0  ;;  %v2191_v24 = vpop.f32.mrb[106].mxu1 }
 0xb4e   :  { %3079 = vtanh.f32 %v2194_v17  ;;  %v2151_v19 = vpop.f32.mrb[107].mxu0  ;;  %v2192_v21 = vpop.f32.mrb[107].mxu1  ;;  %v4922_v17 = vld [vmem:[#allocation71_spill] sm:$0xff] }
 0xb4f   :  { %3081 = vtanh.f32 %v2195_v3  ;;  %v4924_v3 = vld [vmem:[#allocation74_spill] sm:$0xff] }
 0xb50   :  { %3083 = vtanh.f32 %v2196_v62  ;;  %v4923_v62 = vld [vmem:[#allocation73_spill] sm:$0xff] }
 0xb51   :  { %3085 = vtanh.f32 %v2197_v1  ;;  %v4925_v1 = vld [vmem:[#allocation75_spill] sm:$0xff] }
 0xb58   :  { %v3080_v49 = vpop.eup %3079 }
 0xb59   :  { %v2202_v41 = vmul.f32 0.5, %v3080_v49  ;;  %v3082_v9 = vpop.eup %3081 }
 0xb5a   :  { %v2204_v12 = vmul.f32 0.5, %v3082_v9  ;;  %v3084_v14 = vpop.eup %3083 }
 0xb5b   :  { %v2203_v5 = vadd.f32 0.5, %v2202_v41  ;;  %v3086_v51 = vpop.eup %3085 }
 0xb5c   :  { %v2205_v37 = vadd.f32 0.5, %v2204_v12  ;;  %v2206_v47 = vmul.f32 0.5, %v3086_v51 }
 0xb5d   :  { %v2209_v26 = vmul.f32 %v3084_v14, %v2203_v5 }
 0xb5e   :  { %v2208_v32 = vmul.f32 %v2205_v37, %v4454_v35  ;;  %v2207_v42 = vadd.f32 0.5, %v2206_v47 }
 0xb60   :  { %v4556_v33 = vadd.f32 %v2209_v26, %v2208_v32 }
 0xb62   :  { %3087 = vtanh.f32 %v4556_v33 }
 0xb6c   :  { %v3088_v53 = vpop.eup %3087 }
 0xb6d   :  { %v2212_v31 = vmul.f32 %v3088_v53, %v2207_v42 }
 0xb6f   :  { %v2217_v61 = vpack.c.bf16 %v2212_v31, %v2212_v31 }
 0xb71   :  { %2251 = vmatmul.mubr.bf16.vlgmr.msra.gmra.mrb[108].mxu0 %v2217_v61  ;;  %2292 = vmatmul.mubr.bf16.vlgmr.msra.gmra.mrb[108].mxu1 %v2217_v61 }
 0xb72   :  { %2325 = vmatpush1.bf16.msra.mxu0 %v4457_v52  ;;  %2366 = vmatpush1.bf16.msra.mxu1 %v4460_v60 }
 0xb73   :  { %2326 = vmatprep.subr.bf16.mxu0 %v4463_v2  ;;  %2367 = vmatprep.subr.bf16.mxu1 %v4466_v39 }
 0xb74   :  { %2356 = vmatprep.mubr.bf16.mxu0 %v4873_v30  ;;  %2397 = vmatprep.mubr.bf16.mxu1 %v4873_v30 }
 0xb76   :  { %2327 = vmatpush1.bf16.msra.mxu0 %v4471_v59  ;;  %2368 = vmatpush1.bf16.msra.mxu1 %v4474_v22 }
 0xb77   :  { %2328 = vmatprep.subr.bf16.mxu0 %v4477_v50  ;;  %2369 = vmatprep.subr.bf16.mxu1 %v4480_v20 }
 0xb7a   :  { %2329 = vmatpush1.bf16.msra.mxu0 %v4483_v28  ;;  %2370 = vmatpush1.bf16.msra.mxu1 %v4486_v40 }
 0xb7b   :  { %2330 = vmatprep.subr.bf16.mxu0 %v4489_v16  ;;  %2371 = vmatprep.subr.bf16.mxu1 %v4492_v25 }
 0xb7e   :  { %2331 = vmatpush1.bf16.msra.mxu0 %v4495_v8  ;;  %2372 = vmatpush1.bf16.msra.mxu1 %v4498_v7 }
 0xb7f   :  { %2332 = vmatprep.subr.bf16.mxu0 %v4501_v11  ;;  %2373 = vmatprep.subr.bf16.mxu1 %v4504_v56 }
 0xb82   :  { %2333 = vmatpush1.bf16.msra.mxu0 %v4507_v34  ;;  %2374 = vmatpush1.bf16.msra.mxu1 %v4510_v55 }
 0xb83   :  { %2334 = vmatprep.subr.bf16.mxu0 %v4513_v38  ;;  %2375 = vmatprep.subr.bf16.mxu1 %v4516_v45 }
 0xb86   :  { %2335 = vmatpush1.bf16.msra.mxu0 %v4519_v18  ;;  %2376 = vmatpush1.bf16.msra.mxu1 %v4522_v58 }
 0xb87   :  { %2336 = vmatprep.subr.bf16.mxu0 %v4525_v44  ;;  %2377 = vmatprep.subr.bf16.mxu1 %v4528_v48 }
 0xb8a   :  { %2337 = vmatpush1.bf16.msra.mxu0 %v4531_v10  ;;  %2378 = vmatpush1.bf16.msra.mxu1 %v4534_v23 }
 0xb8b   :  { %2338 = vmatprep.subr.bf16.mxu0 %v4537_v29  ;;  %2379 = vmatprep.subr.bf16.mxu1 %v4540_v0 }
 0xb8e   :  { %2339 = vmatpush1.bf16.msra.mxu0 %v4543_v63  ;;  %2380 = vmatpush1.bf16.msra.mxu1 %v4546_v46 }
 0xb8f   :  { %2430 = vmatprep.subr.bf16.mxu0 %v4443_v13  ;;  %2471 = vmatprep.subr.bf16.mxu1 %v4446_v57 }
 0xc44   :  { %v2252_v35 = vpop.f32.mrb[108].mxu0  ;;  %v2293_v15 = vpop.f32.mrb[108].mxu1 }
 0xc45   :  { %v2300_v4 = vadd.f32 %v2252_v35, %v4922_v17  ;;  %v2302_v54 = vadd.f32 %v2293_v15, %v4923_v62  ;;  %v2254_v6 = vpop.f32.mrb[109].mxu0  ;;  %v2295_v43 = vpop.f32.mrb[109].mxu1 }
 0xc46   :  { %v2301_v36 = vadd.f32 %v2254_v6, %v4924_v3  ;;  %v2303_v27 = vadd.f32 %v2295_v43, %v4925_v1  ;;  %v2256_v24 = vpop.f32.mrb[110].mxu0  ;;  %v2297_v19 = vpop.f32.mrb[110].mxu1 }
 0xc47   :  { %3089 = vtanh.f32 %v2300_v4  ;;  %v2257_v21 = vpop.f32.mrb[111].mxu0  ;;  %v2298_v49 = vpop.f32.mrb[111].mxu1  ;;  %v4926_v4 = vld [vmem:[#allocation68_spill] sm:$0xff] }
 0xc48   :  { %3091 = vtanh.f32 %v2301_v36  ;;  %v4928_v36 = vld [vmem:[#allocation70_spill] sm:$0xff] }
 0xc49   :  { %3093 = vtanh.f32 %v2302_v54  ;;  %v4927_v54 = vld [vmem:[#allocation69_spill] sm:$0xff] }
 0xc4a   :  { %3095 = vtanh.f32 %v2303_v27  ;;  %v4929_v27 = vld [vmem:[#allocation72_spill] sm:$0xff] }
 0xc51   :  { %v3090_v41 = vpop.eup %3089 }
 0xc52   :  { %v2308_v9 = vmul.f32 0.5, %v3090_v41  ;;  %v3092_v5 = vpop.eup %3091 }
 0xc53   :  { %v2310_v14 = vmul.f32 0.5, %v3092_v5  ;;  %v3094_v37 = vpop.eup %3093 }
 0xc54   :  { %v2309_v12 = vadd.f32 0.5, %v2308_v9  ;;  %v3096_v42 = vpop.eup %3095 }
 0xc55   :  { %v2311_v26 = vadd.f32 0.5, %v2310_v14  ;;  %v2312_v53 = vmul.f32 0.5, %v3096_v42 }
 0xc56   :  { %v2315_v32 = vmul.f32 %v3094_v37, %v2309_v12 }
 0xc57   :  { %v2314_v51 = vmul.f32 %v2311_v26, %v4556_v33  ;;  %v2313_v31 = vadd.f32 0.5, %v2312_v53 }
 0xc59   :  { %v4598_v47 = vadd.f32 %v2315_v32, %v2314_v51 }
 0xc5b   :  { %3097 = vtanh.f32 %v4598_v47 }
 0xc65   :  { %v3098_v61 = vpop.eup %3097 }
 0xc66   :  { %v2318_v35 = vmul.f32 %v3098_v61, %v2313_v31 }
 0xc68   :  { %v2323_v15 = vpack.c.bf16 %v2318_v35, %v2318_v35 }
 0xc6a   :  { %2357 = vmatmul.mubr.bf16.vlgmr.msra.gmra.mrb[112].mxu0 %v2323_v15  ;;  %2398 = vmatmul.mubr.bf16.vlgmr.msra.gmra.mrb[112].mxu1 %v2323_v15 }
 0xc6b   :  { %2431 = vmatpush1.bf16.msra.mxu0 %v4457_v52  ;;  %2472 = vmatpush1.bf16.msra.mxu1 %v4460_v60 }
 0xc6c   :  { %2432 = vmatprep.subr.bf16.mxu0 %v4463_v2  ;;  %2473 = vmatprep.subr.bf16.mxu1 %v4466_v39 }
 0xc6d   :  { %2462 = vmatprep.mubr.bf16.mxu0 %v4873_v30  ;;  %2503 = vmatprep.mubr.bf16.mxu1 %v4873_v30 }
 0xc6f   :  { %2433 = vmatpush1.bf16.msra.mxu0 %v4471_v59  ;;  %2474 = vmatpush1.bf16.msra.mxu1 %v4474_v22 }
 0xc70   :  { %2434 = vmatprep.subr.bf16.mxu0 %v4477_v50  ;;  %2475 = vmatprep.subr.bf16.mxu1 %v4480_v20 }
 0xc73   :  { %2435 = vmatpush1.bf16.msra.mxu0 %v4483_v28  ;;  %2476 = vmatpush1.bf16.msra.mxu1 %v4486_v40 }
 0xc74   :  { %2436 = vmatprep.subr.bf16.mxu0 %v4489_v16  ;;  %2477 = vmatprep.subr.bf16.mxu1 %v4492_v25 }
 0xc77   :  { %2437 = vmatpush1.bf16.msra.mxu0 %v4495_v8  ;;  %2478 = vmatpush1.bf16.msra.mxu1 %v4498_v7 }
 0xc78   :  { %2438 = vmatprep.subr.bf16.mxu0 %v4501_v11  ;;  %2479 = vmatprep.subr.bf16.mxu1 %v4504_v56 }
 0xc7b   :  { %2439 = vmatpush1.bf16.msra.mxu0 %v4507_v34  ;;  %2480 = vmatpush1.bf16.msra.mxu1 %v4510_v55 }
 0xc7c   :  { %2440 = vmatprep.subr.bf16.mxu0 %v4513_v38  ;;  %2481 = vmatprep.subr.bf16.mxu1 %v4516_v45 }
 0xc7f   :  { %2441 = vmatpush1.bf16.msra.mxu0 %v4519_v18  ;;  %2482 = vmatpush1.bf16.msra.mxu1 %v4522_v58 }
 0xc80   :  { %2442 = vmatprep.subr.bf16.mxu0 %v4525_v44  ;;  %2483 = vmatprep.subr.bf16.mxu1 %v4528_v48 }
 0xc83   :  { %2443 = vmatpush1.bf16.msra.mxu0 %v4531_v10  ;;  %2484 = vmatpush1.bf16.msra.mxu1 %v4534_v23 }
 0xc84   :  { %2444 = vmatprep.subr.bf16.mxu0 %v4537_v29  ;;  %2485 = vmatprep.subr.bf16.mxu1 %v4540_v0 }
 0xc87   :  { %2445 = vmatpush1.bf16.msra.mxu0 %v4543_v63  ;;  %2486 = vmatpush1.bf16.msra.mxu1 %v4546_v46 }
 0xc88   :  { %2536 = vmatprep.subr.bf16.mxu0 %v4443_v13  ;;  %2577 = vmatprep.subr.bf16.mxu1 %v4446_v57 }
 0xd3d   :  { %v2358_v33 = vpop.f32.mrb[112].mxu0  ;;  %v2399_v17 = vpop.f32.mrb[112].mxu1 }
 0xd3e   :  { %v2406_v62 = vadd.f32 %v2358_v33, %v4926_v4  ;;  %v2408_v6 = vadd.f32 %v2399_v17, %v4927_v54  ;;  %v2360_v43 = vpop.f32.mrb[113].mxu0  ;;  %v2401_v3 = vpop.f32.mrb[113].mxu1  ;;  %v2971_v33 = vld [vmem:[%s4718_s4] sm:$0xff]   ;;  %v3248_v17 = vmov 0.0   ;;  %v2972_v4 = vld [vmem:[%s4718_s4 + $0x8] sm:$0xff]   ;;  %v2974_v54 = vld [vmem:[%s4718_s4 + $0x18] sm:$0xff]  }
 0xd3f   :  { %v2407_v1 = vadd.f32 %v2360_v43, %v4928_v36  ;;  %v2409_v24 = vadd.f32 %v2401_v3, %v4929_v27  ;;  %v2362_v19 = vpop.f32.mrb[114].mxu0  ;;  %v2403_v21 = vpop.f32.mrb[114].mxu1  ;;  %v2976_v43 = vld [vmem:[%s4718_s4 + $0x28] sm:$0xff]   ;;  %v2977_v3 = vld [vmem:[%s4718_s4 + $0x30] sm:$0xff]   ;;  %v2978_v36 = vld [vmem:[%s4718_s4 + $0x38] sm:$0xff]  }
 0xd40   :  { %3099 = vtanh.f32 %v2406_v62  ;;  %v2363_v49 = vpop.f32.mrb[115].mxu0  ;;  %v2404_v41 = vpop.f32.mrb[115].mxu1  ;;  %v2973_v62 = vld [vmem:[%s4718_s4 + $0x10] sm:$0xff]   ;;  %v4935_v21 = vld [vmem:[#allocation61_spill] sm:$0xff] }
 0xd41   :  { %3101 = vtanh.f32 %v2407_v1 }
 0xd42   :  { %3103 = vtanh.f32 %v2408_v6  ;;  %v2975_v6 = vld [vmem:[%s4718_s4 + $0x20] sm:$0xff]  }
 0xd43   :  { %3105 = vtanh.f32 %v2409_v24  ;;  %v4934_v24 = vld [vmem:[#allocation60_spill] sm:$0xff] }
 0xd4a   :  { %v3100_v13 = vpop.eup %3099 }
 0xd4b   :  { %v2414_v57 = vmul.f32 0.5, %v3100_v13  ;;  %v3102_v9 = vpop.eup %3101 }
 0xd4c   :  { %v2416_v12 = vmul.f32 0.5, %v3102_v9  ;;  %v3104_v14 = vpop.eup %3103 }
 0xd4d   :  { %v2415_v5 = vadd.f32 0.5, %v2414_v57  ;;  %v3106_v42 = vpop.eup %3105  ;;  %v4936_v57 = vld [vmem:[#allocation62_spill] sm:$0xff] }
 0xd4e   :  { %v2417_v37 = vadd.f32 0.5, %v2416_v12  ;;  %v2418_v53 = vmul.f32 0.5, %v3106_v42 }
 0xd4f   :  { %v2421_v26 = vmul.f32 %v3104_v14, %v2415_v5  ;;  %v4937_v5 = vld [vmem:[#allocation64_spill] sm:$0xff] }
 0xd50   :  { %v2420_v32 = vmul.f32 %v2417_v37, %v4598_v47  ;;  %v2419_v31 = vadd.f32 0.5, %v2418_v53 }
 0xd52   :  { %v4640_v51 = vadd.f32 %v2421_v26, %v2420_v32 }
 0xd54   :  { %3107 = vtanh.f32 %v4640_v51 }
 0xd5e   :  { %v3108_v61 = vpop.eup %3107 }
 0xd5f   :  { %v2424_v35 = vmul.f32 %v3108_v61, %v2419_v31 }
 0xd61   :  { %v2429_v15 = vpack.c.bf16 %v2424_v35, %v2424_v35 }
 0xd63   :  { %2463 = vmatmul.mubr.bf16.vlgmr.msra.gmra.mrb[116].mxu0 %v2429_v15  ;;  %2504 = vmatmul.mubr.bf16.vlgmr.msra.gmra.mrb[116].mxu1 %v2429_v15 }
 0xd64   :  { %2537 = vmatpush1.bf16.msra.mxu0 %v4457_v52  ;;  %2578 = vmatpush1.bf16.msra.mxu1 %v4460_v60  ;;  %v4930_v60 = vld [vmem:[#allocation63_spill] sm:$0xff] }
 0xd65   :  { %2538 = vmatprep.subr.bf16.mxu0 %v4463_v2  ;;  %2579 = vmatprep.subr.bf16.mxu1 %v4466_v39  ;;  %v4931_v39 = vld [vmem:[#allocation65_spill] sm:$0xff] }
 0xd66   :  { %2568 = vmatprep.mubr.bf16.mxu0 %v4873_v30  ;;  %2609 = vmatprep.mubr.bf16.mxu1 %v4873_v30 }
 0xd68   :  { %2539 = vmatpush1.bf16.msra.mxu0 %v4471_v59  ;;  %2580 = vmatpush1.bf16.msra.mxu1 %v4474_v22 }
 0xd69   :  { %2540 = vmatprep.subr.bf16.mxu0 %v4477_v50  ;;  %2581 = vmatprep.subr.bf16.mxu1 %v4480_v20  ;;  %v4932_v20 = vld [vmem:[#allocation66_spill] sm:$0xff] }
 0xd6c   :  { %2541 = vmatpush1.bf16.msra.mxu0 %v4483_v28  ;;  %2582 = vmatpush1.bf16.msra.mxu1 %v4486_v40  ;;  %v4933_v40 = vld [vmem:[#allocation67_spill] sm:$0xff] }
 0xd6d   :  { %2542 = vmatprep.subr.bf16.mxu0 %v4489_v16  ;;  %2583 = vmatprep.subr.bf16.mxu1 %v4492_v25 }
 0xd70   :  { %2543 = vmatpush1.bf16.msra.mxu0 %v4495_v8  ;;  %2584 = vmatpush1.bf16.msra.mxu1 %v4498_v7 }
 0xd71   :  { %2544 = vmatprep.subr.bf16.mxu0 %v4501_v11  ;;  %2585 = vmatprep.subr.bf16.mxu1 %v4504_v56 }
 0xd74   :  { %2545 = vmatpush1.bf16.msra.mxu0 %v4507_v34  ;;  %2586 = vmatpush1.bf16.msra.mxu1 %v4510_v55 }
 0xd75   :  { %2546 = vmatprep.subr.bf16.mxu0 %v4513_v38  ;;  %2587 = vmatprep.subr.bf16.mxu1 %v4516_v45 }
 0xd78   :  { %2547 = vmatpush1.bf16.msra.mxu0 %v4519_v18  ;;  %2588 = vmatpush1.bf16.msra.mxu1 %v4522_v58 }
 0xd79   :  { %2548 = vmatprep.subr.bf16.mxu0 %v4525_v44  ;;  %2589 = vmatprep.subr.bf16.mxu1 %v4528_v48 }
 0xd7c   :  { %2549 = vmatpush1.bf16.msra.mxu0 %v4531_v10  ;;  %2590 = vmatpush1.bf16.msra.mxu1 %v4534_v23 }
 0xd7d   :  { %2550 = vmatprep.subr.bf16.mxu0 %v4537_v29  ;;  %2591 = vmatprep.subr.bf16.mxu1 %v4540_v0 }
 0xd80   :  { %2551 = vmatpush1.bf16.msra.mxu0 %v4543_v63  ;;  %2592 = vmatpush1.bf16.msra.mxu1 %v4546_v46 }
 0xd81   :  { %2886 = vmatprep.subr.bf16.mxu0 %v3248_v17 }
 0xe36   :  { %v2464_v30 = vpop.f32.mrb[116].mxu0  ;;  %v2505_v52 = vpop.f32.mrb[116].mxu1 }
 0xe37   :  { %v2512_v2 = vadd.f32 %v2464_v30, %v4930_v60  ;;  %v2514_v59 = vadd.f32 %v2505_v52, %v4931_v39  ;;  %v2466_v22 = vpop.f32.mrb[117].mxu0  ;;  %v2507_v50 = vpop.f32.mrb[117].mxu1 }
 0xe38   :  { %v2513_v28 = vadd.f32 %v2466_v22, %v4932_v20  ;;  %v2515_v16 = vadd.f32 %v2507_v50, %v4933_v40  ;;  %v2468_v25 = vpop.f32.mrb[118].mxu0  ;;  %v2509_v8 = vpop.f32.mrb[118].mxu1 }
 0xe39   :  { %3109 = vtanh.f32 %v2512_v2  ;;  %v2469_v7 = vpop.f32.mrb[119].mxu0  ;;  %v2510_v11 = vpop.f32.mrb[119].mxu1 }
 0xe3a   :  { %3111 = vtanh.f32 %v2513_v28  ;;  %v2868_v28 = vld [vmem:[%s4719_s5] ss:$0 sm:$0xff] }
 0xe3b   :  { %3113 = vtanh.f32 %v2514_v59 }
 0xe3c   :  { %3115 = vtanh.f32 %v2515_v16 }
 0xe43   :  { %v3110_v56 = vpop.eup %3109 }
 0xe44   :  { %v2520_v34 = vmul.f32 0.5, %v3110_v56  ;;  %v3112_v55 = vpop.eup %3111 }
 0xe45   :  { %v2522_v45 = vmul.f32 0.5, %v3112_v55  ;;  %v3114_v18 = vpop.eup %3113 }
 0xe46   :  { %v2521_v38 = vadd.f32 0.5, %v2520_v34  ;;  %v3116_v23 = vpop.eup %3115 }
 0xe47   :  { %v2523_v58 = vadd.f32 0.5, %v2522_v45  ;;  %v2524_v29 = vmul.f32 0.5, %v3116_v23 }
 0xe48   :  { %v2527_v44 = vmul.f32 %v3114_v18, %v2521_v38 }
 0xe49   :  { %v2526_v48 = vmul.f32 %v2523_v58, %v4640_v51  ;;  %v2525_v0 = vadd.f32 0.5, %v2524_v29 }
 0xe4b   :  { %v2528_v10 = vadd.f32 %v2527_v44, %v2526_v48 }
 0xe4d   :  { %3117 = vtanh.f32 %v2528_v10 }
 0xe57   :  { %v3118_v63 = vpop.eup %3117 }
 0xe58   :  { %v2530_v46 = vmul.f32 %v3118_v63, %v2525_v0 }
 0xe5a   :  { %v2535_v47 = vpack.c.bf16 %v2530_v46, %v2530_v46 }
 0xe5c   :  { %2569 = vmatmul.mubr.bf16.vlgmr.msra.gmra.mrb[120].mxu0 %v2535_v47  ;;  %2610 = vmatmul.mubr.bf16.vlgmr.msra.gmra.mrb[120].mxu1 %v2535_v47 }
 0xe5d   :  { %2887 = vmatpush3.bf16.msra.mxu0 %v2971_v33  ;;  %2902 = vmatprep.mubr.msk.bf16.mxu0 %vm3249_vm1, %v3248_v17 }
 0xe5e   :  { %2888 = vmatprep.subr.bf16.mxu0 %v3248_v17 }
 0xe61   :  { %2889 = vmatpush3.bf16.msra.mxu0 %v2972_v4 }
 0xe62   :  { %2890 = vmatprep.subr.bf16.mxu0 %v3248_v17 }
 0xe65   :  { %2891 = vmatpush3.bf16.msra.mxu0 %v2973_v62 }
 0xe66   :  { %2892 = vmatprep.subr.bf16.mxu0 %v3248_v17 }
 0xe69   :  { %2893 = vmatpush3.bf16.msra.mxu0 %v2974_v54 }
 0xe6a   :  { %2894 = vmatprep.subr.bf16.mxu0 %v3248_v17 }
 0xe6d   :  { %2895 = vmatpush3.bf16.msra.mxu0 %v2975_v6 }
 0xe6e   :  { %2896 = vmatprep.subr.bf16.mxu0 %v3248_v17 }
 0xe71   :  { %2897 = vmatpush3.bf16.msra.mxu0 %v2976_v43 }
 0xe72   :  { %2898 = vmatprep.subr.bf16.mxu0 %v3248_v17 }
 0xe75   :  { %2899 = vmatpush3.bf16.msra.mxu0 %v2977_v3 }
 0xe76   :  { %2900 = vmatprep.subr.bf16.mxu0 %v3248_v17 }
 0xe79   :  { %2901 = vmatpush3.bf16.msra.mxu0 %v2978_v36 }
 0xf2f   :  { %v2570_v1 = vpop.f32.mrb[120].mxu0  ;;  %v2611_v27 = vpop.f32.mrb[120].mxu1 }
 0xf30   :  { %v2618_v19 = vadd.f32 %v2570_v1, %v4934_v24  ;;  %v2620_v49 = vadd.f32 %v2611_v27, %v4935_v21  ;;  %v2572_v41 = vpop.f32.mrb[121].mxu0  ;;  %v2613_v13 = vpop.f32.mrb[121].mxu1 }
 0xf31   :  { %v2619_v9 = vadd.f32 %v2572_v41, %v4936_v57  ;;  %v2621_v12 = vadd.f32 %v2613_v13, %v4937_v5  ;;  %v2574_v14 = vpop.f32.mrb[122].mxu0  ;;  %v2615_v37 = vpop.f32.mrb[122].mxu1 }
 0xf32   :  { %3119 = vtanh.f32 %v2618_v19  ;;  %v2575_v26 = vpop.f32.mrb[123].mxu0  ;;  %v2616_v32 = vpop.f32.mrb[123].mxu1 }
 0xf33   :  { %3121 = vtanh.f32 %v2619_v9 }
 0xf34   :  { %3123 = vtanh.f32 %v2620_v49 }
 0xf35   :  { %3125 = vtanh.f32 %v2621_v12 }
 0xf3c   :  { %v3120_v51 = vpop.eup %3119 }
 0xf3d   :  { %v2626_v42 = vmul.f32 0.5, %v3120_v51  ;;  %v3122_v53 = vpop.eup %3121 }
 0xf3e   :  { %v2628_v61 = vmul.f32 0.5, %v3122_v53  ;;  %v3124_v35 = vpop.eup %3123 }
 0xf3f   :  { %v2627_v31 = vadd.f32 0.5, %v2626_v42  ;;  %v3126_v2 = vpop.eup %3125 }
 0xf40   :  { %v2629_v15 = vadd.f32 0.5, %v2628_v61  ;;  %v2630_v39 = vmul.f32 0.5, %v3126_v2 }
 0xf41   :  { %v2633_v30 = vmul.f32 %v3124_v35, %v2627_v31 }
 0xf42   :  { %v2632_v52 = vmul.f32 %v2629_v15, %v2528_v10  ;;  %v2631_v59 = vadd.f32 0.5, %v2630_v39 }
 0xf44   :  { %v2634_v60 = vadd.f32 %v2633_v30, %v2632_v52 }
 0xf46   :  { %3127 = vtanh.f32 %v2634_v60 }
 0xf50   :  { %v3128_v22 = vpop.eup %3127 }
 0xf51   :  { %v2636_v50 = vmul.f32 %v3128_v22, %v2631_v59 }
 0xf53   :  { %v2637_v20 = vpack.c.bf16 %v2636_v50, %v2636_v50 }
 0xf55   :  { %2903 = vmatmul.mubr.bf16.vlgmr.msra.gmra.mrb[124].mxu0 %v2637_v20 }
0x1028   :  { %v2743_v40 = vpop.f32.mrb[124].mxu0 }
0x1029   :  { %v2744_v16 = vadd.f32 %v2868_v28, %v2743_v40  ;;  %v2904_v25 = vpop.f32.mrb[125].mxu0 }
0x102a   :  { %v2746_v8 = vpop.f32.mrb[126].mxu0 }
0x102b   :  { %2749 = vst [vmem:[%s4720_s6] sm:$0xff] %v2744_v16  ;;  %v2905_v7 = vpop.f32.mrb[127].mxu0 }
0x102c   :  { %2754 = vsyncpa [#allocation3], 1 }
0x102d   :  { %2755 = vsyncpa [#allocation5], 1 }

</bundles_post_ra>
